<compile_context>
chip_gen: v7x
topology: tpu7x:2x2x1
jax: 0.10.0
libtpu: 0.0.40
codegen_flags: <defaults>
</compile_context>

<pallas_src>
import functools

import jax
import jax.numpy as jnp
from jax.experimental import pallas as pl
from jax.experimental.pallas import tpu as pltpu


# ----------------------------------------------------------------------------
# Pallas kernel: 2-layer bidirectional LSTM, returns concat of final hidden
# states of every (layer, direction) pair, i.e. torch.cat([h_n[i] for i], dim=1).
# PyTorch gate ordering (i, f, g, o) and gate math are reproduced exactly.
#
# Weight packing (done in the wrapper):
#   wih0 : (E,  8H) = [W_ih_l0_fwd | W_ih_l0_bwd]   (pre-transposed)
#   wih1 : (2H, 8H) = [W_ih_l1_fwd | W_ih_l1_bwd]
#   b0   : (1,  8H) = [b_ih+b_hh fwd | b_ih+b_hh bwd]   (layer 0)
#   b1   : (1,  8H) = same for layer 1
#   whh*f / whh*b : (H, 4H) recurrent weights per direction (pre-transposed)
# ----------------------------------------------------------------------------
def textrnn_kernel(x_ref,                                    # (S*B, E) time-major flat
                   wih0_ref, whh0f_ref, whh0b_ref, b0_ref,   # layer 0 (packed dirs)
                   wih1_ref, whh1f_ref, whh1b_ref, b1_ref,   # layer 1 (packed dirs)
                   out_ref,                                   # (B, 4H)
                   *, seq_len, batch):
    S, B = seq_len, batch
    H = whh0f_ref.shape[0]
    f32 = jnp.float32

    def cell(gates, c):
        # gates: (B, 4H) = input-projection (bias folded) + h @ W_hh
        i_g = jax.nn.sigmoid(gates[:, 0:H])
        f_g = jax.nn.sigmoid(gates[:, H:2 * H])
        g_g = jnp.tanh(gates[:, 2 * H:3 * H])
        o_g = jax.nn.sigmoid(gates[:, 3 * H:4 * H])
        c_new = f_g * c + i_g * g_g
        h_new = o_g * jnp.tanh(c_new)
        return h_new, c_new

    zeros = jnp.zeros((B, H), f32)

    # ---- layer 0: one big input-projection matmul (M=S*B, N=8H), bias folded ----
    gin0 = jnp.dot(x_ref[...], wih0_ref[...], preferred_element_type=f32) + b0_ref[...]
    whh0f = whh0f_ref[...]
    whh0b = whh0b_ref[...]

    hf, cf, hb, cb = zeros, zeros, zeros, zeros
    hf_seq = [None] * S     # layer-0 fwd outputs, time-ordered
    hb_seq = [None] * S     # layer-0 bwd outputs, time-ordered
    # fused fwd/bwd recurrence, fully unrolled (static S): two independent
    # h @ W_hh dots per step pipeline through the MXU.
    for i in range(S):
        tb = S - 1 - i
        gf = gin0[i * B:(i + 1) * B, 0:4 * H] + jnp.dot(
            hf, whh0f, preferred_element_type=f32)
        gb = gin0[tb * B:(tb + 1) * B, 4 * H:8 * H] + jnp.dot(
            hb, whh0b, preferred_element_type=f32)
        hf, cf = cell(gf, cf)
        hb, cb = cell(gb, cb)
        hf_seq[i] = hf
        hb_seq[tb] = hb
    h_l0f, h_l0b = hf, hb

    # ---- layer 1 input projection: split W_ih1 by input half (fwd rows / bwd
    # rows) so no per-timestep concat is needed; bias folded; M=S*B, N=8H. ----
    hf_all = jnp.concatenate(hf_seq, axis=0)    # (S*B, H) time-major
    hb_all = jnp.concatenate(hb_seq, axis=0)    # (S*B, H) time-major
    gin1 = (jnp.dot(hf_all, wih1_ref[0:H, :], preferred_element_type=f32)
            + jnp.dot(hb_all, wih1_ref[H:2 * H, :], preferred_element_type=f32)
            + b1_ref[...])
    whh1f = whh1f_ref[...]
    whh1b = whh1b_ref[...]

    hf, cf, hb, cb = zeros, zeros, zeros, zeros
    for i in range(S):
        tb = S - 1 - i
        gf = gin1[i * B:(i + 1) * B, 0:4 * H] + jnp.dot(
            hf, whh1f, preferred_element_type=f32)
        gb = gin1[tb * B:(tb + 1) * B, 4 * H:8 * H] + jnp.dot(
            hb, whh1b, preferred_element_type=f32)
        hf, cf = cell(gf, cf)
        hb, cb = cell(gb, cb)
    h_l1f, h_l1b = hf, hb

    # torch.cat([h_n[i] for i in range(4)], dim=1) -> single lane-dense store
    out_ref[...] = jnp.concatenate([h_l0f, h_l0b, h_l1f, h_l1b], axis=-1)
    # TODO(synk): nn.Dropout(args.dropout) is identity at inference; training-mode
    # dropout (pltpu.prng_seed / prng_random_bits mask on h_n) is not implemented.
    # TODO(synk): args.multichannel second embedding (embedding2) branch not modeled.


# ----------------------------------------------------------------------------
# Wrapper: embedding lookup, permute, flatten and direction-packing in JAX;
# LSTM recurrence in the kernel.
# ----------------------------------------------------------------------------
@jax.jit
def textrnn_forward(tokens, params):
    emb = jnp.take(params["embedding"], tokens, axis=0)          # (B, S, E)
    x_seq = jnp.transpose(emb, (1, 0, 2)).astype(jnp.float32)    # (S, B, E)
    S, B, E = x_seq.shape
    H = params["l0f"][1].shape[0]
    x_flat = x_seq.reshape(S * B, E)                             # time-major flat

    # Pack fwd/bwd weights along the gate/output axis -> N = 8H matmuls.
    wih0 = jnp.concatenate([params["l0f"][0], params["l0b"][0]], axis=1)   # (E, 8H)
    b0 = jnp.concatenate([params["l0f"][2], params["l0b"][2]], axis=1)     # (1, 8H)
    wih1 = jnp.concatenate([params["l1f"][0], params["l1b"][0]], axis=1)   # (2H, 8H)
    b1 = jnp.concatenate([params["l1f"][2], params["l1b"][2]], axis=1)     # (1, 8H)

    args = [x_flat,
            wih0, params["l0f"][1], params["l0b"][1], b0,
            wih1, params["l1f"][1], params["l1b"][1], b1]

    vmem = pl.BlockSpec(memory_space=pltpu.MemorySpace.VMEM)
    out = pl.pallas_call(
        functools.partial(textrnn_kernel, seq_len=S, batch=B),
        out_shape=jax.ShapeDtypeStruct((B, 4 * H), jnp.float32),
        in_specs=[vmem] * len(args),
        out_specs=vmem,
        compiler_params=pltpu.CompilerParams(vmem_limit_bytes=32 * 1024 * 1024),
    )(*args)
    return out


# ----------------------------------------------------------------------------
# Deterministic parameter init (shapes from the module's __init__):
#   embedding (V, E); per (layer, dir): w_ih (in, 4H), w_hh (H, 4H), bias (1, 4H)
#   (weights stored pre-transposed vs. PyTorch's (4H, in); bias = b_ih + b_hh).
# ----------------------------------------------------------------------------
def init_params(key, vocab, emb_dim, hidden):
    keys = jax.random.split(key, 16)
    k = 1.0 / jnp.sqrt(hidden)
    params = {"embedding": jax.random.normal(keys[0], (vocab, emb_dim), jnp.float32)}
    layer_inputs = {"l0f": emb_dim, "l0b": emb_dim,
                    "l1f": 2 * hidden, "l1b": 2 * hidden}
    for idx, name in enumerate(("l0f", "l0b", "l1f", "l1b")):
        kw1, kw2, kb = jax.random.split(keys[idx + 1], 3)
        in_dim = layer_inputs[name]
        w_ih = jax.random.uniform(kw1, (in_dim, 4 * hidden), jnp.float32, -k, k)
        w_hh = jax.random.uniform(kw2, (hidden, 4 * hidden), jnp.float32, -k, k)
        b = jax.random.uniform(kb, (1, 4 * hidden), jnp.float32, -k, k)
        params[name] = (w_ih, w_hh, b)
    return params


# ----------------------------------------------------------------------------
# Pure-JAX reference (same math) for a correctness check.
# ----------------------------------------------------------------------------
def ref_forward(tokens, params):
    emb = jnp.take(params["embedding"], tokens, axis=0)
    x = jnp.transpose(emb, (1, 0, 2)).astype(jnp.float32)

    def run(x_seq, w_ih, w_hh, b, reverse):
        S_, B_, _ = x_seq.shape
        H_ = w_hh.shape[0]
        h = jnp.zeros((B_, H_), jnp.float32)
        c = jnp.zeros((B_, H_), jnp.float32)
        outs = [None] * S_
        t_order = range(S_ - 1, -1, -1) if reverse else range(S_)
        for t in t_order:
            gates = x_seq[t] @ w_ih + h @ w_hh + b
            i_g = jax.nn.sigmoid(gates[:, :H_])
            f_g = jax.nn.sigmoid(gates[:, H_:2 * H_])
            g_g = jnp.tanh(gates[:, 2 * H_:3 * H_])
            o_g = jax.nn.sigmoid(gates[:, 3 * H_:])
            c = f_g * c + i_g * g_g
            h = o_g * jnp.tanh(c)
            outs[t] = h
        return jnp.stack(outs, axis=0), h

    out0f, h0f = run(x, *params["l0f"], False)
    out0b, h0b = run(x, *params["l0b"], True)
    x1 = jnp.concatenate([out0f, out0b], axis=-1)
    _, h1f = run(x1, *params["l1f"], False)
    _, h1b = run(x1, *params["l1b"], True)
    return jnp.concatenate([h0f, h0b, h1f, h1b], axis=1)


if __name__ == "__main__":
    VOCAB, EMB, HIDDEN = 50, 16, 32
    BATCH, SEQ = 2, 8

    root = jax.random.PRNGKey(0)
    k_params, k_tokens = jax.random.split(root)
    params = init_params(k_params, VOCAB, EMB, HIDDEN)
    tokens = jax.random.randint(k_tokens, (BATCH, SEQ), 0, VOCAB, dtype=jnp.int32)

    out = textrnn_forward(tokens, params)
    out = jax.block_until_ready(out)

    assert out.shape == (BATCH, 4 * HIDDEN), out.shape
    ref = ref_forward(tokens, params)
    assert jnp.allclose(out, ref, atol=1e-4, rtol=1e-4), float(jnp.max(jnp.abs(out - ref)))

    print("KERNEL_OK")
</pallas_src>

<mosaic_0001>
module attributes {stable_mosaic.version = 11 : i64} {
  func.func @textrnn_kernel(%arg0: memref<16x16xf32, #tpu.memory_space<vmem>>, %arg1: memref<16x256xf32, #tpu.memory_space<vmem>>, %arg2: memref<32x128xf32, #tpu.memory_space<vmem>>, %arg3: memref<32x128xf32, #tpu.memory_space<vmem>>, %arg4: memref<1x256xf32, #tpu.memory_space<vmem>>, %arg5: memref<64x256xf32, #tpu.memory_space<vmem>>, %arg6: memref<32x128xf32, #tpu.memory_space<vmem>>, %arg7: memref<32x128xf32, #tpu.memory_space<vmem>>, %arg8: memref<1x256xf32, #tpu.memory_space<vmem>>, %arg9: memref<2x128xf32, #tpu.memory_space<vmem>>) attributes {dimension_semantics = [], scalar_prefetch = 0 : i64, scratch_operands = 0 : i64, tpu.core_type = #tpu.core_type<tc>} {
    %cst = arith.constant 0.000000e+00 : f32
    %0 = vector.broadcast %cst : f32 to vector<2x32xf32>
    %c0 = arith.constant 0 : index
    %c0_0 = arith.constant 0 : index
    %1 = vector.load %arg0[%c0, %c0_0] : memref<16x16xf32, #tpu.memory_space<vmem>>, vector<16x16xf32>
    %c0_1 = arith.constant 0 : index
    %c0_2 = arith.constant 0 : index
    %2 = vector.load %arg1[%c0_1, %c0_2] : memref<16x256xf32, #tpu.memory_space<vmem>>, vector<16x256xf32>
    %cst_3 = arith.constant dense<0.000000e+00> : vector<16x256xf32>
    %3 = tpu.matmul %1, %2, %cst_3 {dimension_numbers = #tpu.dot_dimension_numbers<[1], [0], [0], [1], [0, 0, 1, 1], [], []>} : vector<16x16xf32>, vector<16x256xf32>, vector<16x256xf32> -> vector<16x256xf32>
    %c0_4 = arith.constant 0 : index
    %c0_5 = arith.constant 0 : index
    %4 = vector.load %arg4[%c0_4, %c0_5] : memref<1x256xf32, #tpu.memory_space<vmem>>, vector<1x256xf32>
    %5 = vector.broadcast %4 : vector<1x256xf32> to vector<16x256xf32>
    %6 = arith.addf %3, %5 : vector<16x256xf32>
    %c0_6 = arith.constant 0 : index
    %c0_7 = arith.constant 0 : index
    %7 = vector.load %arg2[%c0_6, %c0_7] : memref<32x128xf32, #tpu.memory_space<vmem>>, vector<32x128xf32>
    %c0_8 = arith.constant 0 : index
    %c0_9 = arith.constant 0 : index
    %8 = vector.load %arg3[%c0_8, %c0_9] : memref<32x128xf32, #tpu.memory_space<vmem>>, vector<32x128xf32>
    %9 = vector.extract_strided_slice %6 {offsets = [0, 0], sizes = [2, 128], strides = [1, 1]} : vector<16x256xf32> to vector<2x128xf32>
    %cst_10 = arith.constant dense<0.000000e+00> : vector<2x128xf32>
    %10 = tpu.matmul %0, %7, %cst_10 {dimension_numbers = #tpu.dot_dimension_numbers<[1], [0], [0], [1], [0, 0, 1, 1], [], []>} : vector<2x32xf32>, vector<32x128xf32>, vector<2x128xf32> -> vector<2x128xf32>
    %11 = arith.addf %9, %10 : vector<2x128xf32>
    %12 = vector.extract_strided_slice %6 {offsets = [14, 128], sizes = [2, 128], strides = [1, 1]} : vector<16x256xf32> to vector<2x128xf32>
    %cst_11 = arith.constant dense<0.000000e+00> : vector<2x128xf32>
    %13 = tpu.matmul %0, %8, %cst_11 {dimension_numbers = #tpu.dot_dimension_numbers<[1], [0], [0], [1], [0, 0, 1, 1], [], []>} : vector<2x32xf32>, vector<32x128xf32>, vector<2x128xf32> -> vector<2x128xf32>
    %14 = arith.addf %12, %13 : vector<2x128xf32>
    %15 = vector.extract_strided_slice %11 {offsets = [0, 0], sizes = [2, 32], strides = [1, 1]} : vector<2x128xf32> to vector<2x32xf32>
    %16 = arith.negf %15 : vector<2x32xf32>
    %17 = math.exp %16 : vector<2x32xf32>
    %cst_12 = arith.constant 1.000000e+00 : f32
    %18 = vector.broadcast %cst_12 : f32 to vector<2x32xf32>
    %19 = arith.addf %18, %17 : vector<2x32xf32>
    %20 = arith.divf %18, %19 : vector<2x32xf32>
    %21 = vector.extract_strided_slice %11 {offsets = [0, 32], sizes = [2, 32], strides = [1, 1]} : vector<2x128xf32> to vector<2x32xf32>
    %22 = arith.negf %21 : vector<2x32xf32>
    %23 = math.exp %22 : vector<2x32xf32>
    %cst_13 = arith.constant 1.000000e+00 : f32
    %24 = vector.broadcast %cst_13 : f32 to vector<2x32xf32>
    %25 = arith.addf %24, %23 : vector<2x32xf32>
    %26 = arith.divf %24, %25 : vector<2x32xf32>
    %27 = vector.extract_strided_slice %11 {offsets = [0, 64], sizes = [2, 32], strides = [1, 1]} : vector<2x128xf32> to vector<2x32xf32>
    %28 = math.tanh %27 : vector<2x32xf32>
    %29 = vector.extract_strided_slice %11 {offsets = [0, 96], sizes = [2, 32], strides = [1, 1]} : vector<2x128xf32> to vector<2x32xf32>
    %30 = arith.negf %29 : vector<2x32xf32>
    %31 = math.exp %30 : vector<2x32xf32>
    %cst_14 = arith.constant 1.000000e+00 : f32
    %32 = vector.broadcast %cst_14 : f32 to vector<2x32xf32>
    %33 = arith.addf %32, %31 : vector<2x32xf32>
    %34 = arith.divf %32, %33 : vector<2x32xf32>
    %35 = arith.mulf %26, %0 : vector<2x32xf32>
    %36 = arith.mulf %20, %28 : vector<2x32xf32>
    %37 = arith.addf %35, %36 : vector<2x32xf32>
    %38 = math.tanh %37 : vector<2x32xf32>
    %39 = arith.mulf %34, %38 : vector<2x32xf32>
    %40 = vector.extract_strided_slice %14 {offsets = [0, 0], sizes = [2, 32], strides = [1, 1]} : vector<2x128xf32> to vector<2x32xf32>
    %41 = arith.negf %40 : vector<2x32xf32>
    %42 = math.exp %41 : vector<2x32xf32>
    %cst_15 = arith.constant 1.000000e+00 : f32
    %43 = vector.broadcast %cst_15 : f32 to vector<2x32xf32>
    %44 = arith.addf %43, %42 : vector<2x32xf32>
    %45 = arith.divf %43, %44 : vector<2x32xf32>
    %46 = vector.extract_strided_slice %14 {offsets = [0, 32], sizes = [2, 32], strides = [1, 1]} : vector<2x128xf32> to vector<2x32xf32>
    %47 = arith.negf %46 : vector<2x32xf32>
    %48 = math.exp %47 : vector<2x32xf32>
    %cst_16 = arith.constant 1.000000e+00 : f32
    %49 = vector.broadcast %cst_16 : f32 to vector<2x32xf32>
    %50 = arith.addf %49, %48 : vector<2x32xf32>
    %51 = arith.divf %49, %50 : vector<2x32xf32>
    %52 = vector.extract_strided_slice %14 {offsets = [0, 64], sizes = [2, 32], strides = [1, 1]} : vector<2x128xf32> to vector<2x32xf32>
    %53 = math.tanh %52 : vector<2x32xf32>
    %54 = vector.extract_strided_slice %14 {offsets = [0, 96], sizes = [2, 32], strides = [1, 1]} : vector<2x128xf32> to vector<2x32xf32>
    %55 = arith.negf %54 : vector<2x32xf32>
    %56 = math.exp %55 : vector<2x32xf32>
    %cst_17 = arith.constant 1.000000e+00 : f32
    %57 = vector.broadcast %cst_17 : f32 to vector<2x32xf32>
    %58 = arith.addf %57, %56 : vector<2x32xf32>
    %59 = arith.divf %57, %58 : vector<2x32xf32>
    %60 = arith.mulf %51, %0 : vector<2x32xf32>
    %61 = arith.mulf %45, %53 : vector<2x32xf32>
    %62 = arith.addf %60, %61 : vector<2x32xf32>
    %63 = math.tanh %62 : vector<2x32xf32>
    %64 = arith.mulf %59, %63 : vector<2x32xf32>
    %65 = vector.extract_strided_slice %6 {offsets = [2, 0], sizes = [2, 128], strides = [1, 1]} : vector<16x256xf32> to vector<2x128xf32>
    %cst_18 = arith.constant dense<0.000000e+00> : vector<2x128xf32>
    %66 = tpu.matmul %39, %7, %cst_18 {dimension_numbers = #tpu.dot_dimension_numbers<[1], [0], [0], [1], [0, 0, 1, 1], [], []>} : vector<2x32xf32>, vector<32x128xf32>, vector<2x128xf32> -> vector<2x128xf32>
    %67 = arith.addf %65, %66 : vector<2x128xf32>
    %68 = vector.extract_strided_slice %6 {offsets = [12, 128], sizes = [2, 128], strides = [1, 1]} : vector<16x256xf32> to vector<2x128xf32>
    %cst_19 = arith.constant dense<0.000000e+00> : vector<2x128xf32>
    %69 = tpu.matmul %64, %8, %cst_19 {dimension_numbers = #tpu.dot_dimension_numbers<[1], [0], [0], [1], [0, 0, 1, 1], [], []>} : vector<2x32xf32>, vector<32x128xf32>, vector<2x128xf32> -> vector<2x128xf32>
    %70 = arith.addf %68, %69 : vector<2x128xf32>
    %71 = vector.extract_strided_slice %67 {offsets = [0, 0], sizes = [2, 32], strides = [1, 1]} : vector<2x128xf32> to vector<2x32xf32>
    %72 = arith.negf %71 : vector<2x32xf32>
    %73 = math.exp %72 : vector<2x32xf32>
    %cst_20 = arith.constant 1.000000e+00 : f32
    %74 = vector.broadcast %cst_20 : f32 to vector<2x32xf32>
    %75 = arith.addf %74, %73 : vector<2x32xf32>
    %76 = arith.divf %74, %75 : vector<2x32xf32>
    %77 = vector.extract_strided_slice %67 {offsets = [0, 32], sizes = [2, 32], strides = [1, 1]} : vector<2x128xf32> to vector<2x32xf32>
    %78 = arith.negf %77 : vector<2x32xf32>
    %79 = math.exp %78 : vector<2x32xf32>
    %cst_21 = arith.constant 1.000000e+00 : f32
    %80 = vector.broadcast %cst_21 : f32 to vector<2x32xf32>
    %81 = arith.addf %80, %79 : vector<2x32xf32>
    %82 = arith.divf %80, %81 : vector<2x32xf32>
    %83 = vector.extract_strided_slice %67 {offsets = [0, 64], sizes = [2, 32], strides = [1, 1]} : vector<2x128xf32> to vector<2x32xf32>
    %84 = math.tanh %83 : vector<2x32xf32>
    %85 = vector.extract_strided_slice %67 {offsets = [0, 96], sizes = [2, 32], strides = [1, 1]} : vector<2x128xf32> to vector<2x32xf32>
    %86 = arith.negf %85 : vector<2x32xf32>
    %87 = math.exp %86 : vector<2x32xf32>
    %cst_22 = arith.constant 1.000000e+00 : f32
    %88 = vector.broadcast %cst_22 : f32 to vector<2x32xf32>
    %89 = arith.addf %88, %87 : vector<2x32xf32>
    %90 = arith.divf %88, %89 : vector<2x32xf32>
    %91 = arith.mulf %82, %37 : vector<2x32xf32>
    %92 = arith.mulf %76, %84 : vector<2x32xf32>
    %93 = arith.addf %91, %92 : vector<2x32xf32>
    %94 = math.tanh %93 : vector<2x32xf32>
    %95 = arith.mulf %90, %94 : vector<2x32xf32>
    %96 = vector.extract_strided_slice %70 {offsets = [0, 0], sizes = [2, 32], strides = [1, 1]} : vector<2x128xf32> to vector<2x32xf32>
    %97 = arith.negf %96 : vector<2x32xf32>
    %98 = math.exp %97 : vector<2x32xf32>
    %cst_23 = arith.constant 1.000000e+00 : f32
    %99 = vector.broadcast %cst_23 : f32 to vector<2x32xf32>
    %100 = arith.addf %99, %98 : vector<2x32xf32>
    %101 = arith.divf %99, %100 : vector<2x32xf32>
    %102 = vector.extract_strided_slice %70 {offsets = [0, 32], sizes = [2, 32], strides = [1, 1]} : vector<2x128xf32> to vector<2x32xf32>
    %103 = arith.negf %102 : vector<2x32xf32>
    %104 = math.exp %103 : vector<2x32xf32>
    %cst_24 = arith.constant 1.000000e+00 : f32
    %105 = vector.broadcast %cst_24 : f32 to vector<2x32xf32>
    %106 = arith.addf %105, %104 : vector<2x32xf32>
    %107 = arith.divf %105, %106 : vector<2x32xf32>
    %108 = vector.extract_strided_slice %70 {offsets = [0, 64], sizes = [2, 32], strides = [1, 1]} : vector<2x128xf32> to vector<2x32xf32>
    %109 = math.tanh %108 : vector<2x32xf32>
    %110 = vector.extract_strided_slice %70 {offsets = [0, 96], sizes = [2, 32], strides = [1, 1]} : vector<2x128xf32> to vector<2x32xf32>
    %111 = arith.negf %110 : vector<2x32xf32>
    %112 = math.exp %111 : vector<2x32xf32>
    %cst_25 = arith.constant 1.000000e+00 : f32
    %113 = vector.broadcast %cst_25 : f32 to vector<2x32xf32>
    %114 = arith.addf %113, %112 : vector<2x32xf32>
    %115 = arith.divf %113, %114 : vector<2x32xf32>
    %116 = arith.mulf %107, %62 : vector<2x32xf32>
    %117 = arith.mulf %101, %109 : vector<2x32xf32>
    %118 = arith.addf %116, %117 : vector<2x32xf32>
    %119 = math.tanh %118 : vector<2x32xf32>
    %120 = arith.mulf %115, %119 : vector<2x32xf32>
    %121 = vector.extract_strided_slice %6 {offsets = [4, 0], sizes = [2, 128], strides = [1, 1]} : vector<16x256xf32> to vector<2x128xf32>
    %cst_26 = arith.constant dense<0.000000e+00> : vector<2x128xf32>
    %122 = tpu.matmul %95, %7, %cst_26 {dimension_numbers = #tpu.dot_dimension_numbers<[1], [0], [0], [1], [0, 0, 1, 1], [], []>} : vector<2x32xf32>, vector<32x128xf32>, vector<2x128xf32> -> vector<2x128xf32>
    %123 = arith.addf %121, %122 : vector<2x128xf32>
    %124 = vector.extract_strided_slice %6 {offsets = [10, 128], sizes = [2, 128], strides = [1, 1]} : vector<16x256xf32> to vector<2x128xf32>
    %cst_27 = arith.constant dense<0.000000e+00> : vector<2x128xf32>
    %125 = tpu.matmul %120, %8, %cst_27 {dimension_numbers = #tpu.dot_dimension_numbers<[1], [0], [0], [1], [0, 0, 1, 1], [], []>} : vector<2x32xf32>, vector<32x128xf32>, vector<2x128xf32> -> vector<2x128xf32>
    %126 = arith.addf %124, %125 : vector<2x128xf32>
    %127 = vector.extract_strided_slice %123 {offsets = [0, 0], sizes = [2, 32], strides = [1, 1]} : vector<2x128xf32> to vector<2x32xf32>
    %128 = arith.negf %127 : vector<2x32xf32>
    %129 = math.exp %128 : vector<2x32xf32>
    %cst_28 = arith.constant 1.000000e+00 : f32
    %130 = vector.broadcast %cst_28 : f32 to vector<2x32xf32>
    %131 = arith.addf %130, %129 : vector<2x32xf32>
    %132 = arith.divf %130, %131 : vector<2x32xf32>
    %133 = vector.extract_strided_slice %123 {offsets = [0, 32], sizes = [2, 32], strides = [1, 1]} : vector<2x128xf32> to vector<2x32xf32>
    %134 = arith.negf %133 : vector<2x32xf32>
    %135 = math.exp %134 : vector<2x32xf32>
    %cst_29 = arith.constant 1.000000e+00 : f32
    %136 = vector.broadcast %cst_29 : f32 to vector<2x32xf32>
    %137 = arith.addf %136, %135 : vector<2x32xf32>
    %138 = arith.divf %136, %137 : vector<2x32xf32>
    %139 = vector.extract_strided_slice %123 {offsets = [0, 64], sizes = [2, 32], strides = [1, 1]} : vector<2x128xf32> to vector<2x32xf32>
    %140 = math.tanh %139 : vector<2x32xf32>
    %141 = vector.extract_strided_slice %123 {offsets = [0, 96], sizes = [2, 32], strides = [1, 1]} : vector<2x128xf32> to vector<2x32xf32>
    %142 = arith.negf %141 : vector<2x32xf32>
    %143 = math.exp %142 : vector<2x32xf32>
    %cst_30 = arith.constant 1.000000e+00 : f32
    %144 = vector.broadcast %cst_30 : f32 to vector<2x32xf32>
    %145 = arith.addf %144, %143 : vector<2x32xf32>
    %146 = arith.divf %144, %145 : vector<2x32xf32>
    %147 = arith.mulf %138, %93 : vector<2x32xf32>
    %148 = arith.mulf %132, %140 : vector<2x32xf32>
    %149 = arith.addf %147, %148 : vector<2x32xf32>
    %150 = math.tanh %149 : vector<2x32xf32>
    %151 = arith.mulf %146, %150 : vector<2x32xf32>
    %152 = vector.extract_strided_slice %126 {offsets = [0, 0], sizes = [2, 32], strides = [1, 1]} : vector<2x128xf32> to vector<2x32xf32>
    %153 = arith.negf %152 : vector<2x32xf32>
    %154 = math.exp %153 : vector<2x32xf32>
    %cst_31 = arith.constant 1.000000e+00 : f32
    %155 = vector.broadcast %cst_31 : f32 to vector<2x32xf32>
    %156 = arith.addf %155, %154 : vector<2x32xf32>
    %157 = arith.divf %155, %156 : vector<2x32xf32>
    %158 = vector.extract_strided_slice %126 {offsets = [0, 32], sizes = [2, 32], strides = [1, 1]} : vector<2x128xf32> to vector<2x32xf32>
    %159 = arith.negf %158 : vector<2x32xf32>
    %160 = math.exp %159 : vector<2x32xf32>
    %cst_32 = arith.constant 1.000000e+00 : f32
    %161 = vector.broadcast %cst_32 : f32 to vector<2x32xf32>
    %162 = arith.addf %161, %160 : vector<2x32xf32>
    %163 = arith.divf %161, %162 : vector<2x32xf32>
    %164 = vector.extract_strided_slice %126 {offsets = [0, 64], sizes = [2, 32], strides = [1, 1]} : vector<2x128xf32> to vector<2x32xf32>
    %165 = math.tanh %164 : vector<2x32xf32>
    %166 = vector.extract_strided_slice %126 {offsets = [0, 96], sizes = [2, 32], strides = [1, 1]} : vector<2x128xf32> to vector<2x32xf32>
    %167 = arith.negf %166 : vector<2x32xf32>
    %168 = math.exp %167 : vector<2x32xf32>
    %cst_33 = arith.constant 1.000000e+00 : f32
    %169 = vector.broadcast %cst_33 : f32 to vector<2x32xf32>
    %170 = arith.addf %169, %168 : vector<2x32xf32>
    %171 = arith.divf %169, %170 : vector<2x32xf32>
    %172 = arith.mulf %163, %118 : vector<2x32xf32>
    %173 = arith.mulf %157, %165 : vector<2x32xf32>
    %174 = arith.addf %172, %173 : vector<2x32xf32>
    %175 = math.tanh %174 : vector<2x32xf32>
    %176 = arith.mulf %171, %175 : vector<2x32xf32>
    %177 = vector.extract_strided_slice %6 {offsets = [6, 0], sizes = [2, 128], strides = [1, 1]} : vector<16x256xf32> to vector<2x128xf32>
    %cst_34 = arith.constant dense<0.000000e+00> : vector<2x128xf32>
    %178 = tpu.matmul %151, %7, %cst_34 {dimension_numbers = #tpu.dot_dimension_numbers<[1], [0], [0], [1], [0, 0, 1, 1], [], []>} : vector<2x32xf32>, vector<32x128xf32>, vector<2x128xf32> -> vector<2x128xf32>
    %179 = arith.addf %177, %178 : vector<2x128xf32>
    %180 = vector.extract_strided_slice %6 {offsets = [8, 128], sizes = [2, 128], strides = [1, 1]} : vector<16x256xf32> to vector<2x128xf32>
    %cst_35 = arith.constant dense<0.000000e+00> : vector<2x128xf32>
    %181 = tpu.matmul %176, %8, %cst_35 {dimension_numbers = #tpu.dot_dimension_numbers<[1], [0], [0], [1], [0, 0, 1, 1], [], []>} : vector<2x32xf32>, vector<32x128xf32>, vector<2x128xf32> -> vector<2x128xf32>
    %182 = arith.addf %180, %181 : vector<2x128xf32>
    %183 = vector.extract_strided_slice %179 {offsets = [0, 0], sizes = [2, 32], strides = [1, 1]} : vector<2x128xf32> to vector<2x32xf32>
    %184 = arith.negf %183 : vector<2x32xf32>
    %185 = math.exp %184 : vector<2x32xf32>
    %cst_36 = arith.constant 1.000000e+00 : f32
    %186 = vector.broadcast %cst_36 : f32 to vector<2x32xf32>
    %187 = arith.addf %186, %185 : vector<2x32xf32>
    %188 = arith.divf %186, %187 : vector<2x32xf32>
    %189 = vector.extract_strided_slice %179 {offsets = [0, 32], sizes = [2, 32], strides = [1, 1]} : vector<2x128xf32> to vector<2x32xf32>
    %190 = arith.negf %189 : vector<2x32xf32>
    %191 = math.exp %190 : vector<2x32xf32>
    %cst_37 = arith.constant 1.000000e+00 : f32
    %192 = vector.broadcast %cst_37 : f32 to vector<2x32xf32>
    %193 = arith.addf %192, %191 : vector<2x32xf32>
    %194 = arith.divf %192, %193 : vector<2x32xf32>
    %195 = vector.extract_strided_slice %179 {offsets = [0, 64], sizes = [2, 32], strides = [1, 1]} : vector<2x128xf32> to vector<2x32xf32>
    %196 = math.tanh %195 : vector<2x32xf32>
    %197 = vector.extract_strided_slice %179 {offsets = [0, 96], sizes = [2, 32], strides = [1, 1]} : vector<2x128xf32> to vector<2x32xf32>
    %198 = arith.negf %197 : vector<2x32xf32>
    %199 = math.exp %198 : vector<2x32xf32>
    %cst_38 = arith.constant 1.000000e+00 : f32
    %200 = vector.broadcast %cst_38 : f32 to vector<2x32xf32>
    %201 = arith.addf %200, %199 : vector<2x32xf32>
    %202 = arith.divf %200, %201 : vector<2x32xf32>
    %203 = arith.mulf %194, %149 : vector<2x32xf32>
    %204 = arith.mulf %188, %196 : vector<2x32xf32>
    %205 = arith.addf %203, %204 : vector<2x32xf32>
    %206 = math.tanh %205 : vector<2x32xf32>
    %207 = arith.mulf %202, %206 : vector<2x32xf32>
    %208 = vector.extract_strided_slice %182 {offsets = [0, 0], sizes = [2, 32], strides = [1, 1]} : vector<2x128xf32> to vector<2x32xf32>
    %209 = arith.negf %208 : vector<2x32xf32>
    %210 = math.exp %209 : vector<2x32xf32>
    %cst_39 = arith.constant 1.000000e+00 : f32
    %211 = vector.broadcast %cst_39 : f32 to vector<2x32xf32>
    %212 = arith.addf %211, %210 : vector<2x32xf32>
    %213 = arith.divf %211, %212 : vector<2x32xf32>
    %214 = vector.extract_strided_slice %182 {offsets = [0, 32], sizes = [2, 32], strides = [1, 1]} : vector<2x128xf32> to vector<2x32xf32>
    %215 = arith.negf %214 : vector<2x32xf32>
    %216 = math.exp %215 : vector<2x32xf32>
    %cst_40 = arith.constant 1.000000e+00 : f32
    %217 = vector.broadcast %cst_40 : f32 to vector<2x32xf32>
    %218 = arith.addf %217, %216 : vector<2x32xf32>
    %219 = arith.divf %217, %218 : vector<2x32xf32>
    %220 = vector.extract_strided_slice %182 {offsets = [0, 64], sizes = [2, 32], strides = [1, 1]} : vector<2x128xf32> to vector<2x32xf32>
    %221 = math.tanh %220 : vector<2x32xf32>
    %222 = vector.extract_strided_slice %182 {offsets = [0, 96], sizes = [2, 32], strides = [1, 1]} : vector<2x128xf32> to vector<2x32xf32>
    %223 = arith.negf %222 : vector<2x32xf32>
    %224 = math.exp %223 : vector<2x32xf32>
    %cst_41 = arith.constant 1.000000e+00 : f32
    %225 = vector.broadcast %cst_41 : f32 to vector<2x32xf32>
    %226 = arith.addf %225, %224 : vector<2x32xf32>
    %227 = arith.divf %225, %226 : vector<2x32xf32>
    %228 = arith.mulf %219, %174 : vector<2x32xf32>
    %229 = arith.mulf %213, %221 : vector<2x32xf32>
    %230 = arith.addf %228, %229 : vector<2x32xf32>
    %231 = math.tanh %230 : vector<2x32xf32>
    %232 = arith.mulf %227, %231 : vector<2x32xf32>
    %233 = vector.extract_strided_slice %6 {offsets = [8, 0], sizes = [2, 128], strides = [1, 1]} : vector<16x256xf32> to vector<2x128xf32>
    %cst_42 = arith.constant dense<0.000000e+00> : vector<2x128xf32>
    %234 = tpu.matmul %207, %7, %cst_42 {dimension_numbers = #tpu.dot_dimension_numbers<[1], [0], [0], [1], [0, 0, 1, 1], [], []>} : vector<2x32xf32>, vector<32x128xf32>, vector<2x128xf32> -> vector<2x128xf32>
    %235 = arith.addf %233, %234 : vector<2x128xf32>
    %236 = vector.extract_strided_slice %6 {offsets = [6, 128], sizes = [2, 128], strides = [1, 1]} : vector<16x256xf32> to vector<2x128xf32>
    %cst_43 = arith.constant dense<0.000000e+00> : vector<2x128xf32>
    %237 = tpu.matmul %232, %8, %cst_43 {dimension_numbers = #tpu.dot_dimension_numbers<[1], [0], [0], [1], [0, 0, 1, 1], [], []>} : vector<2x32xf32>, vector<32x128xf32>, vector<2x128xf32> -> vector<2x128xf32>
    %238 = arith.addf %236, %237 : vector<2x128xf32>
    %239 = vector.extract_strided_slice %235 {offsets = [0, 0], sizes = [2, 32], strides = [1, 1]} : vector<2x128xf32> to vector<2x32xf32>
    %240 = arith.negf %239 : vector<2x32xf32>
    %241 = math.exp %240 : vector<2x32xf32>
    %cst_44 = arith.constant 1.000000e+00 : f32
    %242 = vector.broadcast %cst_44 : f32 to vector<2x32xf32>
    %243 = arith.addf %242, %241 : vector<2x32xf32>
    %244 = arith.divf %242, %243 : vector<2x32xf32>
    %245 = vector.extract_strided_slice %235 {offsets = [0, 32], sizes = [2, 32], strides = [1, 1]} : vector<2x128xf32> to vector<2x32xf32>
    %246 = arith.negf %245 : vector<2x32xf32>
    %247 = math.exp %246 : vector<2x32xf32>
    %cst_45 = arith.constant 1.000000e+00 : f32
    %248 = vector.broadcast %cst_45 : f32 to vector<2x32xf32>
    %249 = arith.addf %248, %247 : vector<2x32xf32>
    %250 = arith.divf %248, %249 : vector<2x32xf32>
    %251 = vector.extract_strided_slice %235 {offsets = [0, 64], sizes = [2, 32], strides = [1, 1]} : vector<2x128xf32> to vector<2x32xf32>
    %252 = math.tanh %251 : vector<2x32xf32>
    %253 = vector.extract_strided_slice %235 {offsets = [0, 96], sizes = [2, 32], strides = [1, 1]} : vector<2x128xf32> to vector<2x32xf32>
    %254 = arith.negf %253 : vector<2x32xf32>
    %255 = math.exp %254 : vector<2x32xf32>
    %cst_46 = arith.constant 1.000000e+00 : f32
    %256 = vector.broadcast %cst_46 : f32 to vector<2x32xf32>
    %257 = arith.addf %256, %255 : vector<2x32xf32>
    %258 = arith.divf %256, %257 : vector<2x32xf32>
    %259 = arith.mulf %250, %205 : vector<2x32xf32>
    %260 = arith.mulf %244, %252 : vector<2x32xf32>
    %261 = arith.addf %259, %260 : vector<2x32xf32>
    %262 = math.tanh %261 : vector<2x32xf32>
    %263 = arith.mulf %258, %262 : vector<2x32xf32>
    %264 = vector.extract_strided_slice %238 {offsets = [0, 0], sizes = [2, 32], strides = [1, 1]} : vector<2x128xf32> to vector<2x32xf32>
    %265 = arith.negf %264 : vector<2x32xf32>
    %266 = math.exp %265 : vector<2x32xf32>
    %cst_47 = arith.constant 1.000000e+00 : f32
    %267 = vector.broadcast %cst_47 : f32 to vector<2x32xf32>
    %268 = arith.addf %267, %266 : vector<2x32xf32>
    %269 = arith.divf %267, %268 : vector<2x32xf32>
    %270 = vector.extract_strided_slice %238 {offsets = [0, 32], sizes = [2, 32], strides = [1, 1]} : vector<2x128xf32> to vector<2x32xf32>
    %271 = arith.negf %270 : vector<2x32xf32>
    %272 = math.exp %271 : vector<2x32xf32>
    %cst_48 = arith.constant 1.000000e+00 : f32
    %273 = vector.broadcast %cst_48 : f32 to vector<2x32xf32>
    %274 = arith.addf %273, %272 : vector<2x32xf32>
    %275 = arith.divf %273, %274 : vector<2x32xf32>
    %276 = vector.extract_strided_slice %238 {offsets = [0, 64], sizes = [2, 32], strides = [1, 1]} : vector<2x128xf32> to vector<2x32xf32>
    %277 = math.tanh %276 : vector<2x32xf32>
    %278 = vector.extract_strided_slice %238 {offsets = [0, 96], sizes = [2, 32], strides = [1, 1]} : vector<2x128xf32> to vector<2x32xf32>
    %279 = arith.negf %278 : vector<2x32xf32>
    %280 = math.exp %279 : vector<2x32xf32>
    %cst_49 = arith.constant 1.000000e+00 : f32
    %281 = vector.broadcast %cst_49 : f32 to vector<2x32xf32>
    %282 = arith.addf %281, %280 : vector<2x32xf32>
    %283 = arith.divf %281, %282 : vector<2x32xf32>
    %284 = arith.mulf %275, %230 : vector<2x32xf32>
    %285 = arith.mulf %269, %277 : vector<2x32xf32>
    %286 = arith.addf %284, %285 : vector<2x32xf32>
    %287 = math.tanh %286 : vector<2x32xf32>
    %288 = arith.mulf %283, %287 : vector<2x32xf32>
    %289 = vector.extract_strided_slice %6 {offsets = [10, 0], sizes = [2, 128], strides = [1, 1]} : vector<16x256xf32> to vector<2x128xf32>
    %cst_50 = arith.constant dense<0.000000e+00> : vector<2x128xf32>
    %290 = tpu.matmul %263, %7, %cst_50 {dimension_numbers = #tpu.dot_dimension_numbers<[1], [0], [0], [1], [0, 0, 1, 1], [], []>} : vector<2x32xf32>, vector<32x128xf32>, vector<2x128xf32> -> vector<2x128xf32>
    %291 = arith.addf %289, %290 : vector<2x128xf32>
    %292 = vector.extract_strided_slice %6 {offsets = [4, 128], sizes = [2, 128], strides = [1, 1]} : vector<16x256xf32> to vector<2x128xf32>
    %cst_51 = arith.constant dense<0.000000e+00> : vector<2x128xf32>
    %293 = tpu.matmul %288, %8, %cst_51 {dimension_numbers = #tpu.dot_dimension_numbers<[1], [0], [0], [1], [0, 0, 1, 1], [], []>} : vector<2x32xf32>, vector<32x128xf32>, vector<2x128xf32> -> vector<2x128xf32>
    %294 = arith.addf %292, %293 : vector<2x128xf32>
    %295 = vector.extract_strided_slice %291 {offsets = [0, 0], sizes = [2, 32], strides = [1, 1]} : vector<2x128xf32> to vector<2x32xf32>
    %296 = arith.negf %295 : vector<2x32xf32>
    %297 = math.exp %296 : vector<2x32xf32>
    %cst_52 = arith.constant 1.000000e+00 : f32
    %298 = vector.broadcast %cst_52 : f32 to vector<2x32xf32>
    %299 = arith.addf %298, %297 : vector<2x32xf32>
    %300 = arith.divf %298, %299 : vector<2x32xf32>
    %301 = vector.extract_strided_slice %291 {offsets = [0, 32], sizes = [2, 32], strides = [1, 1]} : vector<2x128xf32> to vector<2x32xf32>
    %302 = arith.negf %301 : vector<2x32xf32>
    %303 = math.exp %302 : vector<2x32xf32>
    %cst_53 = arith.constant 1.000000e+00 : f32
    %304 = vector.broadcast %cst_53 : f32 to vector<2x32xf32>
    %305 = arith.addf %304, %303 : vector<2x32xf32>
    %306 = arith.divf %304, %305 : vector<2x32xf32>
    %307 = vector.extract_strided_slice %291 {offsets = [0, 64], sizes = [2, 32], strides = [1, 1]} : vector<2x128xf32> to vector<2x32xf32>
    %308 = math.tanh %307 : vector<2x32xf32>
    %309 = vector.extract_strided_slice %291 {offsets = [0, 96], sizes = [2, 32], strides = [1, 1]} : vector<2x128xf32> to vector<2x32xf32>
    %310 = arith.negf %309 : vector<2x32xf32>
    %311 = math.exp %310 : vector<2x32xf32>
    %cst_54 = arith.constant 1.000000e+00 : f32
    %312 = vector.broadcast %cst_54 : f32 to vector<2x32xf32>
    %313 = arith.addf %312, %311 : vector<2x32xf32>
    %314 = arith.divf %312, %313 : vector<2x32xf32>
    %315 = arith.mulf %306, %261 : vector<2x32xf32>
    %316 = arith.mulf %300, %308 : vector<2x32xf32>
    %317 = arith.addf %315, %316 : vector<2x32xf32>
    %318 = math.tanh %317 : vector<2x32xf32>
    %319 = arith.mulf %314, %318 : vector<2x32xf32>
    %320 = vector.extract_strided_slice %294 {offsets = [0, 0], sizes = [2, 32], strides = [1, 1]} : vector<2x128xf32> to vector<2x32xf32>
    %321 = arith.negf %320 : vector<2x32xf32>
    %322 = math.exp %321 : vector<2x32xf32>
    %cst_55 = arith.constant 1.000000e+00 : f32
    %323 = vector.broadcast %cst_55 : f32 to vector<2x32xf32>
    %324 = arith.addf %323, %322 : vector<2x32xf32>
    %325 = arith.divf %323, %324 : vector<2x32xf32>
    %326 = vector.extract_strided_slice %294 {offsets = [0, 32], sizes = [2, 32], strides = [1, 1]} : vector<2x128xf32> to vector<2x32xf32>
    %327 = arith.negf %326 : vector<2x32xf32>
    %328 = math.exp %327 : vector<2x32xf32>
    %cst_56 = arith.constant 1.000000e+00 : f32
    %329 = vector.broadcast %cst_56 : f32 to vector<2x32xf32>
    %330 = arith.addf %329, %328 : vector<2x32xf32>
    %331 = arith.divf %329, %330 : vector<2x32xf32>
    %332 = vector.extract_strided_slice %294 {offsets = [0, 64], sizes = [2, 32], strides = [1, 1]} : vector<2x128xf32> to vector<2x32xf32>
    %333 = math.tanh %332 : vector<2x32xf32>
    %334 = vector.extract_strided_slice %294 {offsets = [0, 96], sizes = [2, 32], strides = [1, 1]} : vector<2x128xf32> to vector<2x32xf32>
    %335 = arith.negf %334 : vector<2x32xf32>
    %336 = math.exp %335 : vector<2x32xf32>
    %cst_57 = arith.constant 1.000000e+00 : f32
    %337 = vector.broadcast %cst_57 : f32 to vector<2x32xf32>
    %338 = arith.addf %337, %336 : vector<2x32xf32>
    %339 = arith.divf %337, %338 : vector<2x32xf32>
    %340 = arith.mulf %331, %286 : vector<2x32xf32>
    %341 = arith.mulf %325, %333 : vector<2x32xf32>
    %342 = arith.addf %340, %341 : vector<2x32xf32>
    %343 = math.tanh %342 : vector<2x32xf32>
    %344 = arith.mulf %339, %343 : vector<2x32xf32>
    %345 = vector.extract_strided_slice %6 {offsets = [12, 0], sizes = [2, 128], strides = [1, 1]} : vector<16x256xf32> to vector<2x128xf32>
    %cst_58 = arith.constant dense<0.000000e+00> : vector<2x128xf32>
    %346 = tpu.matmul %319, %7, %cst_58 {dimension_numbers = #tpu.dot_dimension_numbers<[1], [0], [0], [1], [0, 0, 1, 1], [], []>} : vector<2x32xf32>, vector<32x128xf32>, vector<2x128xf32> -> vector<2x128xf32>
    %347 = arith.addf %345, %346 : vector<2x128xf32>
    %348 = vector.extract_strided_slice %6 {offsets = [2, 128], sizes = [2, 128], strides = [1, 1]} : vector<16x256xf32> to vector<2x128xf32>
    %cst_59 = arith.constant dense<0.000000e+00> : vector<2x128xf32>
    %349 = tpu.matmul %344, %8, %cst_59 {dimension_numbers = #tpu.dot_dimension_numbers<[1], [0], [0], [1], [0, 0, 1, 1], [], []>} : vector<2x32xf32>, vector<32x128xf32>, vector<2x128xf32> -> vector<2x128xf32>
    %350 = arith.addf %348, %349 : vector<2x128xf32>
    %351 = vector.extract_strided_slice %347 {offsets = [0, 0], sizes = [2, 32], strides = [1, 1]} : vector<2x128xf32> to vector<2x32xf32>
    %352 = arith.negf %351 : vector<2x32xf32>
    %353 = math.exp %352 : vector<2x32xf32>
    %cst_60 = arith.constant 1.000000e+00 : f32
    %354 = vector.broadcast %cst_60 : f32 to vector<2x32xf32>
    %355 = arith.addf %354, %353 : vector<2x32xf32>
    %356 = arith.divf %354, %355 : vector<2x32xf32>
    %357 = vector.extract_strided_slice %347 {offsets = [0, 32], sizes = [2, 32], strides = [1, 1]} : vector<2x128xf32> to vector<2x32xf32>
    %358 = arith.negf %357 : vector<2x32xf32>
    %359 = math.exp %358 : vector<2x32xf32>
    %cst_61 = arith.constant 1.000000e+00 : f32
    %360 = vector.broadcast %cst_61 : f32 to vector<2x32xf32>
    %361 = arith.addf %360, %359 : vector<2x32xf32>
    %362 = arith.divf %360, %361 : vector<2x32xf32>
    %363 = vector.extract_strided_slice %347 {offsets = [0, 64], sizes = [2, 32], strides = [1, 1]} : vector<2x128xf32> to vector<2x32xf32>
    %364 = math.tanh %363 : vector<2x32xf32>
    %365 = vector.extract_strided_slice %347 {offsets = [0, 96], sizes = [2, 32], strides = [1, 1]} : vector<2x128xf32> to vector<2x32xf32>
    %366 = arith.negf %365 : vector<2x32xf32>
    %367 = math.exp %366 : vector<2x32xf32>
    %cst_62 = arith.constant 1.000000e+00 : f32
    %368 = vector.broadcast %cst_62 : f32 to vector<2x32xf32>
    %369 = arith.addf %368, %367 : vector<2x32xf32>
    %370 = arith.divf %368, %369 : vector<2x32xf32>
    %371 = arith.mulf %362, %317 : vector<2x32xf32>
    %372 = arith.mulf %356, %364 : vector<2x32xf32>
    %373 = arith.addf %371, %372 : vector<2x32xf32>
    %374 = math.tanh %373 : vector<2x32xf32>
    %375 = arith.mulf %370, %374 : vector<2x32xf32>
    %376 = vector.extract_strided_slice %350 {offsets = [0, 0], sizes = [2, 32], strides = [1, 1]} : vector<2x128xf32> to vector<2x32xf32>
    %377 = arith.negf %376 : vector<2x32xf32>
    %378 = math.exp %377 : vector<2x32xf32>
    %cst_63 = arith.constant 1.000000e+00 : f32
    %379 = vector.broadcast %cst_63 : f32 to vector<2x32xf32>
    %380 = arith.addf %379, %378 : vector<2x32xf32>
    %381 = arith.divf %379, %380 : vector<2x32xf32>
    %382 = vector.extract_strided_slice %350 {offsets = [0, 32], sizes = [2, 32], strides = [1, 1]} : vector<2x128xf32> to vector<2x32xf32>
    %383 = arith.negf %382 : vector<2x32xf32>
    %384 = math.exp %383 : vector<2x32xf32>
    %cst_64 = arith.constant 1.000000e+00 : f32
    %385 = vector.broadcast %cst_64 : f32 to vector<2x32xf32>
    %386 = arith.addf %385, %384 : vector<2x32xf32>
    %387 = arith.divf %385, %386 : vector<2x32xf32>
    %388 = vector.extract_strided_slice %350 {offsets = [0, 64], sizes = [2, 32], strides = [1, 1]} : vector<2x128xf32> to vector<2x32xf32>
    %389 = math.tanh %388 : vector<2x32xf32>
    %390 = vector.extract_strided_slice %350 {offsets = [0, 96], sizes = [2, 32], strides = [1, 1]} : vector<2x128xf32> to vector<2x32xf32>
    %391 = arith.negf %390 : vector<2x32xf32>
    %392 = math.exp %391 : vector<2x32xf32>
    %cst_65 = arith.constant 1.000000e+00 : f32
    %393 = vector.broadcast %cst_65 : f32 to vector<2x32xf32>
    %394 = arith.addf %393, %392 : vector<2x32xf32>
    %395 = arith.divf %393, %394 : vector<2x32xf32>
    %396 = arith.mulf %387, %342 : vector<2x32xf32>
    %397 = arith.mulf %381, %389 : vector<2x32xf32>
    %398 = arith.addf %396, %397 : vector<2x32xf32>
    %399 = math.tanh %398 : vector<2x32xf32>
    %400 = arith.mulf %395, %399 : vector<2x32xf32>
    %401 = vector.extract_strided_slice %6 {offsets = [14, 0], sizes = [2, 128], strides = [1, 1]} : vector<16x256xf32> to vector<2x128xf32>
    %cst_66 = arith.constant dense<0.000000e+00> : vector<2x128xf32>
    %402 = tpu.matmul %375, %7, %cst_66 {dimension_numbers = #tpu.dot_dimension_numbers<[1], [0], [0], [1], [0, 0, 1, 1], [], []>} : vector<2x32xf32>, vector<32x128xf32>, vector<2x128xf32> -> vector<2x128xf32>
    %403 = arith.addf %401, %402 : vector<2x128xf32>
    %404 = vector.extract_strided_slice %6 {offsets = [0, 128], sizes = [2, 128], strides = [1, 1]} : vector<16x256xf32> to vector<2x128xf32>
    %cst_67 = arith.constant dense<0.000000e+00> : vector<2x128xf32>
    %405 = tpu.matmul %400, %8, %cst_67 {dimension_numbers = #tpu.dot_dimension_numbers<[1], [0], [0], [1], [0, 0, 1, 1], [], []>} : vector<2x32xf32>, vector<32x128xf32>, vector<2x128xf32> -> vector<2x128xf32>
    %406 = arith.addf %404, %405 : vector<2x128xf32>
    %407 = vector.extract_strided_slice %403 {offsets = [0, 0], sizes = [2, 32], strides = [1, 1]} : vector<2x128xf32> to vector<2x32xf32>
    %408 = arith.negf %407 : vector<2x32xf32>
    %409 = math.exp %408 : vector<2x32xf32>
    %cst_68 = arith.constant 1.000000e+00 : f32
    %410 = vector.broadcast %cst_68 : f32 to vector<2x32xf32>
    %411 = arith.addf %410, %409 : vector<2x32xf32>
    %412 = arith.divf %410, %411 : vector<2x32xf32>
    %413 = vector.extract_strided_slice %403 {offsets = [0, 32], sizes = [2, 32], strides = [1, 1]} : vector<2x128xf32> to vector<2x32xf32>
    %414 = arith.negf %413 : vector<2x32xf32>
    %415 = math.exp %414 : vector<2x32xf32>
    %cst_69 = arith.constant 1.000000e+00 : f32
    %416 = vector.broadcast %cst_69 : f32 to vector<2x32xf32>
    %417 = arith.addf %416, %415 : vector<2x32xf32>
    %418 = arith.divf %416, %417 : vector<2x32xf32>
    %419 = vector.extract_strided_slice %403 {offsets = [0, 64], sizes = [2, 32], strides = [1, 1]} : vector<2x128xf32> to vector<2x32xf32>
    %420 = math.tanh %419 : vector<2x32xf32>
    %421 = vector.extract_strided_slice %403 {offsets = [0, 96], sizes = [2, 32], strides = [1, 1]} : vector<2x128xf32> to vector<2x32xf32>
    %422 = arith.negf %421 : vector<2x32xf32>
    %423 = math.exp %422 : vector<2x32xf32>
    %cst_70 = arith.constant 1.000000e+00 : f32
    %424 = vector.broadcast %cst_70 : f32 to vector<2x32xf32>
    %425 = arith.addf %424, %423 : vector<2x32xf32>
    %426 = arith.divf %424, %425 : vector<2x32xf32>
    %427 = arith.mulf %418, %373 : vector<2x32xf32>
    %428 = arith.mulf %412, %420 : vector<2x32xf32>
    %429 = arith.addf %427, %428 : vector<2x32xf32>
    %430 = math.tanh %429 : vector<2x32xf32>
    %431 = arith.mulf %426, %430 : vector<2x32xf32>
    %432 = vector.extract_strided_slice %406 {offsets = [0, 0], sizes = [2, 32], strides = [1, 1]} : vector<2x128xf32> to vector<2x32xf32>
    %433 = arith.negf %432 : vector<2x32xf32>
    %434 = math.exp %433 : vector<2x32xf32>
    %cst_71 = arith.constant 1.000000e+00 : f32
    %435 = vector.broadcast %cst_71 : f32 to vector<2x32xf32>
    %436 = arith.addf %435, %434 : vector<2x32xf32>
    %437 = arith.divf %435, %436 : vector<2x32xf32>
    %438 = vector.extract_strided_slice %406 {offsets = [0, 32], sizes = [2, 32], strides = [1, 1]} : vector<2x128xf32> to vector<2x32xf32>
    %439 = arith.negf %438 : vector<2x32xf32>
    %440 = math.exp %439 : vector<2x32xf32>
    %cst_72 = arith.constant 1.000000e+00 : f32
    %441 = vector.broadcast %cst_72 : f32 to vector<2x32xf32>
    %442 = arith.addf %441, %440 : vector<2x32xf32>
    %443 = arith.divf %441, %442 : vector<2x32xf32>
    %444 = vector.extract_strided_slice %406 {offsets = [0, 64], sizes = [2, 32], strides = [1, 1]} : vector<2x128xf32> to vector<2x32xf32>
    %445 = math.tanh %444 : vector<2x32xf32>
    %446 = vector.extract_strided_slice %406 {offsets = [0, 96], sizes = [2, 32], strides = [1, 1]} : vector<2x128xf32> to vector<2x32xf32>
    %447 = arith.negf %446 : vector<2x32xf32>
    %448 = math.exp %447 : vector<2x32xf32>
    %cst_73 = arith.constant 1.000000e+00 : f32
    %449 = vector.broadcast %cst_73 : f32 to vector<2x32xf32>
    %450 = arith.addf %449, %448 : vector<2x32xf32>
    %451 = arith.divf %449, %450 : vector<2x32xf32>
    %452 = arith.mulf %443, %398 : vector<2x32xf32>
    %453 = arith.mulf %437, %445 : vector<2x32xf32>
    %454 = arith.addf %452, %453 : vector<2x32xf32>
    %455 = math.tanh %454 : vector<2x32xf32>
    %456 = arith.mulf %451, %455 : vector<2x32xf32>
    %457 = tpu.concatenate %39, %95, %151, %207, %263, %319, %375, %431 in 0 : vector<2x32xf32>, vector<2x32xf32>, vector<2x32xf32>, vector<2x32xf32>, vector<2x32xf32>, vector<2x32xf32>, vector<2x32xf32>, vector<2x32xf32> -> vector<16x32xf32>
    %458 = tpu.concatenate %456, %400, %344, %288, %232, %176, %120, %64 in 0 : vector<2x32xf32>, vector<2x32xf32>, vector<2x32xf32>, vector<2x32xf32>, vector<2x32xf32>, vector<2x32xf32>, vector<2x32xf32>, vector<2x32xf32> -> vector<16x32xf32>
    %c0_74 = arith.constant 0 : index
    %c0_75 = arith.constant 0 : index
    %459 = vector.load %arg5[%c0_74, %c0_75] : memref<64x256xf32, #tpu.memory_space<vmem>>, vector<32x256xf32>
    %cst_76 = arith.constant dense<0.000000e+00> : vector<16x256xf32>
    %460 = tpu.matmul %457, %459, %cst_76 {dimension_numbers = #tpu.dot_dimension_numbers<[1], [0], [0], [1], [0, 0, 1, 1], [], []>} : vector<16x32xf32>, vector<32x256xf32>, vector<16x256xf32> -> vector<16x256xf32>
    %c32 = arith.constant 32 : index
    %c0_77 = arith.constant 0 : index
    %461 = vector.load %arg5[%c32, %c0_77] : memref<64x256xf32, #tpu.memory_space<vmem>>, vector<32x256xf32>
    %cst_78 = arith.constant dense<0.000000e+00> : vector<16x256xf32>
    %462 = tpu.matmul %458, %461, %cst_78 {dimension_numbers = #tpu.dot_dimension_numbers<[1], [0], [0], [1], [0, 0, 1, 1], [], []>} : vector<16x32xf32>, vector<32x256xf32>, vector<16x256xf32> -> vector<16x256xf32>
    %463 = arith.addf %460, %462 : vector<16x256xf32>
    %c0_79 = arith.constant 0 : index
    %c0_80 = arith.constant 0 : index
    %464 = vector.load %arg8[%c0_79, %c0_80] : memref<1x256xf32, #tpu.memory_space<vmem>>, vector<1x256xf32>
    %465 = vector.broadcast %464 : vector<1x256xf32> to vector<16x256xf32>
    %466 = arith.addf %463, %465 : vector<16x256xf32>
    %c0_81 = arith.constant 0 : index
    %c0_82 = arith.constant 0 : index
    %467 = vector.load %arg6[%c0_81, %c0_82] : memref<32x128xf32, #tpu.memory_space<vmem>>, vector<32x128xf32>
    %c0_83 = arith.constant 0 : index
    %c0_84 = arith.constant 0 : index
    %468 = vector.load %arg7[%c0_83, %c0_84] : memref<32x128xf32, #tpu.memory_space<vmem>>, vector<32x128xf32>
    %469 = vector.extract_strided_slice %466 {offsets = [0, 0], sizes = [2, 128], strides = [1, 1]} : vector<16x256xf32> to vector<2x128xf32>
    %cst_85 = arith.constant dense<0.000000e+00> : vector<2x128xf32>
    %470 = tpu.matmul %0, %467, %cst_85 {dimension_numbers = #tpu.dot_dimension_numbers<[1], [0], [0], [1], [0, 0, 1, 1], [], []>} : vector<2x32xf32>, vector<32x128xf32>, vector<2x128xf32> -> vector<2x128xf32>
    %471 = arith.addf %469, %470 : vector<2x128xf32>
    %472 = vector.extract_strided_slice %466 {offsets = [14, 128], sizes = [2, 128], strides = [1, 1]} : vector<16x256xf32> to vector<2x128xf32>
    %cst_86 = arith.constant dense<0.000000e+00> : vector<2x128xf32>
    %473 = tpu.matmul %0, %468, %cst_86 {dimension_numbers = #tpu.dot_dimension_numbers<[1], [0], [0], [1], [0, 0, 1, 1], [], []>} : vector<2x32xf32>, vector<32x128xf32>, vector<2x128xf32> -> vector<2x128xf32>
    %474 = arith.addf %472, %473 : vector<2x128xf32>
    %475 = vector.extract_strided_slice %471 {offsets = [0, 0], sizes = [2, 32], strides = [1, 1]} : vector<2x128xf32> to vector<2x32xf32>
    %476 = arith.negf %475 : vector<2x32xf32>
    %477 = math.exp %476 : vector<2x32xf32>
    %cst_87 = arith.constant 1.000000e+00 : f32
    %478 = vector.broadcast %cst_87 : f32 to vector<2x32xf32>
    %479 = arith.addf %478, %477 : vector<2x32xf32>
    %480 = arith.divf %478, %479 : vector<2x32xf32>
    %481 = vector.extract_strided_slice %471 {offsets = [0, 32], sizes = [2, 32], strides = [1, 1]} : vector<2x128xf32> to vector<2x32xf32>
    %482 = arith.negf %481 : vector<2x32xf32>
    %483 = math.exp %482 : vector<2x32xf32>
    %cst_88 = arith.constant 1.000000e+00 : f32
    %484 = vector.broadcast %cst_88 : f32 to vector<2x32xf32>
    %485 = arith.addf %484, %483 : vector<2x32xf32>
    %486 = arith.divf %484, %485 : vector<2x32xf32>
    %487 = vector.extract_strided_slice %471 {offsets = [0, 64], sizes = [2, 32], strides = [1, 1]} : vector<2x128xf32> to vector<2x32xf32>
    %488 = math.tanh %487 : vector<2x32xf32>
    %489 = vector.extract_strided_slice %471 {offsets = [0, 96], sizes = [2, 32], strides = [1, 1]} : vector<2x128xf32> to vector<2x32xf32>
    %490 = arith.negf %489 : vector<2x32xf32>
    %491 = math.exp %490 : vector<2x32xf32>
    %cst_89 = arith.constant 1.000000e+00 : f32
    %492 = vector.broadcast %cst_89 : f32 to vector<2x32xf32>
    %493 = arith.addf %492, %491 : vector<2x32xf32>
    %494 = arith.divf %492, %493 : vector<2x32xf32>
    %495 = arith.mulf %486, %0 : vector<2x32xf32>
    %496 = arith.mulf %480, %488 : vector<2x32xf32>
    %497 = arith.addf %495, %496 : vector<2x32xf32>
    %498 = math.tanh %497 : vector<2x32xf32>
    %499 = arith.mulf %494, %498 : vector<2x32xf32>
    %500 = vector.extract_strided_slice %474 {offsets = [0, 0], sizes = [2, 32], strides = [1, 1]} : vector<2x128xf32> to vector<2x32xf32>
    %501 = arith.negf %500 : vector<2x32xf32>
    %502 = math.exp %501 : vector<2x32xf32>
    %cst_90 = arith.constant 1.000000e+00 : f32
    %503 = vector.broadcast %cst_90 : f32 to vector<2x32xf32>
    %504 = arith.addf %503, %502 : vector<2x32xf32>
    %505 = arith.divf %503, %504 : vector<2x32xf32>
    %506 = vector.extract_strided_slice %474 {offsets = [0, 32], sizes = [2, 32], strides = [1, 1]} : vector<2x128xf32> to vector<2x32xf32>
    %507 = arith.negf %506 : vector<2x32xf32>
    %508 = math.exp %507 : vector<2x32xf32>
    %cst_91 = arith.constant 1.000000e+00 : f32
    %509 = vector.broadcast %cst_91 : f32 to vector<2x32xf32>
    %510 = arith.addf %509, %508 : vector<2x32xf32>
    %511 = arith.divf %509, %510 : vector<2x32xf32>
    %512 = vector.extract_strided_slice %474 {offsets = [0, 64], sizes = [2, 32], strides = [1, 1]} : vector<2x128xf32> to vector<2x32xf32>
    %513 = math.tanh %512 : vector<2x32xf32>
    %514 = vector.extract_strided_slice %474 {offsets = [0, 96], sizes = [2, 32], strides = [1, 1]} : vector<2x128xf32> to vector<2x32xf32>
    %515 = arith.negf %514 : vector<2x32xf32>
    %516 = math.exp %515 : vector<2x32xf32>
    %cst_92 = arith.constant 1.000000e+00 : f32
    %517 = vector.broadcast %cst_92 : f32 to vector<2x32xf32>
    %518 = arith.addf %517, %516 : vector<2x32xf32>
    %519 = arith.divf %517, %518 : vector<2x32xf32>
    %520 = arith.mulf %511, %0 : vector<2x32xf32>
    %521 = arith.mulf %505, %513 : vector<2x32xf32>
    %522 = arith.addf %520, %521 : vector<2x32xf32>
    %523 = math.tanh %522 : vector<2x32xf32>
    %524 = arith.mulf %519, %523 : vector<2x32xf32>
    %525 = vector.extract_strided_slice %466 {offsets = [2, 0], sizes = [2, 128], strides = [1, 1]} : vector<16x256xf32> to vector<2x128xf32>
    %cst_93 = arith.constant dense<0.000000e+00> : vector<2x128xf32>
    %526 = tpu.matmul %499, %467, %cst_93 {dimension_numbers = #tpu.dot_dimension_numbers<[1], [0], [0], [1], [0, 0, 1, 1], [], []>} : vector<2x32xf32>, vector<32x128xf32>, vector<2x128xf32> -> vector<2x128xf32>
    %527 = arith.addf %525, %526 : vector<2x128xf32>
    %528 = vector.extract_strided_slice %466 {offsets = [12, 128], sizes = [2, 128], strides = [1, 1]} : vector<16x256xf32> to vector<2x128xf32>
    %cst_94 = arith.constant dense<0.000000e+00> : vector<2x128xf32>
    %529 = tpu.matmul %524, %468, %cst_94 {dimension_numbers = #tpu.dot_dimension_numbers<[1], [0], [0], [1], [0, 0, 1, 1], [], []>} : vector<2x32xf32>, vector<32x128xf32>, vector<2x128xf32> -> vector<2x128xf32>
    %530 = arith.addf %528, %529 : vector<2x128xf32>
    %531 = vector.extract_strided_slice %527 {offsets = [0, 0], sizes = [2, 32], strides = [1, 1]} : vector<2x128xf32> to vector<2x32xf32>
    %532 = arith.negf %531 : vector<2x32xf32>
    %533 = math.exp %532 : vector<2x32xf32>
    %cst_95 = arith.constant 1.000000e+00 : f32
    %534 = vector.broadcast %cst_95 : f32 to vector<2x32xf32>
    %535 = arith.addf %534, %533 : vector<2x32xf32>
    %536 = arith.divf %534, %535 : vector<2x32xf32>
    %537 = vector.extract_strided_slice %527 {offsets = [0, 32], sizes = [2, 32], strides = [1, 1]} : vector<2x128xf32> to vector<2x32xf32>
    %538 = arith.negf %537 : vector<2x32xf32>
    %539 = math.exp %538 : vector<2x32xf32>
    %cst_96 = arith.constant 1.000000e+00 : f32
    %540 = vector.broadcast %cst_96 : f32 to vector<2x32xf32>
    %541 = arith.addf %540, %539 : vector<2x32xf32>
    %542 = arith.divf %540, %541 : vector<2x32xf32>
    %543 = vector.extract_strided_slice %527 {offsets = [0, 64], sizes = [2, 32], strides = [1, 1]} : vector<2x128xf32> to vector<2x32xf32>
    %544 = math.tanh %543 : vector<2x32xf32>
    %545 = vector.extract_strided_slice %527 {offsets = [0, 96], sizes = [2, 32], strides = [1, 1]} : vector<2x128xf32> to vector<2x32xf32>
    %546 = arith.negf %545 : vector<2x32xf32>
    %547 = math.exp %546 : vector<2x32xf32>
    %cst_97 = arith.constant 1.000000e+00 : f32
    %548 = vector.broadcast %cst_97 : f32 to vector<2x32xf32>
    %549 = arith.addf %548, %547 : vector<2x32xf32>
    %550 = arith.divf %548, %549 : vector<2x32xf32>
    %551 = arith.mulf %542, %497 : vector<2x32xf32>
    %552 = arith.mulf %536, %544 : vector<2x32xf32>
    %553 = arith.addf %551, %552 : vector<2x32xf32>
    %554 = math.tanh %553 : vector<2x32xf32>
    %555 = arith.mulf %550, %554 : vector<2x32xf32>
    %556 = vector.extract_strided_slice %530 {offsets = [0, 0], sizes = [2, 32], strides = [1, 1]} : vector<2x128xf32> to vector<2x32xf32>
    %557 = arith.negf %556 : vector<2x32xf32>
    %558 = math.exp %557 : vector<2x32xf32>
    %cst_98 = arith.constant 1.000000e+00 : f32
    %559 = vector.broadcast %cst_98 : f32 to vector<2x32xf32>
    %560 = arith.addf %559, %558 : vector<2x32xf32>
    %561 = arith.divf %559, %560 : vector<2x32xf32>
    %562 = vector.extract_strided_slice %530 {offsets = [0, 32], sizes = [2, 32], strides = [1, 1]} : vector<2x128xf32> to vector<2x32xf32>
    %563 = arith.negf %562 : vector<2x32xf32>
    %564 = math.exp %563 : vector<2x32xf32>
    %cst_99 = arith.constant 1.000000e+00 : f32
    %565 = vector.broadcast %cst_99 : f32 to vector<2x32xf32>
    %566 = arith.addf %565, %564 : vector<2x32xf32>
    %567 = arith.divf %565, %566 : vector<2x32xf32>
    %568 = vector.extract_strided_slice %530 {offsets = [0, 64], sizes = [2, 32], strides = [1, 1]} : vector<2x128xf32> to vector<2x32xf32>
    %569 = math.tanh %568 : vector<2x32xf32>
    %570 = vector.extract_strided_slice %530 {offsets = [0, 96], sizes = [2, 32], strides = [1, 1]} : vector<2x128xf32> to vector<2x32xf32>
    %571 = arith.negf %570 : vector<2x32xf32>
    %572 = math.exp %571 : vector<2x32xf32>
    %cst_100 = arith.constant 1.000000e+00 : f32
    %573 = vector.broadcast %cst_100 : f32 to vector<2x32xf32>
    %574 = arith.addf %573, %572 : vector<2x32xf32>
    %575 = arith.divf %573, %574 : vector<2x32xf32>
    %576 = arith.mulf %567, %522 : vector<2x32xf32>
    %577 = arith.mulf %561, %569 : vector<2x32xf32>
    %578 = arith.addf %576, %577 : vector<2x32xf32>
    %579 = math.tanh %578 : vector<2x32xf32>
    %580 = arith.mulf %575, %579 : vector<2x32xf32>
    %581 = vector.extract_strided_slice %466 {offsets = [4, 0], sizes = [2, 128], strides = [1, 1]} : vector<16x256xf32> to vector<2x128xf32>
    %cst_101 = arith.constant dense<0.000000e+00> : vector<2x128xf32>
    %582 = tpu.matmul %555, %467, %cst_101 {dimension_numbers = #tpu.dot_dimension_numbers<[1], [0], [0], [1], [0, 0, 1, 1], [], []>} : vector<2x32xf32>, vector<32x128xf32>, vector<2x128xf32> -> vector<2x128xf32>
    %583 = arith.addf %581, %582 : vector<2x128xf32>
    %584 = vector.extract_strided_slice %466 {offsets = [10, 128], sizes = [2, 128], strides = [1, 1]} : vector<16x256xf32> to vector<2x128xf32>
    %cst_102 = arith.constant dense<0.000000e+00> : vector<2x128xf32>
    %585 = tpu.matmul %580, %468, %cst_102 {dimension_numbers = #tpu.dot_dimension_numbers<[1], [0], [0], [1], [0, 0, 1, 1], [], []>} : vector<2x32xf32>, vector<32x128xf32>, vector<2x128xf32> -> vector<2x128xf32>
    %586 = arith.addf %584, %585 : vector<2x128xf32>
    %587 = vector.extract_strided_slice %583 {offsets = [0, 0], sizes = [2, 32], strides = [1, 1]} : vector<2x128xf32> to vector<2x32xf32>
    %588 = arith.negf %587 : vector<2x32xf32>
    %589 = math.exp %588 : vector<2x32xf32>
    %cst_103 = arith.constant 1.000000e+00 : f32
    %590 = vector.broadcast %cst_103 : f32 to vector<2x32xf32>
    %591 = arith.addf %590, %589 : vector<2x32xf32>
    %592 = arith.divf %590, %591 : vector<2x32xf32>
    %593 = vector.extract_strided_slice %583 {offsets = [0, 32], sizes = [2, 32], strides = [1, 1]} : vector<2x128xf32> to vector<2x32xf32>
    %594 = arith.negf %593 : vector<2x32xf32>
    %595 = math.exp %594 : vector<2x32xf32>
    %cst_104 = arith.constant 1.000000e+00 : f32
    %596 = vector.broadcast %cst_104 : f32 to vector<2x32xf32>
    %597 = arith.addf %596, %595 : vector<2x32xf32>
    %598 = arith.divf %596, %597 : vector<2x32xf32>
    %599 = vector.extract_strided_slice %583 {offsets = [0, 64], sizes = [2, 32], strides = [1, 1]} : vector<2x128xf32> to vector<2x32xf32>
    %600 = math.tanh %599 : vector<2x32xf32>
    %601 = vector.extract_strided_slice %583 {offsets = [0, 96], sizes = [2, 32], strides = [1, 1]} : vector<2x128xf32> to vector<2x32xf32>
    %602 = arith.negf %601 : vector<2x32xf32>
    %603 = math.exp %602 : vector<2x32xf32>
    %cst_105 = arith.constant 1.000000e+00 : f32
    %604 = vector.broadcast %cst_105 : f32 to vector<2x32xf32>
    %605 = arith.addf %604, %603 : vector<2x32xf32>
    %606 = arith.divf %604, %605 : vector<2x32xf32>
    %607 = arith.mulf %598, %553 : vector<2x32xf32>
    %608 = arith.mulf %592, %600 : vector<2x32xf32>
    %609 = arith.addf %607, %608 : vector<2x32xf32>
    %610 = math.tanh %609 : vector<2x32xf32>
    %611 = arith.mulf %606, %610 : vector<2x32xf32>
    %612 = vector.extract_strided_slice %586 {offsets = [0, 0], sizes = [2, 32], strides = [1, 1]} : vector<2x128xf32> to vector<2x32xf32>
    %613 = arith.negf %612 : vector<2x32xf32>
    %614 = math.exp %613 : vector<2x32xf32>
    %cst_106 = arith.constant 1.000000e+00 : f32
    %615 = vector.broadcast %cst_106 : f32 to vector<2x32xf32>
    %616 = arith.addf %615, %614 : vector<2x32xf32>
    %617 = arith.divf %615, %616 : vector<2x32xf32>
    %618 = vector.extract_strided_slice %586 {offsets = [0, 32], sizes = [2, 32], strides = [1, 1]} : vector<2x128xf32> to vector<2x32xf32>
    %619 = arith.negf %618 : vector<2x32xf32>
    %620 = math.exp %619 : vector<2x32xf32>
    %cst_107 = arith.constant 1.000000e+00 : f32
    %621 = vector.broadcast %cst_107 : f32 to vector<2x32xf32>
    %622 = arith.addf %621, %620 : vector<2x32xf32>
    %623 = arith.divf %621, %622 : vector<2x32xf32>
    %624 = vector.extract_strided_slice %586 {offsets = [0, 64], sizes = [2, 32], strides = [1, 1]} : vector<2x128xf32> to vector<2x32xf32>
    %625 = math.tanh %624 : vector<2x32xf32>
    %626 = vector.extract_strided_slice %586 {offsets = [0, 96], sizes = [2, 32], strides = [1, 1]} : vector<2x128xf32> to vector<2x32xf32>
    %627 = arith.negf %626 : vector<2x32xf32>
    %628 = math.exp %627 : vector<2x32xf32>
    %cst_108 = arith.constant 1.000000e+00 : f32
    %629 = vector.broadcast %cst_108 : f32 to vector<2x32xf32>
    %630 = arith.addf %629, %628 : vector<2x32xf32>
    %631 = arith.divf %629, %630 : vector<2x32xf32>
    %632 = arith.mulf %623, %578 : vector<2x32xf32>
    %633 = arith.mulf %617, %625 : vector<2x32xf32>
    %634 = arith.addf %632, %633 : vector<2x32xf32>
    %635 = math.tanh %634 : vector<2x32xf32>
    %636 = arith.mulf %631, %635 : vector<2x32xf32>
    %637 = vector.extract_strided_slice %466 {offsets = [6, 0], sizes = [2, 128], strides = [1, 1]} : vector<16x256xf32> to vector<2x128xf32>
    %cst_109 = arith.constant dense<0.000000e+00> : vector<2x128xf32>
    %638 = tpu.matmul %611, %467, %cst_109 {dimension_numbers = #tpu.dot_dimension_numbers<[1], [0], [0], [1], [0, 0, 1, 1], [], []>} : vector<2x32xf32>, vector<32x128xf32>, vector<2x128xf32> -> vector<2x128xf32>
    %639 = arith.addf %637, %638 : vector<2x128xf32>
    %640 = vector.extract_strided_slice %466 {offsets = [8, 128], sizes = [2, 128], strides = [1, 1]} : vector<16x256xf32> to vector<2x128xf32>
    %cst_110 = arith.constant dense<0.000000e+00> : vector<2x128xf32>
    %641 = tpu.matmul %636, %468, %cst_110 {dimension_numbers = #tpu.dot_dimension_numbers<[1], [0], [0], [1], [0, 0, 1, 1], [], []>} : vector<2x32xf32>, vector<32x128xf32>, vector<2x128xf32> -> vector<2x128xf32>
    %642 = arith.addf %640, %641 : vector<2x128xf32>
    %643 = vector.extract_strided_slice %639 {offsets = [0, 0], sizes = [2, 32], strides = [1, 1]} : vector<2x128xf32> to vector<2x32xf32>
    %644 = arith.negf %643 : vector<2x32xf32>
    %645 = math.exp %644 : vector<2x32xf32>
    %cst_111 = arith.constant 1.000000e+00 : f32
    %646 = vector.broadcast %cst_111 : f32 to vector<2x32xf32>
    %647 = arith.addf %646, %645 : vector<2x32xf32>
    %648 = arith.divf %646, %647 : vector<2x32xf32>
    %649 = vector.extract_strided_slice %639 {offsets = [0, 32], sizes = [2, 32], strides = [1, 1]} : vector<2x128xf32> to vector<2x32xf32>
    %650 = arith.negf %649 : vector<2x32xf32>
    %651 = math.exp %650 : vector<2x32xf32>
    %cst_112 = arith.constant 1.000000e+00 : f32
    %652 = vector.broadcast %cst_112 : f32 to vector<2x32xf32>
    %653 = arith.addf %652, %651 : vector<2x32xf32>
    %654 = arith.divf %652, %653 : vector<2x32xf32>
    %655 = vector.extract_strided_slice %639 {offsets = [0, 64], sizes = [2, 32], strides = [1, 1]} : vector<2x128xf32> to vector<2x32xf32>
    %656 = math.tanh %655 : vector<2x32xf32>
    %657 = vector.extract_strided_slice %639 {offsets = [0, 96], sizes = [2, 32], strides = [1, 1]} : vector<2x128xf32> to vector<2x32xf32>
    %658 = arith.negf %657 : vector<2x32xf32>
    %659 = math.exp %658 : vector<2x32xf32>
    %cst_113 = arith.constant 1.000000e+00 : f32
    %660 = vector.broadcast %cst_113 : f32 to vector<2x32xf32>
    %661 = arith.addf %660, %659 : vector<2x32xf32>
    %662 = arith.divf %660, %661 : vector<2x32xf32>
    %663 = arith.mulf %654, %609 : vector<2x32xf32>
    %664 = arith.mulf %648, %656 : vector<2x32xf32>
    %665 = arith.addf %663, %664 : vector<2x32xf32>
    %666 = math.tanh %665 : vector<2x32xf32>
    %667 = arith.mulf %662, %666 : vector<2x32xf32>
    %668 = vector.extract_strided_slice %642 {offsets = [0, 0], sizes = [2, 32], strides = [1, 1]} : vector<2x128xf32> to vector<2x32xf32>
    %669 = arith.negf %668 : vector<2x32xf32>
    %670 = math.exp %669 : vector<2x32xf32>
    %cst_114 = arith.constant 1.000000e+00 : f32
    %671 = vector.broadcast %cst_114 : f32 to vector<2x32xf32>
    %672 = arith.addf %671, %670 : vector<2x32xf32>
    %673 = arith.divf %671, %672 : vector<2x32xf32>
    %674 = vector.extract_strided_slice %642 {offsets = [0, 32], sizes = [2, 32], strides = [1, 1]} : vector<2x128xf32> to vector<2x32xf32>
    %675 = arith.negf %674 : vector<2x32xf32>
    %676 = math.exp %675 : vector<2x32xf32>
    %cst_115 = arith.constant 1.000000e+00 : f32
    %677 = vector.broadcast %cst_115 : f32 to vector<2x32xf32>
    %678 = arith.addf %677, %676 : vector<2x32xf32>
    %679 = arith.divf %677, %678 : vector<2x32xf32>
    %680 = vector.extract_strided_slice %642 {offsets = [0, 64], sizes = [2, 32], strides = [1, 1]} : vector<2x128xf32> to vector<2x32xf32>
    %681 = math.tanh %680 : vector<2x32xf32>
    %682 = vector.extract_strided_slice %642 {offsets = [0, 96], sizes = [2, 32], strides = [1, 1]} : vector<2x128xf32> to vector<2x32xf32>
    %683 = arith.negf %682 : vector<2x32xf32>
    %684 = math.exp %683 : vector<2x32xf32>
    %cst_116 = arith.constant 1.000000e+00 : f32
    %685 = vector.broadcast %cst_116 : f32 to vector<2x32xf32>
    %686 = arith.addf %685, %684 : vector<2x32xf32>
    %687 = arith.divf %685, %686 : vector<2x32xf32>
    %688 = arith.mulf %679, %634 : vector<2x32xf32>
    %689 = arith.mulf %673, %681 : vector<2x32xf32>
    %690 = arith.addf %688, %689 : vector<2x32xf32>
    %691 = math.tanh %690 : vector<2x32xf32>
    %692 = arith.mulf %687, %691 : vector<2x32xf32>
    %693 = vector.extract_strided_slice %466 {offsets = [8, 0], sizes = [2, 128], strides = [1, 1]} : vector<16x256xf32> to vector<2x128xf32>
    %cst_117 = arith.constant dense<0.000000e+00> : vector<2x128xf32>
    %694 = tpu.matmul %667, %467, %cst_117 {dimension_numbers = #tpu.dot_dimension_numbers<[1], [0], [0], [1], [0, 0, 1, 1], [], []>} : vector<2x32xf32>, vector<32x128xf32>, vector<2x128xf32> -> vector<2x128xf32>
    %695 = arith.addf %693, %694 : vector<2x128xf32>
    %696 = vector.extract_strided_slice %466 {offsets = [6, 128], sizes = [2, 128], strides = [1, 1]} : vector<16x256xf32> to vector<2x128xf32>
    %cst_118 = arith.constant dense<0.000000e+00> : vector<2x128xf32>
    %697 = tpu.matmul %692, %468, %cst_118 {dimension_numbers = #tpu.dot_dimension_numbers<[1], [0], [0], [1], [0, 0, 1, 1], [], []>} : vector<2x32xf32>, vector<32x128xf32>, vector<2x128xf32> -> vector<2x128xf32>
    %698 = arith.addf %696, %697 : vector<2x128xf32>
    %699 = vector.extract_strided_slice %695 {offsets = [0, 0], sizes = [2, 32], strides = [1, 1]} : vector<2x128xf32> to vector<2x32xf32>
    %700 = arith.negf %699 : vector<2x32xf32>
    %701 = math.exp %700 : vector<2x32xf32>
    %cst_119 = arith.constant 1.000000e+00 : f32
    %702 = vector.broadcast %cst_119 : f32 to vector<2x32xf32>
    %703 = arith.addf %702, %701 : vector<2x32xf32>
    %704 = arith.divf %702, %703 : vector<2x32xf32>
    %705 = vector.extract_strided_slice %695 {offsets = [0, 32], sizes = [2, 32], strides = [1, 1]} : vector<2x128xf32> to vector<2x32xf32>
    %706 = arith.negf %705 : vector<2x32xf32>
    %707 = math.exp %706 : vector<2x32xf32>
    %cst_120 = arith.constant 1.000000e+00 : f32
    %708 = vector.broadcast %cst_120 : f32 to vector<2x32xf32>
    %709 = arith.addf %708, %707 : vector<2x32xf32>
    %710 = arith.divf %708, %709 : vector<2x32xf32>
    %711 = vector.extract_strided_slice %695 {offsets = [0, 64], sizes = [2, 32], strides = [1, 1]} : vector<2x128xf32> to vector<2x32xf32>
    %712 = math.tanh %711 : vector<2x32xf32>
    %713 = vector.extract_strided_slice %695 {offsets = [0, 96], sizes = [2, 32], strides = [1, 1]} : vector<2x128xf32> to vector<2x32xf32>
    %714 = arith.negf %713 : vector<2x32xf32>
    %715 = math.exp %714 : vector<2x32xf32>
    %cst_121 = arith.constant 1.000000e+00 : f32
    %716 = vector.broadcast %cst_121 : f32 to vector<2x32xf32>
    %717 = arith.addf %716, %715 : vector<2x32xf32>
    %718 = arith.divf %716, %717 : vector<2x32xf32>
    %719 = arith.mulf %710, %665 : vector<2x32xf32>
    %720 = arith.mulf %704, %712 : vector<2x32xf32>
    %721 = arith.addf %719, %720 : vector<2x32xf32>
    %722 = math.tanh %721 : vector<2x32xf32>
    %723 = arith.mulf %718, %722 : vector<2x32xf32>
    %724 = vector.extract_strided_slice %698 {offsets = [0, 0], sizes = [2, 32], strides = [1, 1]} : vector<2x128xf32> to vector<2x32xf32>
    %725 = arith.negf %724 : vector<2x32xf32>
    %726 = math.exp %725 : vector<2x32xf32>
    %cst_122 = arith.constant 1.000000e+00 : f32
    %727 = vector.broadcast %cst_122 : f32 to vector<2x32xf32>
    %728 = arith.addf %727, %726 : vector<2x32xf32>
    %729 = arith.divf %727, %728 : vector<2x32xf32>
    %730 = vector.extract_strided_slice %698 {offsets = [0, 32], sizes = [2, 32], strides = [1, 1]} : vector<2x128xf32> to vector<2x32xf32>
    %731 = arith.negf %730 : vector<2x32xf32>
    %732 = math.exp %731 : vector<2x32xf32>
    %cst_123 = arith.constant 1.000000e+00 : f32
    %733 = vector.broadcast %cst_123 : f32 to vector<2x32xf32>
    %734 = arith.addf %733, %732 : vector<2x32xf32>
    %735 = arith.divf %733, %734 : vector<2x32xf32>
    %736 = vector.extract_strided_slice %698 {offsets = [0, 64], sizes = [2, 32], strides = [1, 1]} : vector<2x128xf32> to vector<2x32xf32>
    %737 = math.tanh %736 : vector<2x32xf32>
    %738 = vector.extract_strided_slice %698 {offsets = [0, 96], sizes = [2, 32], strides = [1, 1]} : vector<2x128xf32> to vector<2x32xf32>
    %739 = arith.negf %738 : vector<2x32xf32>
    %740 = math.exp %739 : vector<2x32xf32>
    %cst_124 = arith.constant 1.000000e+00 : f32
    %741 = vector.broadcast %cst_124 : f32 to vector<2x32xf32>
    %742 = arith.addf %741, %740 : vector<2x32xf32>
    %743 = arith.divf %741, %742 : vector<2x32xf32>
    %744 = arith.mulf %735, %690 : vector<2x32xf32>
    %745 = arith.mulf %729, %737 : vector<2x32xf32>
    %746 = arith.addf %744, %745 : vector<2x32xf32>
    %747 = math.tanh %746 : vector<2x32xf32>
    %748 = arith.mulf %743, %747 : vector<2x32xf32>
    %749 = vector.extract_strided_slice %466 {offsets = [10, 0], sizes = [2, 128], strides = [1, 1]} : vector<16x256xf32> to vector<2x128xf32>
    %cst_125 = arith.constant dense<0.000000e+00> : vector<2x128xf32>
    %750 = tpu.matmul %723, %467, %cst_125 {dimension_numbers = #tpu.dot_dimension_numbers<[1], [0], [0], [1], [0, 0, 1, 1], [], []>} : vector<2x32xf32>, vector<32x128xf32>, vector<2x128xf32> -> vector<2x128xf32>
    %751 = arith.addf %749, %750 : vector<2x128xf32>
    %752 = vector.extract_strided_slice %466 {offsets = [4, 128], sizes = [2, 128], strides = [1, 1]} : vector<16x256xf32> to vector<2x128xf32>
    %cst_126 = arith.constant dense<0.000000e+00> : vector<2x128xf32>
    %753 = tpu.matmul %748, %468, %cst_126 {dimension_numbers = #tpu.dot_dimension_numbers<[1], [0], [0], [1], [0, 0, 1, 1], [], []>} : vector<2x32xf32>, vector<32x128xf32>, vector<2x128xf32> -> vector<2x128xf32>
    %754 = arith.addf %752, %753 : vector<2x128xf32>
    %755 = vector.extract_strided_slice %751 {offsets = [0, 0], sizes = [2, 32], strides = [1, 1]} : vector<2x128xf32> to vector<2x32xf32>
    %756 = arith.negf %755 : vector<2x32xf32>
    %757 = math.exp %756 : vector<2x32xf32>
    %cst_127 = arith.constant 1.000000e+00 : f32
    %758 = vector.broadcast %cst_127 : f32 to vector<2x32xf32>
    %759 = arith.addf %758, %757 : vector<2x32xf32>
    %760 = arith.divf %758, %759 : vector<2x32xf32>
    %761 = vector.extract_strided_slice %751 {offsets = [0, 32], sizes = [2, 32], strides = [1, 1]} : vector<2x128xf32> to vector<2x32xf32>
    %762 = arith.negf %761 : vector<2x32xf32>
    %763 = math.exp %762 : vector<2x32xf32>
    %cst_128 = arith.constant 1.000000e+00 : f32
    %764 = vector.broadcast %cst_128 : f32 to vector<2x32xf32>
    %765 = arith.addf %764, %763 : vector<2x32xf32>
    %766 = arith.divf %764, %765 : vector<2x32xf32>
    %767 = vector.extract_strided_slice %751 {offsets = [0, 64], sizes = [2, 32], strides = [1, 1]} : vector<2x128xf32> to vector<2x32xf32>
    %768 = math.tanh %767 : vector<2x32xf32>
    %769 = vector.extract_strided_slice %751 {offsets = [0, 96], sizes = [2, 32], strides = [1, 1]} : vector<2x128xf32> to vector<2x32xf32>
    %770 = arith.negf %769 : vector<2x32xf32>
    %771 = math.exp %770 : vector<2x32xf32>
    %cst_129 = arith.constant 1.000000e+00 : f32
    %772 = vector.broadcast %cst_129 : f32 to vector<2x32xf32>
    %773 = arith.addf %772, %771 : vector<2x32xf32>
    %774 = arith.divf %772, %773 : vector<2x32xf32>
    %775 = arith.mulf %766, %721 : vector<2x32xf32>
    %776 = arith.mulf %760, %768 : vector<2x32xf32>
    %777 = arith.addf %775, %776 : vector<2x32xf32>
    %778 = math.tanh %777 : vector<2x32xf32>
    %779 = arith.mulf %774, %778 : vector<2x32xf32>
    %780 = vector.extract_strided_slice %754 {offsets = [0, 0], sizes = [2, 32], strides = [1, 1]} : vector<2x128xf32> to vector<2x32xf32>
    %781 = arith.negf %780 : vector<2x32xf32>
    %782 = math.exp %781 : vector<2x32xf32>
    %cst_130 = arith.constant 1.000000e+00 : f32
    %783 = vector.broadcast %cst_130 : f32 to vector<2x32xf32>
    %784 = arith.addf %783, %782 : vector<2x32xf32>
    %785 = arith.divf %783, %784 : vector<2x32xf32>
    %786 = vector.extract_strided_slice %754 {offsets = [0, 32], sizes = [2, 32], strides = [1, 1]} : vector<2x128xf32> to vector<2x32xf32>
    %787 = arith.negf %786 : vector<2x32xf32>
    %788 = math.exp %787 : vector<2x32xf32>
    %cst_131 = arith.constant 1.000000e+00 : f32
    %789 = vector.broadcast %cst_131 : f32 to vector<2x32xf32>
    %790 = arith.addf %789, %788 : vector<2x32xf32>
    %791 = arith.divf %789, %790 : vector<2x32xf32>
    %792 = vector.extract_strided_slice %754 {offsets = [0, 64], sizes = [2, 32], strides = [1, 1]} : vector<2x128xf32> to vector<2x32xf32>
    %793 = math.tanh %792 : vector<2x32xf32>
    %794 = vector.extract_strided_slice %754 {offsets = [0, 96], sizes = [2, 32], strides = [1, 1]} : vector<2x128xf32> to vector<2x32xf32>
    %795 = arith.negf %794 : vector<2x32xf32>
    %796 = math.exp %795 : vector<2x32xf32>
    %cst_132 = arith.constant 1.000000e+00 : f32
    %797 = vector.broadcast %cst_132 : f32 to vector<2x32xf32>
    %798 = arith.addf %797, %796 : vector<2x32xf32>
    %799 = arith.divf %797, %798 : vector<2x32xf32>
    %800 = arith.mulf %791, %746 : vector<2x32xf32>
    %801 = arith.mulf %785, %793 : vector<2x32xf32>
    %802 = arith.addf %800, %801 : vector<2x32xf32>
    %803 = math.tanh %802 : vector<2x32xf32>
    %804 = arith.mulf %799, %803 : vector<2x32xf32>
    %805 = vector.extract_strided_slice %466 {offsets = [12, 0], sizes = [2, 128], strides = [1, 1]} : vector<16x256xf32> to vector<2x128xf32>
    %cst_133 = arith.constant dense<0.000000e+00> : vector<2x128xf32>
    %806 = tpu.matmul %779, %467, %cst_133 {dimension_numbers = #tpu.dot_dimension_numbers<[1], [0], [0], [1], [0, 0, 1, 1], [], []>} : vector<2x32xf32>, vector<32x128xf32>, vector<2x128xf32> -> vector<2x128xf32>
    %807 = arith.addf %805, %806 : vector<2x128xf32>
    %808 = vector.extract_strided_slice %466 {offsets = [2, 128], sizes = [2, 128], strides = [1, 1]} : vector<16x256xf32> to vector<2x128xf32>
    %cst_134 = arith.constant dense<0.000000e+00> : vector<2x128xf32>
    %809 = tpu.matmul %804, %468, %cst_134 {dimension_numbers = #tpu.dot_dimension_numbers<[1], [0], [0], [1], [0, 0, 1, 1], [], []>} : vector<2x32xf32>, vector<32x128xf32>, vector<2x128xf32> -> vector<2x128xf32>
    %810 = arith.addf %808, %809 : vector<2x128xf32>
    %811 = vector.extract_strided_slice %807 {offsets = [0, 0], sizes = [2, 32], strides = [1, 1]} : vector<2x128xf32> to vector<2x32xf32>
    %812 = arith.negf %811 : vector<2x32xf32>
    %813 = math.exp %812 : vector<2x32xf32>
    %cst_135 = arith.constant 1.000000e+00 : f32
    %814 = vector.broadcast %cst_135 : f32 to vector<2x32xf32>
    %815 = arith.addf %814, %813 : vector<2x32xf32>
    %816 = arith.divf %814, %815 : vector<2x32xf32>
    %817 = vector.extract_strided_slice %807 {offsets = [0, 32], sizes = [2, 32], strides = [1, 1]} : vector<2x128xf32> to vector<2x32xf32>
    %818 = arith.negf %817 : vector<2x32xf32>
    %819 = math.exp %818 : vector<2x32xf32>
    %cst_136 = arith.constant 1.000000e+00 : f32
    %820 = vector.broadcast %cst_136 : f32 to vector<2x32xf32>
    %821 = arith.addf %820, %819 : vector<2x32xf32>
    %822 = arith.divf %820, %821 : vector<2x32xf32>
    %823 = vector.extract_strided_slice %807 {offsets = [0, 64], sizes = [2, 32], strides = [1, 1]} : vector<2x128xf32> to vector<2x32xf32>
    %824 = math.tanh %823 : vector<2x32xf32>
    %825 = vector.extract_strided_slice %807 {offsets = [0, 96], sizes = [2, 32], strides = [1, 1]} : vector<2x128xf32> to vector<2x32xf32>
    %826 = arith.negf %825 : vector<2x32xf32>
    %827 = math.exp %826 : vector<2x32xf32>
    %cst_137 = arith.constant 1.000000e+00 : f32
    %828 = vector.broadcast %cst_137 : f32 to vector<2x32xf32>
    %829 = arith.addf %828, %827 : vector<2x32xf32>
    %830 = arith.divf %828, %829 : vector<2x32xf32>
    %831 = arith.mulf %822, %777 : vector<2x32xf32>
    %832 = arith.mulf %816, %824 : vector<2x32xf32>
    %833 = arith.addf %831, %832 : vector<2x32xf32>
    %834 = math.tanh %833 : vector<2x32xf32>
    %835 = arith.mulf %830, %834 : vector<2x32xf32>
    %836 = vector.extract_strided_slice %810 {offsets = [0, 0], sizes = [2, 32], strides = [1, 1]} : vector<2x128xf32> to vector<2x32xf32>
    %837 = arith.negf %836 : vector<2x32xf32>
    %838 = math.exp %837 : vector<2x32xf32>
    %cst_138 = arith.constant 1.000000e+00 : f32
    %839 = vector.broadcast %cst_138 : f32 to vector<2x32xf32>
    %840 = arith.addf %839, %838 : vector<2x32xf32>
    %841 = arith.divf %839, %840 : vector<2x32xf32>
    %842 = vector.extract_strided_slice %810 {offsets = [0, 32], sizes = [2, 32], strides = [1, 1]} : vector<2x128xf32> to vector<2x32xf32>
    %843 = arith.negf %842 : vector<2x32xf32>
    %844 = math.exp %843 : vector<2x32xf32>
    %cst_139 = arith.constant 1.000000e+00 : f32
    %845 = vector.broadcast %cst_139 : f32 to vector<2x32xf32>
    %846 = arith.addf %845, %844 : vector<2x32xf32>
    %847 = arith.divf %845, %846 : vector<2x32xf32>
    %848 = vector.extract_strided_slice %810 {offsets = [0, 64], sizes = [2, 32], strides = [1, 1]} : vector<2x128xf32> to vector<2x32xf32>
    %849 = math.tanh %848 : vector<2x32xf32>
    %850 = vector.extract_strided_slice %810 {offsets = [0, 96], sizes = [2, 32], strides = [1, 1]} : vector<2x128xf32> to vector<2x32xf32>
    %851 = arith.negf %850 : vector<2x32xf32>
    %852 = math.exp %851 : vector<2x32xf32>
    %cst_140 = arith.constant 1.000000e+00 : f32
    %853 = vector.broadcast %cst_140 : f32 to vector<2x32xf32>
    %854 = arith.addf %853, %852 : vector<2x32xf32>
    %855 = arith.divf %853, %854 : vector<2x32xf32>
    %856 = arith.mulf %847, %802 : vector<2x32xf32>
    %857 = arith.mulf %841, %849 : vector<2x32xf32>
    %858 = arith.addf %856, %857 : vector<2x32xf32>
    %859 = math.tanh %858 : vector<2x32xf32>
    %860 = arith.mulf %855, %859 : vector<2x32xf32>
    %861 = vector.extract_strided_slice %466 {offsets = [14, 0], sizes = [2, 128], strides = [1, 1]} : vector<16x256xf32> to vector<2x128xf32>
    %cst_141 = arith.constant dense<0.000000e+00> : vector<2x128xf32>
    %862 = tpu.matmul %835, %467, %cst_141 {dimension_numbers = #tpu.dot_dimension_numbers<[1], [0], [0], [1], [0, 0, 1, 1], [], []>} : vector<2x32xf32>, vector<32x128xf32>, vector<2x128xf32> -> vector<2x128xf32>
    %863 = arith.addf %861, %862 : vector<2x128xf32>
    %864 = vector.extract_strided_slice %466 {offsets = [0, 128], sizes = [2, 128], strides = [1, 1]} : vector<16x256xf32> to vector<2x128xf32>
    %cst_142 = arith.constant dense<0.000000e+00> : vector<2x128xf32>
    %865 = tpu.matmul %860, %468, %cst_142 {dimension_numbers = #tpu.dot_dimension_numbers<[1], [0], [0], [1], [0, 0, 1, 1], [], []>} : vector<2x32xf32>, vector<32x128xf32>, vector<2x128xf32> -> vector<2x128xf32>
    %866 = arith.addf %864, %865 : vector<2x128xf32>
    %867 = vector.extract_strided_slice %863 {offsets = [0, 0], sizes = [2, 32], strides = [1, 1]} : vector<2x128xf32> to vector<2x32xf32>
    %868 = arith.negf %867 : vector<2x32xf32>
    %869 = math.exp %868 : vector<2x32xf32>
    %cst_143 = arith.constant 1.000000e+00 : f32
    %870 = vector.broadcast %cst_143 : f32 to vector<2x32xf32>
    %871 = arith.addf %870, %869 : vector<2x32xf32>
    %872 = arith.divf %870, %871 : vector<2x32xf32>
    %873 = vector.extract_strided_slice %863 {offsets = [0, 32], sizes = [2, 32], strides = [1, 1]} : vector<2x128xf32> to vector<2x32xf32>
    %874 = arith.negf %873 : vector<2x32xf32>
    %875 = math.exp %874 : vector<2x32xf32>
    %cst_144 = arith.constant 1.000000e+00 : f32
    %876 = vector.broadcast %cst_144 : f32 to vector<2x32xf32>
    %877 = arith.addf %876, %875 : vector<2x32xf32>
    %878 = arith.divf %876, %877 : vector<2x32xf32>
    %879 = vector.extract_strided_slice %863 {offsets = [0, 64], sizes = [2, 32], strides = [1, 1]} : vector<2x128xf32> to vector<2x32xf32>
    %880 = math.tanh %879 : vector<2x32xf32>
    %881 = vector.extract_strided_slice %863 {offsets = [0, 96], sizes = [2, 32], strides = [1, 1]} : vector<2x128xf32> to vector<2x32xf32>
    %882 = arith.negf %881 : vector<2x32xf32>
    %883 = math.exp %882 : vector<2x32xf32>
    %cst_145 = arith.constant 1.000000e+00 : f32
    %884 = vector.broadcast %cst_145 : f32 to vector<2x32xf32>
    %885 = arith.addf %884, %883 : vector<2x32xf32>
    %886 = arith.divf %884, %885 : vector<2x32xf32>
    %887 = arith.mulf %878, %833 : vector<2x32xf32>
    %888 = arith.mulf %872, %880 : vector<2x32xf32>
    %889 = arith.addf %887, %888 : vector<2x32xf32>
    %890 = math.tanh %889 : vector<2x32xf32>
    %891 = arith.mulf %886, %890 : vector<2x32xf32>
    %892 = vector.extract_strided_slice %866 {offsets = [0, 0], sizes = [2, 32], strides = [1, 1]} : vector<2x128xf32> to vector<2x32xf32>
    %893 = arith.negf %892 : vector<2x32xf32>
    %894 = math.exp %893 : vector<2x32xf32>
    %cst_146 = arith.constant 1.000000e+00 : f32
    %895 = vector.broadcast %cst_146 : f32 to vector<2x32xf32>
    %896 = arith.addf %895, %894 : vector<2x32xf32>
    %897 = arith.divf %895, %896 : vector<2x32xf32>
    %898 = vector.extract_strided_slice %866 {offsets = [0, 32], sizes = [2, 32], strides = [1, 1]} : vector<2x128xf32> to vector<2x32xf32>
    %899 = arith.negf %898 : vector<2x32xf32>
    %900 = math.exp %899 : vector<2x32xf32>
    %cst_147 = arith.constant 1.000000e+00 : f32
    %901 = vector.broadcast %cst_147 : f32 to vector<2x32xf32>
    %902 = arith.addf %901, %900 : vector<2x32xf32>
    %903 = arith.divf %901, %902 : vector<2x32xf32>
    %904 = vector.extract_strided_slice %866 {offsets = [0, 64], sizes = [2, 32], strides = [1, 1]} : vector<2x128xf32> to vector<2x32xf32>
    %905 = math.tanh %904 : vector<2x32xf32>
    %906 = vector.extract_strided_slice %866 {offsets = [0, 96], sizes = [2, 32], strides = [1, 1]} : vector<2x128xf32> to vector<2x32xf32>
    %907 = arith.negf %906 : vector<2x32xf32>
    %908 = math.exp %907 : vector<2x32xf32>
    %cst_148 = arith.constant 1.000000e+00 : f32
    %909 = vector.broadcast %cst_148 : f32 to vector<2x32xf32>
    %910 = arith.addf %909, %908 : vector<2x32xf32>
    %911 = arith.divf %909, %910 : vector<2x32xf32>
    %912 = arith.mulf %903, %858 : vector<2x32xf32>
    %913 = arith.mulf %897, %905 : vector<2x32xf32>
    %914 = arith.addf %912, %913 : vector<2x32xf32>
    %915 = math.tanh %914 : vector<2x32xf32>
    %916 = arith.mulf %911, %915 : vector<2x32xf32>
    %917 = tpu.concatenate %431, %456, %891, %916 in 1 : vector<2x32xf32>, vector<2x32xf32>, vector<2x32xf32>, vector<2x32xf32> -> vector<2x128xf32>
    %c0_149 = arith.constant 0 : index
    %c0_150 = arith.constant 0 : index
    %918 = vector.load %arg9[%c0_149, %c0_150] : memref<2x128xf32, #tpu.memory_space<vmem>>, vector<2x128xf32>
    tpu.vector_store %arg9[%c0_149, %c0_150], %917 {strides = array<i32>} : memref<2x128xf32, #tpu.memory_space<vmem>>, vector<2x128xf32>,
    return
  }
}

</mosaic_0001>

<bundles_post_ra>
// kernel: textrnn_forward.1
= control target key start
LH: loop header
LB: loop body
LE: loop exit
PB: predicated region body
PF: predicated region fallthrough
CT: control target
= control target key end

     0   :  { %v4851_v3 = vmov 0.0|0.0   ;;  %v4852_v8 = vmov 0.0   ;;  %vm4853_vm0 = vmmov 0   ;;  %vm51_vm1 = vcmask 130048   ;;  %s5657_s0 = inlined_call_operand.vmem [shape: f32[16,16], index: 0, kind: input, shape index: {}]   ;;  %s5658_s1 = inlined_call_operand.vmem [shape: f32[16,256], index: 1, kind: input, shape index: {}]   ;;  %s5659_s2 = inlined_call_operand.vmem [shape: f32[32,128], index: 2, kind: input, shape index: {}]   ;;  %s5660_s3 = inlined_call_operand.vmem [shape: f32[32,128], index: 3, kind: input, shape index: {}]   ;;  %s5661_s4 = inlined_call_operand.vmem [shape: f32[1,256], index: 4, kind: input, shape index: {}]   ;;  %s5662_s5 = inlined_call_operand.vmem [shape: f32[64,256], index: 5, kind: input, shape index: {}]   ;;  %s5663_s6 = inlined_call_operand.vmem [shape: f32[32,128], index: 6, kind: input, shape index: {}]   ;;  %s5664_s7 = inlined_call_operand.vmem [shape: f32[32,128], index: 7, kind: input, shape index: {}]   ;;  %s5665_s8 = inlined_call_operand.vmem [shape: f32[1,256], index: 8, kind: input, shape index: {}]   ;;  %s5666_s9 = inlined_call_operand.hbm [shape: f32[2,128], index: 9, kind: output, shape index: {}]  }
   0x1   :  { %v36_v0 = vld [vmem:[%s5658_s1 + $0x8] sm:$0xff]  ;;  %v38_v1 = vld [vmem:[%s5658_s1 + $0x18] sm:$0xff]  ;;  %v135_v2 = vld [vmem:[%s5659_s2] sm:$0xff]  ;;  %4352 = vmatprep.subr.bf16.mxu1 %v4851_v3  ;;  %122 = vmatprep.mubr.f32.mxu0 %v4852_v8 }
   0x2   :  { %v4348_v4 = vpack.c.bf16 %v38_v1, %v36_v0  ;;  %v136_v5 = vld [vmem:[%s5659_s2 + $0x8] sm:$0xff]  ;;  %v35_v6 = vld [vmem:[%s5658_s1] sm:$0xff]  ;;  %v37_v7 = vld [vmem:[%s5658_s1 + $0x10] sm:$0xff]  ;;  %4004 = vmatprep.mubr.msk.f32.mxu1 %vm4853_vm0, %v4852_v8 }
   0x3   :  { %v4928_v9 = vpack.c.bf16 %v136_v5, %v135_v2  ;;  %v4350_v10 = vpack.c.bf16 %v37_v7, %v35_v6  ;;  %v137_v11 = vld [vmem:[%s5659_s2 + $0x10] sm:$0xff]  ;;  %v138_v12 = vld [vmem:[%s5659_s2 + $0x18] sm:$0xff]  ;;  %v139_v13 = vld [vmem:[%s5660_s3] sm:$0xff] }
   0x4   :  { %4349 = vmatprep.subr.bf16.mxu0 %v4348_v4  ;;  %v140_v14 = vld [vmem:[%s5660_s3 + $0x8] sm:$0xff]  ;;  %v33_v15 = vld [vmem:[%s5657_s0] sm:$0xff]  ;;  %v4948_v16 = vpack.c.bf16 %v138_v12, %v137_v11  ;;  %v141_v18 = vld [vmem:[%s5660_s3 + $0x10] sm:$0xff] }
   0x5   :  { %4354 = vmatpush3.bf16.msra.mxu1 %v4928_v9  ;;  %4351 = vmatpush1.bf16.msra.mxu0 %v4350_v10  ;;  %v4950_v17 = vpack.c.bf16 %v140_v14, %v139_v13  ;;  %v142_v19 = vld [vmem:[%s5660_s3 + $0x18] sm:$0xff] }
   0x6   :  { %4355 = vmatprep.subr.bf16.mxu1 %v4851_v3  ;;  %4358 = vmatprep.subr.bf16.mxu0 %v4851_v3 }
   0x7   :  { %14 = vsyncpa [#allocation3], 0  ;;  %v34_v20 = vld [vmem:[%s5657_s0 + $0x8] sm:$0xff]  ;;  %v4966_v21 = vpack.c.bf16 %v142_v19, %v141_v18  ;;  %v41_v22 = vlaneseq  ;;  %v39_v25 = vld [vmem:[%s5661_s4] sm:$0x3]  ;;  %s4854_s4 = smov 64  }
   0x8   :  { %3770 = vmatmul.mubr.msk.f32.vlgmr.msra.gmra.mrb[0].mxu0 %vm51_vm1, %v33_v15  ;;  %s4855_s14 = smov 32   ;;  %vm143_vm2 = vcmask 261120   ;;  %vm1826_vm3 = vcmask 1041408   ;;  %vm1828_vm4 = vcmask 1043456   ;;  %vm1830_vm5 = vcmask 1045504   ;;  %s4857_s3 = smov [#allocation2]  }
   0x9   :  { %4357 = vmatpush3.bf16.msra.mxu1 %v4948_v16  ;;  %4360 = vmatpush3.bf16.msra.mxu0 %v4950_v17  ;;  %v4990_v23 = vshrl.u32 %v41_v22, 7  ;;  %vm3751_vm6 = vcmask 523264   ;;  %s3762_s15 = sshll.u32 %s4857_s3, 4  ;;  %vm3753_vm7 = vcmask 785408   ;;  %s3763_s15 = int_to_ptr.vmem [resolvable:$true] %s3762_s15 }
   0xa   :  { %128 = vmatprep.mubr.f32.mxu0 %v4852_v8  ;;  %4361 = vmatprep.subr.bf16.mxu0 %v4851_v3  ;;  %p4832_p1 = scmp.lt.s32.totalorder %s3763_s15, %s3763_s15 }
   0xb   :  { %4364 = vmatprep.subr.bf16.mxu1 %v4851_v3  ;;  %v43_v24 = vsub.s32 0, %v4990_v23  ;;  %v47_v26 = vsub.s32 1, %v4990_v23 }
   0xc   :  { %4005 = vmatmul.mubr.f32.vlgmr.msra.gmra.mrb[0].mxu1 %v4852_v8  ;;  %3771 = vmatmul.mubr.msk.f32.gmra.mrb[2].mxu0 %vm51_vm1, %v34_v20 }
   0xd   :  { %4363 = vmatpush3.bf16.msra.mxu0 %v4966_v21  ;;  %4015 = vmatprep.mubr.msk.f32.mxu0 %vm4853_vm0, %v4852_v8  ;;  %v44_v27 = vrot.slane %v39_v25, %v43_v24  ;;  %v48_v28 = vrot.slane %v39_v25, %v47_v26 }
   0xe   :  { %4370 = vmatprep.subr.bf16.mxu0 %v4851_v3  ;;  %4366 = vmatpush3.bf16.msra.mxu1 %v4928_v9 }
   0xf   :  { %4367 = vmatprep.subr.bf16.mxu1 %v4851_v3  ;;  %4026 = vmatprep.mubr.msk.f32.mxu1 %vm4853_vm0, %v4852_v8 }
  0x10   :  { %4016 = vmatmul.mubr.f32.vlgmr.msra.gmra.mrb[4].mxu0 %v4852_v8 }
  0x11   :  { %4372 = vmatpush3.bf16.msra.mxu0 %v4950_v17  ;;  %4037 = vmatprep.mubr.msk.f32.mxu0 %vm4853_vm0, %v4852_v8 }
  0x12   :  { %4373 = vmatprep.subr.bf16.mxu0 %v4851_v3  ;;  %4369 = vmatpush3.bf16.msra.mxu1 %v4948_v16 }
  0x13   :  { %4376 = vmatprep.subr.bf16.mxu1 %v4851_v3 }
  0x15   :  { %4375 = vmatpush3.bf16.msra.mxu0 %v4966_v21 }
  0x16   :  { %4382 = vmatprep.subr.bf16.mxu0 %v4851_v3 }
  0xdb   :  { %v124_v29 = vpop.f32.mrb[0].mxu0 }
  0xdc   :  { %v5001_v30 = vadd.f32 %v124_v29, %v44_v27  ;;  %v126_v31 = vpop.f32.mrb[1].mxu0 }
  0xdd   :  { %v5003_v32 = vadd.f32 %v126_v31, %v48_v28 }
  0xdf   :  { %v213_v33 = vpop.f32.mrb[0].mxu1  ;;  %v130_v34 = vpop.f32.mrb[2].mxu0 }
  0xe0   :  { %v217_v35 = vadd.f32 %v213_v33, %v5001_v30  ;;  %v5006_v36 = vadd.f32 %v130_v34, %v44_v27  ;;  %v132_v37 = vpop.f32.mrb[3].mxu0  ;;  %v4006_v38 = vpop.f32.mrb[1].mxu1 }
  0xe1   :  { %v5008_v40 = vadd.f32 %v132_v37, %v48_v28 }
  0xe2   :  { %4571 = vtanh.f32 %v217_v35  ;;  %v3772_v46 = vmul.f32 -1.442695, %v217_v35 }
  0xe3   :  { %v284_v39 = vpop.f32.mrb[4].mxu0 }
  0xe4   :  { %v289_v41 = vrot.slane %v284_v39, 2  ;;  %v4017_v42 = vpop.f32.mrb[5].mxu0 }
  0xe6   :  { %v291_v43 = vadd.f32 %v289_v41, %v5008_v40 }
  0xe8   :  { %4573 = vtanh.f32 %v291_v43  ;;  %v3773_v47 = vmul.f32 -1.442695, %v291_v43 }
  0xe9   :  { %4575 = vpow2.f32 %v3772_v46 }
  0xea   :  { %4577 = vpow2.f32 %v3773_v47 }
  0xec   :  { %v4572_v44 = vpop.eup %4571 }
  0xed   :  { %301 = vrot.lane.b32.xlu1 %v4572_v44, %s4854_s4 }
  0xf2   :  { %v4574_v45 = vpop.eup %4573 }
  0xf3   :  { %325 = vrot.lane.b32.xlu0 %v4574_v45, %s4854_s4  ;;  %v4576_v48 = vpop.eup %4575 }
  0xf4   :  { %v295_v49 = vadd.f32 1.0, %v4576_v48  ;;  %v4578_v50 = vpop.eup %4577 }
  0xf5   :  { %v319_v51 = vadd.f32 1.0, %v4578_v50 }
  0xf6   :  { %4579 = vrcp.f32 %v295_v49 }
  0xf7   :  { %4581 = vrcp.f32 %v319_v51 }
 0x100   :  { %v4580_v52 = vpop.eup %4579 }
 0x101   :  { %v4582_v55 = vpop.eup %4581  ;;  %v299_v61 = vmul.f32 0.0, %v4580_v52 }
 0x102   :  { %v323_v58 = vmul.f32 0.0, %v4582_v55 }
 0x15f   :  { %v302_v53 = vpop.permute.xlu1 %301 }
 0x160   :  { %v304_v54 = vmul.f32 %v4580_v52, %v302_v53 }
 0x162   :  { %306 = vrot.lane.b32.xlu1 %v304_v54, %s4855_s14 }
 0x165   :  { %v326_v56 = vpop.permute.xlu0 %325 }
 0x166   :  { %v328_v57 = vmul.f32 %v4582_v55, %v326_v56 }
 0x168   :  { %330 = vrot.lane.b32.xlu0 %v328_v57, %s4855_s14 }
 0x1d4   :  { %v307_v59 = vpop.permute.xlu1 %306 }
 0x1d5   :  { %v5017_v63 = vadd.f32 %v307_v59, %v299_v61 }
 0x1d7   :  { %v507_v47 = vrot.slane %v5017_v63, 6 }
 0x1da   :  { %v331_v60 = vpop.permute.xlu0 %330 }
 0x1db   :  { %v5015_v62 = vadd.f32 %v331_v60, %v323_v58 }
 0x1dd   :  { %4583 = vtanh.f32 %v5015_v62  ;;  %v534_v44 = vrot.slane %v5015_v62, 2 }
 0x1de   :  { %4585 = vtanh.f32 %v5017_v63 }
 0x1e7   :  { %v4584_v0 = vpop.eup %4583 }
 0x1e8   :  { %336 = vrot.lane.b32.xlu0 %v4584_v0, %s4854_s4  ;;  %v4586_v1 = vpop.eup %4585 }
 0x1ec   :  { %312 = vrot.lane.b32.xlu0 %v4586_v1, %s4854_s4 }
 0x25a   :  { %v337_v2 = vpop.permute.xlu0 %336 }
 0x25b   :  { %v5023_v4 = vmul.f32 %v4582_v55, %v337_v2 }
 0x25d   :  { %v420_v5 = vrot.slane %v5023_v4, 6 }
 0x25e   :  { %v313_v6 = vpop.permute.xlu0 %312 }
 0x25f   :  { %421 = vrot.lane.b32.xlu1 %v420_v5, %s4855_s14  ;;  %v5027_v7 = vmul.f32 %v4580_v52, %v313_v6 }
 0x263   :  { %341 = vrot.lane.b32.xlu1 %v5027_v7, %s4855_s14 }
 0x2d1   :  { %v422_v10 = vpop.permute.xlu1 %421 }
 0x2d2   :  { %4038 = vmatmul.mubr.msk.f32.vlgmr.msra.gmra.mrb[6].mxu0 %vm143_vm2, %v422_v10 }
 0x2d3   :  { %4384 = vmatpush3.bf16.msra.mxu0 %v4950_v17  ;;  %4059 = vmatprep.mubr.msk.f32.mxu0 %vm4853_vm0, %v4852_v8 }
 0x2d4   :  { %4385 = vmatprep.subr.bf16.mxu0 %v4851_v3 }
 0x2d5   :  { %v342_v11 = vpop.permute.xlu1 %341 }
 0x2d6   :  { %4027 = vmatmul.mubr.msk.f32.vlgmr.msra.gmra.mrb[2].mxu1 %vm143_vm2, %v342_v11 }
 0x2d7   :  { %4378 = vmatpush3.bf16.msra.mxu1 %v4928_v9  ;;  %4387 = vmatpush3.bf16.msra.mxu0 %v4966_v21 }
 0x2d8   :  { %4379 = vmatprep.subr.bf16.mxu1 %v4851_v3  ;;  %4048 = vmatprep.mubr.msk.f32.mxu1 %vm4853_vm0, %v4852_v8 }
 0x2d9   :  { %4394 = vmatprep.subr.bf16.mxu0 %v4851_v3 }
 0x2db   :  { %4381 = vmatpush3.bf16.msra.mxu1 %v4948_v16 }
 0x2dc   :  { %4388 = vmatprep.subr.bf16.mxu1 %v4851_v3 }
 0x3a5   :  { %v491_v12 = vpop.f32.mrb[6].mxu0 }
 0x3a6   :  { %v496_v13 = vrot.slane %v491_v12, 4  ;;  %v4039_v14 = vpop.f32.mrb[7].mxu0 }
 0x3a8   :  { %v498_v15 = vadd.f32 %v496_v13, %v5008_v40 }
 0x3a9   :  { %v411_v18 = vpop.f32.mrb[2].mxu1 }
 0x3aa   :  { %4587 = vtanh.f32 %v498_v15  ;;  %v416_v19 = vrot.slane %v411_v18, 6  ;;  %v4028_v20 = vpop.f32.mrb[3].mxu1  ;;  %v3777_v28 = vmul.f32 -1.442695, %v498_v15 }
 0x3ac   :  { %v418_v22 = vadd.f32 %v416_v19, %v5001_v30 }
 0x3ae   :  { %4589 = vtanh.f32 %v418_v22  ;;  %v3776_v29 = vmul.f32 -1.442695, %v418_v22 }
 0x3af   :  { %4591 = vpow2.f32 %v3777_v28 }
 0x3b0   :  { %4593 = vpow2.f32 %v3776_v29 }
 0x3b4   :  { %v4588_v25 = vpop.eup %4587 }
 0x3b5   :  { %538 = vrot.lane.b32.xlu0 %v4588_v25, %s4854_s4 }
 0x3b8   :  { %v4590_v27 = vpop.eup %4589 }
 0x3b9   :  { %511 = vrot.lane.b32.xlu0 %v4590_v27, %s4854_s4  ;;  %v4592_v31 = vpop.eup %4591 }
 0x3ba   :  { %v529_v33 = vadd.f32 1.0, %v4592_v31  ;;  %v4594_v34 = vpop.eup %4593 }
 0x3bb   :  { %v502_v35 = vadd.f32 1.0, %v4594_v34 }
 0x3bc   :  { %4595 = vrcp.f32 %v529_v33 }
 0x3bd   :  { %4597 = vrcp.f32 %v502_v35 }
 0x3c6   :  { %v4596_v37 = vpop.eup %4595 }
 0x3c7   :  { %v4598_v41 = vpop.eup %4597  ;;  %v536_v45 = vmul.f32 %v4596_v37, %v534_v44 }
 0x3c8   :  { %v509_v49 = vmul.f32 %v4598_v41, %v507_v47 }
 0x427   :  { %v539_v38 = vpop.permute.xlu0 %538 }
 0x428   :  { %v541_v39 = vmul.f32 %v4596_v37, %v539_v38 }
 0x42a   :  { %543 = vrot.lane.b32.xlu1 %v541_v39, %s4855_s14 }
 0x42b   :  { %v512_v42 = vpop.permute.xlu0 %511 }
 0x42c   :  { %v514_v43 = vmul.f32 %v4598_v41, %v512_v42 }
 0x42e   :  { %516 = vrot.lane.b32.xlu1 %v514_v43, %s4855_s14 }
 0x49c   :  { %v544_v46 = vpop.permute.xlu1 %543 }
 0x49d   :  { %v5053_v48 = vadd.f32 %v544_v46, %v536_v45 }
 0x49f   :  { %4599 = vtanh.f32 %v5053_v48  ;;  %v748_v33 = vrot.slane %v5053_v48, 2 }
 0x4a0   :  { %v517_v50 = vpop.permute.xlu1 %516 }
 0x4a1   :  { %v5056_v51 = vadd.f32 %v517_v50, %v509_v49 }
 0x4a3   :  { %4601 = vtanh.f32 %v5056_v51 }
 0x4a9   :  { %v4600_v52 = vpop.eup %4599 }
 0x4aa   :  { %549 = vrot.lane.b32.xlu0 %v4600_v52, %s4854_s4 }
 0x4ad   :  { %v4602_v53 = vpop.eup %4601 }
 0x4ae   :  { %522 = vrot.lane.b32.xlu0 %v4602_v53, %s4854_s4 }
 0x51c   :  { %v550_v54 = vpop.permute.xlu0 %549 }
 0x51d   :  { %v5061_v55 = vmul.f32 %v4596_v37, %v550_v54  ;;  %v721_v37 = vrot.slane %v5056_v51, 6 }
 0x51f   :  { %v634_v56 = vrot.slane %v5061_v55, 4 }
 0x520   :  { %v523_v57 = vpop.permute.xlu0 %522 }
 0x521   :  { %v5064_v58 = vmul.f32 %v4598_v41, %v523_v57  ;;  %635 = vrot.lane.b32.xlu1 %v634_v56, %s4855_s14 }
 0x523   :  { %v554_v59 = vrot.slane %v5064_v58, 2  ;;  %v1827_v50 = vsel %vm1826_vm3, %v5027_v7, %v5064_v58 }
 0x525   :  { %555 = vrot.lane.b32.xlu1 %v554_v59, %s4855_s14 }
 0x593   :  { %v636_v60 = vpop.permute.xlu1 %635 }
 0x594   :  { %4060 = vmatmul.mubr.msk.f32.vlgmr.msra.gmra.mrb[8].mxu0 %vm143_vm2, %v636_v60 }
 0x595   :  { %4396 = vmatpush3.bf16.msra.mxu0 %v4950_v17  ;;  %4081 = vmatprep.mubr.msk.f32.mxu0 %vm4853_vm0, %v4852_v8 }
 0x596   :  { %4397 = vmatprep.subr.bf16.mxu0 %v4851_v3 }
 0x597   :  { %v556_v61 = vpop.permute.xlu1 %555 }
 0x598   :  { %4049 = vmatmul.mubr.msk.f32.vlgmr.msra.gmra.mrb[4].mxu1 %vm143_vm2, %v556_v61 }
 0x599   :  { %4390 = vmatpush3.bf16.msra.mxu1 %v4928_v9  ;;  %4399 = vmatpush3.bf16.msra.mxu0 %v4966_v21 }
 0x59a   :  { %4391 = vmatprep.subr.bf16.mxu1 %v4851_v3  ;;  %4070 = vmatprep.mubr.msk.f32.mxu1 %vm4853_vm0, %v4852_v8 }
 0x59b   :  { %4406 = vmatprep.subr.bf16.mxu0 %v4851_v3 }
 0x59d   :  { %4393 = vmatpush3.bf16.msra.mxu1 %v4948_v16 }
 0x59e   :  { %4400 = vmatprep.subr.bf16.mxu1 %v4851_v3 }
 0x667   :  { %v705_v62 = vpop.f32.mrb[8].mxu0 }
 0x668   :  { %v710_v63 = vrot.slane %v705_v62, 6  ;;  %v4061_v0 = vpop.f32.mrb[9].mxu0 }
 0x66a   :  { %v712_v1 = vadd.f32 %v710_v63, %v5008_v40 }
 0x66b   :  { %v625_v2 = vpop.f32.mrb[4].mxu1 }
 0x66c   :  { %4603 = vtanh.f32 %v712_v1  ;;  %v630_v5 = vrot.slane %v625_v2, 4  ;;  %v4050_v6 = vpop.f32.mrb[5].mxu1  ;;  %v3781_v13 = vmul.f32 -1.442695, %v712_v1 }
 0x66e   :  { %v632_v10 = vadd.f32 %v630_v5, %v5001_v30 }
 0x670   :  { %4605 = vtanh.f32 %v632_v10  ;;  %v3780_v14 = vmul.f32 -1.442695, %v632_v10 }
 0x671   :  { %4607 = vpow2.f32 %v3781_v13 }
 0x672   :  { %4609 = vpow2.f32 %v3780_v14 }
 0x676   :  { %v4604_v11 = vpop.eup %4603 }
 0x677   :  { %752 = vrot.lane.b32.xlu0 %v4604_v11, %s4854_s4 }
 0x67a   :  { %v4606_v12 = vpop.eup %4605 }
 0x67b   :  { %725 = vrot.lane.b32.xlu0 %v4606_v12, %s4854_s4  ;;  %v4608_v15 = vpop.eup %4607 }
 0x67c   :  { %v743_v18 = vadd.f32 1.0, %v4608_v15  ;;  %v4610_v19 = vpop.eup %4609 }
 0x67d   :  { %v716_v20 = vadd.f32 1.0, %v4610_v19 }
 0x67e   :  { %4611 = vrcp.f32 %v743_v18 }
 0x67f   :  { %4613 = vrcp.f32 %v716_v20 }
 0x688   :  { %v4612_v22 = vpop.eup %4611 }
 0x689   :  { %v4614_v28 = vpop.eup %4613  ;;  %v750_v34 = vmul.f32 %v4612_v22, %v748_v33 }
 0x68a   :  { %v723_v39 = vmul.f32 %v4614_v28, %v721_v37 }
 0x6e9   :  { %v753_v25 = vpop.permute.xlu0 %752 }
 0x6ea   :  { %v755_v27 = vmul.f32 %v4612_v22, %v753_v25 }
 0x6ec   :  { %757 = vrot.lane.b32.xlu1 %v755_v27, %s4855_s14 }
 0x6ed   :  { %v726_v29 = vpop.permute.xlu0 %725 }
 0x6ee   :  { %v728_v31 = vmul.f32 %v4614_v28, %v726_v29 }
 0x6f0   :  { %730 = vrot.lane.b32.xlu1 %v728_v31, %s4855_s14 }
 0x75e   :  { %v758_v35 = vpop.permute.xlu1 %757 }
 0x75f   :  { %v5091_v38 = vadd.f32 %v758_v35, %v750_v34 }
 0x761   :  { %4615 = vtanh.f32 %v5091_v38  ;;  %v959_v15 = vrot.slane %v5091_v38, 2 }
 0x762   :  { %v731_v41 = vpop.permute.xlu1 %730 }
 0x763   :  { %v5094_v42 = vadd.f32 %v731_v41, %v723_v39 }
 0x765   :  { %4617 = vtanh.f32 %v5094_v42 }
 0x76b   :  { %v4616_v43 = vpop.eup %4615 }
 0x76c   :  { %763 = vrot.lane.b32.xlu0 %v4616_v43, %s4854_s4 }
 0x76f   :  { %v4618_v44 = vpop.eup %4617 }
 0x770   :  { %736 = vrot.lane.b32.xlu0 %v4618_v44, %s4854_s4 }
 0x7de   :  { %v764_v45 = vpop.permute.xlu0 %763 }
 0x7df   :  { %v5099_v46 = vmul.f32 %v4612_v22, %v764_v45  ;;  %v932_v22 = vrot.slane %v5094_v42, 6 }
 0x7e1   :  { %v848_v47 = vrot.slane %v5099_v46, 2 }
 0x7e2   :  { %v737_v48 = vpop.permute.xlu0 %736 }
 0x7e3   :  { %v739_v49 = vmul.f32 %v4614_v28, %v737_v48  ;;  %849 = vrot.lane.b32.xlu1 %v848_v47, %s4855_s14 }
 0x7e5   :  { %v768_v51 = vrot.slane %v739_v49, 4  ;;  %v5107_v52 = vsel %vm1828_vm4, %v1827_v50, %v739_v49 }
 0x7e7   :  { %769 = vrot.lane.b32.xlu1 %v768_v51, %s4855_s14 }
 0x855   :  { %v850_v53 = vpop.permute.xlu1 %849 }
 0x856   :  { %4082 = vmatmul.mubr.msk.f32.vlgmr.msra.gmra.mrb[10].mxu0 %vm143_vm2, %v850_v53 }
 0x857   :  { %4408 = vmatpush3.bf16.msra.mxu0 %v4950_v17  ;;  %4103 = vmatprep.mubr.msk.f32.mxu0 %vm4853_vm0, %v4852_v8 }
 0x858   :  { %4409 = vmatprep.subr.bf16.mxu0 %v4851_v3 }
 0x859   :  { %v770_v54 = vpop.permute.xlu1 %769 }
 0x85a   :  { %4071 = vmatmul.mubr.msk.f32.vlgmr.msra.gmra.mrb[6].mxu1 %vm143_vm2, %v770_v54 }
 0x85b   :  { %4411 = vmatpush3.bf16.msra.mxu0 %v4966_v21  ;;  %4402 = vmatpush3.bf16.msra.mxu1 %v4928_v9 }
 0x85c   :  { %4403 = vmatprep.subr.bf16.mxu1 %v4851_v3  ;;  %4092 = vmatprep.mubr.msk.f32.mxu1 %vm4853_vm0, %v4852_v8 }
 0x85d   :  { %4418 = vmatprep.subr.bf16.mxu0 %v4851_v3 }
 0x85f   :  { %4405 = vmatpush3.bf16.msra.mxu1 %v4948_v16 }
 0x860   :  { %4412 = vmatprep.subr.bf16.mxu1 %v4851_v3 }
 0x929   :  { %v919_v7 = vpop.f32.mrb[10].mxu0 }
 0x92a   :  { %v923_v56 = vadd.f32 %v919_v7, %v5008_v40  ;;  %v4083_v57 = vpop.f32.mrb[11].mxu0 }
 0x92c   :  { %4619 = vtanh.f32 %v923_v56  ;;  %v3785_v0 = vmul.f32 -1.442695, %v923_v56 }
 0x92d   :  { %v839_v58 = vpop.f32.mrb[6].mxu1 }
 0x92e   :  { %v844_v59 = vrot.slane %v839_v58, 2  ;;  %v4072_v60 = vpop.f32.mrb[7].mxu1 }
 0x930   :  { %v846_v61 = vadd.f32 %v844_v59, %v5001_v30 }
 0x932   :  { %4621 = vtanh.f32 %v846_v61  ;;  %v3784_v1 = vmul.f32 -1.442695, %v846_v61 }
 0x933   :  { %4623 = vpow2.f32 %v3785_v0 }
 0x934   :  { %4625 = vpow2.f32 %v3784_v1 }
 0x936   :  { %v4620_v62 = vpop.eup %4619 }
 0x937   :  { %963 = vrot.lane.b32.xlu0 %v4620_v62, %s4854_s4 }
 0x93c   :  { %v4622_v63 = vpop.eup %4621 }
 0x93d   :  { %936 = vrot.lane.b32.xlu0 %v4622_v63, %s4854_s4  ;;  %v4624_v2 = vpop.eup %4623 }
 0x93e   :  { %v954_v40 = vadd.f32 1.0, %v4624_v2  ;;  %v4626_v5 = vpop.eup %4625 }
 0x93f   :  { %v927_v6 = vadd.f32 1.0, %v4626_v5 }
 0x940   :  { %4627 = vrcp.f32 %v954_v40 }
 0x941   :  { %4629 = vrcp.f32 %v927_v6 }
 0x94a   :  { %v4628_v10 = vpop.eup %4627 }
 0x94b   :  { %v4630_v12 = vpop.eup %4629  ;;  %v961_v18 = vmul.f32 %v4628_v10, %v959_v15 }
 0x94c   :  { %v934_v25 = vmul.f32 %v4630_v12, %v932_v22 }
 0x9a9   :  { %v964_v11 = vpop.permute.xlu0 %963 }
 0x9aa   :  { %v966_v30 = vmul.f32 %v4628_v10, %v964_v11 }
 0x9ac   :  { %968 = vrot.lane.b32.xlu1 %v966_v30, %s4855_s14 }
 0x9af   :  { %v937_v13 = vpop.permute.xlu0 %936 }
 0x9b0   :  { %v939_v14 = vmul.f32 %v4630_v12, %v937_v13 }
 0x9b2   :  { %941 = vrot.lane.b32.xlu1 %v939_v14, %s4855_s14 }
 0xa1e   :  { %v969_v19 = vpop.permute.xlu1 %968 }
 0xa1f   :  { %v5131_v20 = vadd.f32 %v969_v19, %v961_v18 }
 0xa21   :  { %4631 = vtanh.f32 %v5131_v20  ;;  %v1169_v1 = vrot.slane %v5131_v20, 2 }
 0xa24   :  { %v942_v27 = vpop.permute.xlu1 %941 }
 0xa25   :  { %v5135_v28 = vadd.f32 %v942_v27, %v934_v25 }
 0xa27   :  { %4633 = vtanh.f32 %v5135_v28  ;;  %v1142_v6 = vrot.slane %v5135_v28, 6 }
 0xa2b   :  { %v4632_v29 = vpop.eup %4631 }
 0xa2c   :  { %974 = vrot.lane.b32.xlu0 %v4632_v29, %s4854_s4 }
 0xa31   :  { %v4634_v31 = vpop.eup %4633 }
 0xa32   :  { %947 = vrot.lane.b32.xlu0 %v4634_v31, %s4854_s4 }
 0xa9e   :  { %v975_v33 = vpop.permute.xlu0 %974 }
 0xa9f   :  { %v5140_v34 = vmul.f32 %v4628_v10, %v975_v33 }
 0xaa1   :  { %1056 = vrot.lane.b32.xlu1 %v5140_v34, %s4855_s14 }
 0xaa4   :  { %v948_v35 = vpop.permute.xlu0 %947 }
 0xaa5   :  { %v950_v37 = vmul.f32 %v4630_v12, %v948_v35 }
 0xaa7   :  { %v979_v38 = vrot.slane %v950_v37, 6  ;;  %v5146_v39 = vsel %vm1830_vm5, %v5107_v52, %v950_v37 }
 0xaa9   :  { %980 = vrot.lane.b32.xlu1 %v979_v38, %s4855_s14 }
 0xb13   :  { %v1057_v41 = vpop.permute.xlu1 %1056 }
 0xb14   :  { %4104 = vmatmul.mubr.msk.f32.vlgmr.msra.gmra.mrb[12].mxu0 %vm143_vm2, %v1057_v41 }
 0xb15   :  { %4420 = vmatpush3.bf16.msra.mxu0 %v4950_v17  ;;  %4125 = vmatprep.mubr.msk.f32.mxu0 %vm4853_vm0, %v4852_v8 }
 0xb16   :  { %4421 = vmatprep.subr.bf16.mxu0 %v4851_v3 }
 0xb19   :  { %4423 = vmatpush3.bf16.msra.mxu0 %v4966_v21 }
 0xb1a   :  { %4430 = vmatprep.subr.bf16.mxu0 %v4851_v3 }
 0xb1b   :  { %v981_v42 = vpop.permute.xlu1 %980 }
 0xb1c   :  { %4093 = vmatmul.mubr.msk.f32.vlgmr.msra.gmra.mrb[8].mxu1 %vm143_vm2, %v981_v42 }
 0xb1d   :  { %4414 = vmatpush3.bf16.msra.mxu1 %v4928_v9  ;;  %4114 = vmatprep.mubr.msk.f32.mxu1 %vm4853_vm0, %v4852_v8 }
 0xb1e   :  { %4415 = vmatprep.subr.bf16.mxu1 %v4851_v3 }
 0xb21   :  { %4417 = vmatpush3.bf16.msra.mxu1 %v4948_v16 }
 0xb22   :  { %4424 = vmatprep.subr.bf16.mxu1 %v4851_v3 }
 0xbe7   :  { %v1126_v43 = vpop.f32.mrb[12].mxu0 }
 0xbe8   :  { %v1131_v44 = vrot.slane %v1126_v43, 2  ;;  %v4105_v45 = vpop.f32.mrb[13].mxu0 }
 0xbea   :  { %v1133_v47 = vadd.f32 %v1131_v44, %v5003_v32 }
 0xbec   :  { %4635 = vtanh.f32 %v1133_v47  ;;  %v3789_v53 = vmul.f32 -1.442695, %v1133_v47 }
 0xbef   :  { %v1050_v48 = vpop.f32.mrb[8].mxu1 }
 0xbf0   :  { %v1054_v49 = vadd.f32 %v1050_v48, %v5006_v36  ;;  %v4094_v50 = vpop.f32.mrb[9].mxu1 }
 0xbf2   :  { %4637 = vtanh.f32 %v1054_v49  ;;  %v3788_v54 = vmul.f32 -1.442695, %v1054_v49 }
 0xbf3   :  { %4639 = vpow2.f32 %v3789_v53 }
 0xbf4   :  { %4641 = vpow2.f32 %v3788_v54 }
 0xbf6   :  { %v4636_v51 = vpop.eup %4635 }
 0xbf7   :  { %1173 = vrot.lane.b32.xlu0 %v4636_v51, %s4854_s4 }
 0xbfc   :  { %v4638_v52 = vpop.eup %4637 }
 0xbfd   :  { %1146 = vrot.lane.b32.xlu0 %v4638_v52, %s4854_s4  ;;  %v4640_v7 = vpop.eup %4639 }
 0xbfe   :  { %v1164_v56 = vadd.f32 1.0, %v4640_v7  ;;  %v4642_v57 = vpop.eup %4641 }
 0xbff   :  { %v1137_v58 = vadd.f32 1.0, %v4642_v57 }
 0xc00   :  { %4643 = vrcp.f32 %v1164_v56 }
 0xc01   :  { %4645 = vrcp.f32 %v1137_v58 }
 0xc0a   :  { %v4644_v59 = vpop.eup %4643 }
 0xc0b   :  { %v4646_v62 = vpop.eup %4645  ;;  %v1171_v2 = vmul.f32 %v4644_v59, %v1169_v1 }
 0xc0c   :  { %v1144_v10 = vmul.f32 %v4646_v62, %v1142_v6 }
 0xc69   :  { %v1174_v60 = vpop.permute.xlu0 %1173 }
 0xc6a   :  { %v1176_v61 = vmul.f32 %v4644_v59, %v1174_v60 }
 0xc6c   :  { %1178 = vrot.lane.b32.xlu1 %v1176_v61, %s4855_s14 }
 0xc6f   :  { %v1147_v63 = vpop.permute.xlu0 %1146 }
 0xc70   :  { %v1149_v0 = vmul.f32 %v4646_v62, %v1147_v63 }
 0xc72   :  { %1151 = vrot.lane.b32.xlu1 %v1149_v0, %s4855_s14 }
 0xcde   :  { %v1179_v40 = vpop.permute.xlu1 %1178 }
 0xcdf   :  { %v5170_v5 = vadd.f32 %v1179_v40, %v1171_v2 }
 0xce1   :  { %4647 = vtanh.f32 %v5170_v5  ;;  %v1382_v56 = vrot.slane %v5170_v5, 2 }
 0xce4   :  { %v1152_v11 = vpop.permute.xlu1 %1151 }
 0xce5   :  { %v5174_v30 = vadd.f32 %v1152_v11, %v1144_v10 }
 0xce7   :  { %4649 = vtanh.f32 %v5174_v30 }
 0xceb   :  { %v4648_v12 = vpop.eup %4647 }
 0xcec   :  { %1184 = vrot.lane.b32.xlu0 %v4648_v12, %s4854_s4 }
 0xcf1   :  { %v4650_v13 = vpop.eup %4649 }
 0xcf2   :  { %1157 = vrot.lane.b32.xlu0 %v4650_v13, %s4854_s4 }
 0xd5e   :  { %v1185_v14 = vpop.permute.xlu0 %1184 }
 0xd5f   :  { %v5179_v15 = vmul.f32 %v4644_v59, %v1185_v14  ;;  %v1355_v59 = vrot.slane %v5174_v30, 6 }
 0xd61   :  { %v1268_v18 = vrot.slane %v5179_v15, 6 }
 0xd63   :  { %1269 = vrot.lane.b32.xlu1 %v1268_v18, %s4855_s14 }
 0xd64   :  { %v1158_v19 = vpop.permute.xlu0 %1157 }
 0xd65   :  { %v5183_v20 = vmul.f32 %v4646_v62, %v1158_v19 }
 0xd67   :  { %1189 = vrot.lane.b32.xlu1 %v5183_v20, %s4855_s14 }
 0xdd5   :  { %v1270_v22 = vpop.permute.xlu1 %1269 }
 0xdd6   :  { %4126 = vmatmul.mubr.msk.f32.vlgmr.msra.gmra.mrb[14].mxu0 %vm143_vm2, %v1270_v22 }
 0xdd7   :  { %4432 = vmatpush3.bf16.msra.mxu0 %v4950_v17  ;;  %4147 = vmatprep.mubr.msk.f32.mxu0 %vm4853_vm0, %v4852_v8 }
 0xdd8   :  { %4433 = vmatprep.subr.bf16.mxu0 %v4851_v3 }
 0xdd9   :  { %v1190_v25 = vpop.permute.xlu1 %1189 }
 0xdda   :  { %4115 = vmatmul.mubr.msk.f32.vlgmr.msra.gmra.mrb[10].mxu1 %vm143_vm2, %v1190_v25 }
 0xddb   :  { %4426 = vmatpush3.bf16.msra.mxu1 %v4928_v9  ;;  %4435 = vmatpush3.bf16.msra.mxu0 %v4966_v21 }
 0xddc   :  { %4427 = vmatprep.subr.bf16.mxu1 %v4851_v3  ;;  %4136 = vmatprep.mubr.msk.f32.mxu1 %vm4853_vm0, %v4852_v8 }
 0xddd   :  { %4442 = vmatprep.subr.bf16.mxu0 %v4851_v3 }
 0xddf   :  { %4429 = vmatpush3.bf16.msra.mxu1 %v4948_v16 }
 0xde0   :  { %4436 = vmatprep.subr.bf16.mxu1 %v4851_v3 }
 0xea9   :  { %v1339_v27 = vpop.f32.mrb[14].mxu0 }
 0xeaa   :  { %v1344_v28 = vrot.slane %v1339_v27, 4  ;;  %v4127_v29 = vpop.f32.mrb[15].mxu0 }
 0xeac   :  { %v1346_v31 = vadd.f32 %v1344_v28, %v5003_v32 }
 0xead   :  { %v1259_v33 = vpop.f32.mrb[10].mxu1 }
 0xeae   :  { %4651 = vtanh.f32 %v1346_v31  ;;  %v1264_v35 = vrot.slane %v1259_v33, 6  ;;  %v4116_v37 = vpop.f32.mrb[11].mxu1  ;;  %v3793_v43 = vmul.f32 -1.442695, %v1346_v31 }
 0xeb0   :  { %v1266_v38 = vadd.f32 %v1264_v35, %v5006_v36 }
 0xeb2   :  { %4653 = vtanh.f32 %v1266_v38  ;;  %v3792_v44 = vmul.f32 -1.442695, %v1266_v38 }
 0xeb3   :  { %4655 = vpow2.f32 %v3793_v43 }
 0xeb4   :  { %4657 = vpow2.f32 %v3792_v44 }
 0xeb8   :  { %v4652_v41 = vpop.eup %4651 }
 0xeb9   :  { %1386 = vrot.lane.b32.xlu0 %v4652_v41, %s4854_s4 }
 0xebc   :  { %v4654_v42 = vpop.eup %4653 }
 0xebd   :  { %1359 = vrot.lane.b32.xlu0 %v4654_v42, %s4854_s4  ;;  %v4656_v45 = vpop.eup %4655 }
 0xebe   :  { %v1377_v47 = vadd.f32 1.0, %v4656_v45  ;;  %v4658_v48 = vpop.eup %4657 }
 0xebf   :  { %v1350_v49 = vadd.f32 1.0, %v4658_v48 }
 0xec0   :  { %4659 = vrcp.f32 %v1377_v47 }
 0xec1   :  { %4661 = vrcp.f32 %v1350_v49 }
 0xeca   :  { %v4660_v50 = vpop.eup %4659 }
 0xecb   :  { %v4662_v53 = vpop.eup %4661  ;;  %v1384_v57 = vmul.f32 %v4660_v50, %v1382_v56 }
 0xecc   :  { %v1357_v61 = vmul.f32 %v4662_v53, %v1355_v59 }
 0xf2b   :  { %v1387_v51 = vpop.permute.xlu0 %1386 }
 0xf2c   :  { %v1389_v52 = vmul.f32 %v4660_v50, %v1387_v51 }
 0xf2e   :  { %1391 = vrot.lane.b32.xlu1 %v1389_v52, %s4855_s14 }
 0xf2f   :  { %v1360_v54 = vpop.permute.xlu0 %1359 }
 0xf30   :  { %v1362_v7 = vmul.f32 %v4662_v53, %v1360_v54 }
 0xf32   :  { %1364 = vrot.lane.b32.xlu1 %v1362_v7, %s4855_s14 }
 0xfa0   :  { %v1392_v58 = vpop.permute.xlu1 %1391 }
 0xfa1   :  { %v5209_v60 = vadd.f32 %v1392_v58, %v1384_v57 }
 0xfa3   :  { %4663 = vtanh.f32 %v5209_v60  ;;  %v1596_v45 = vrot.slane %v5209_v60, 2 }
 0xfa4   :  { %v1365_v62 = vpop.permute.xlu1 %1364 }
 0xfa5   :  { %v5212_v63 = vadd.f32 %v1365_v62, %v1357_v61 }
 0xfa7   :  { %4665 = vtanh.f32 %v5212_v63  ;;  %v1569_v49 = vrot.slane %v5212_v63, 6 }
 0xfad   :  { %v4664_v0 = vpop.eup %4663 }
 0xfae   :  { %1397 = vrot.lane.b32.xlu0 %v4664_v0, %s4854_s4 }
 0xfb1   :  { %v4666_v1 = vpop.eup %4665 }
 0xfb2   :  { %1370 = vrot.lane.b32.xlu0 %v4666_v1, %s4854_s4 }
0x1020   :  { %v1398_v2 = vpop.permute.xlu0 %1397 }
0x1021   :  { %v5217_v40 = vmul.f32 %v4660_v50, %v1398_v2 }
0x1023   :  { %v1482_v5 = vrot.slane %v5217_v40, 4 }
0x1024   :  { %v1371_v6 = vpop.permute.xlu0 %1370 }
0x1025   :  { %v5220_v10 = vmul.f32 %v4662_v53, %v1371_v6  ;;  %1483 = vrot.lane.b32.xlu1 %v1482_v5, %s4855_s14 }
0x1027   :  { %v1402_v11 = vrot.slane %v5220_v10, 2  ;;  %v1832_v61 = vsel %vm1826_vm3, %v5183_v20, %v5220_v10 }
0x1029   :  { %1403 = vrot.lane.b32.xlu1 %v1402_v11, %s4855_s14 }
0x1097   :  { %v1484_v30 = vpop.permute.xlu1 %1483 }
0x1098   :  { %4148 = vmatmul.mubr.msk.f32.vlgmr.msra.gmra.mrb[16].mxu0 %vm143_vm2, %v1484_v30 }
0x1099   :  { %4444 = vmatpush3.bf16.msra.mxu0 %v4950_v17  ;;  %4169 = vmatprep.mubr.msk.f32.mxu0 %vm4853_vm0, %v4852_v8 }
0x109a   :  { %4445 = vmatprep.subr.bf16.mxu0 %v4851_v3 }
0x109b   :  { %v1404_v12 = vpop.permute.xlu1 %1403 }
0x109c   :  { %4137 = vmatmul.mubr.msk.f32.vlgmr.msra.gmra.mrb[12].mxu1 %vm143_vm2, %v1404_v12 }
0x109d   :  { %4438 = vmatpush3.bf16.msra.mxu1 %v4928_v9  ;;  %4447 = vmatpush3.bf16.msra.mxu0 %v4966_v21 }
0x109e   :  { %4439 = vmatprep.subr.bf16.mxu1 %v4851_v3  ;;  %4158 = vmatprep.mubr.msk.f32.mxu1 %vm4853_vm0, %v4852_v8 }
0x109f   :  { %4464 = vmatprep.subr.bf16.mxu0 %v4851_v3 }
0x10a1   :  { %4441 = vmatpush3.bf16.msra.mxu1 %v4948_v16 }
0x116b   :  { %v1553_v17 = vpop.f32.mrb[16].mxu0 }
0x116c   :  { %v1558_v13 = vrot.slane %v1553_v17, 6  ;;  %v4149_v14 = vpop.f32.mrb[17].mxu0 }
0x116e   :  { %v1560_v18 = vadd.f32 %v1558_v13, %v5003_v32 }
0x116f   :  { %v1473_v19 = vpop.f32.mrb[12].mxu1 }
0x1170   :  { %4667 = vtanh.f32 %v1560_v18  ;;  %v1478_v22 = vrot.slane %v1473_v19, 4  ;;  %v4138_v9 = vpop.f32.mrb[13].mxu1  ;;  %v3797_v28 = vmul.f32 -1.442695, %v1560_v18 }
0x1172   :  { %v1480_v21 = vadd.f32 %v1478_v22, %v5006_v36 }
0x1174   :  { %4669 = vtanh.f32 %v1480_v21  ;;  %v3796_v16 = vmul.f32 -1.442695, %v1480_v21 }
0x1175   :  { %4671 = vpow2.f32 %v3797_v28 }
0x1176   :  { %4673 = vpow2.f32 %v3796_v16 }
0x117a   :  { %v4668_v25 = vpop.eup %4667 }
0x117b   :  { %1600 = vrot.lane.b32.xlu0 %v4668_v25, %s4854_s4 }
0x117e   :  { %v4670_v27 = vpop.eup %4669 }
0x117f   :  { %1573 = vrot.lane.b32.xlu0 %v4670_v27, %s4854_s4  ;;  %v4672_v29 = vpop.eup %4671 }
0x1180   :  { %v1591_v31 = vadd.f32 1.0, %v4672_v29  ;;  %v4674_v33 = vpop.eup %4673 }
0x1181   :  { %v1564_v35 = vadd.f32 1.0, %v4674_v33 }
0x1182   :  { %4675 = vrcp.f32 %v1591_v31 }
0x1183   :  { %4677 = vrcp.f32 %v1564_v35 }
0x118c   :  { %v4676_v37 = vpop.eup %4675 }
0x118d   :  { %v4678_v42 = vpop.eup %4677  ;;  %v1598_v47 = vmul.f32 %v4676_v37, %v1596_v45  ;;  %v1849_v45 = vld [vmem:[%s5662_s5 + $0x40] sm:$0xff] }
0x118e   :  { %v1571_v51 = vmul.f32 %v4678_v42, %v1569_v49  ;;  %v1854_v49 = vld [vmem:[%s5662_s5 + $0x68] sm:$0xff] }
0x11ed   :  { %v1601_v38 = vpop.permute.xlu0 %1600 }
0x11ee   :  { %v1603_v41 = vmul.f32 %v4676_v37, %v1601_v38 }
0x11f0   :  { %1605 = vrot.lane.b32.xlu1 %v1603_v41, %s4855_s14 }
0x11f1   :  { %v1574_v43 = vpop.permute.xlu0 %1573 }
0x11f2   :  { %v1576_v44 = vmul.f32 %v4678_v42, %v1574_v43  ;;  %v1850_v43 = vld [vmem:[%s5662_s5 + $0x48] sm:$0xff] }
0x11f4   :  { %1578 = vrot.lane.b32.xlu1 %v1576_v44, %s4855_s14  ;;  %v1852_v44 = vld [vmem:[%s5662_s5 + $0x58] sm:$0xff] }
0x1262   :  { %v1606_v48 = vpop.permute.xlu1 %1605 }
0x1263   :  { %v1608_v50 = vadd.f32 %v1606_v48, %v1598_v47  ;;  %v4448_v47 = vpack.c.bf16 %v1852_v44, %v1850_v43  ;;  %v1851_v48 = vld [vmem:[%s5662_s5 + $0x50] sm:$0xff] }
0x1265   :  { %4679 = vtanh.f32 %v1608_v50  ;;  %v1807_v16 = vrot.slane %v1608_v50, 2  ;;  %v1856_v50 = vld [vmem:[%s5662_s5 + $0x78] sm:$0xff]  ;;  %4449 = vmatprep.subr.bf16.mxu1 %v4448_v47 }
0x1266   :  { %v1579_v52 = vpop.permute.xlu1 %1578 }
0x1267   :  { %v1581_v53 = vadd.f32 %v1579_v52, %v1571_v51  ;;  %v4450_v51 = vpack.c.bf16 %v1851_v48, %v1849_v45  ;;  %v4452_v52 = vpack.c.bf16 %v1856_v50, %v1854_v49 }
0x1269   :  { %4681 = vtanh.f32 %v1581_v53  ;;  %v1780_v35 = vrot.slane %v1581_v53, 6  ;;  %v1853_v53 = vld [vmem:[%s5662_s5 + $0x60] sm:$0xff] }
0x126f   :  { %v4680_v54 = vpop.eup %4679 }
0x1270   :  { %1611 = vrot.lane.b32.xlu0 %v4680_v54, %s4854_s4  ;;  %v1855_v54 = vld [vmem:[%s5662_s5 + $0x70] sm:$0xff] }
0x1273   :  { %v4682_v7 = vpop.eup %4681 }
0x1274   :  { %1584 = vrot.lane.b32.xlu0 %v4682_v7, %s4854_s4  ;;  %v2047_v7 = vld [vmem:[%s5663_s6] sm:$0xff] }
0x12e2   :  { %v1612_v56 = vpop.permute.xlu0 %1611 }
0x12e3   :  { %v5248_v57 = vmul.f32 %v4676_v37, %v1612_v56  ;;  %v2048_v56 = vld [vmem:[%s5663_s6 + $0x8] sm:$0xff] }
0x12e5   :  { %v1696_v58 = vrot.slane %v5248_v57, 2 }
0x12e6   :  { %v1585_v59 = vpop.permute.xlu0 %1584 }
0x12e7   :  { %v1587_v60 = vmul.f32 %v4678_v42, %v1585_v59  ;;  %1697 = vrot.lane.b32.xlu1 %v1696_v58, %s4855_s14  ;;  %v4454_v58 = vpack.c.bf16 %v1855_v54, %v1853_v53  ;;  %v5305_v59 = vpack.c.bf16 %v2048_v56, %v2047_v7 }
0x12e9   :  { %v1616_v62 = vrot.slane %v1587_v60, 4  ;;  %v5256_v63 = vsel %vm1828_vm4, %v1832_v61, %v1587_v60  ;;  %v1842_v61 = vld [vmem:[%s5662_s5 + $0x8] sm:$0xff] }
0x12eb   :  { %1617 = vrot.lane.b32.xlu1 %v1616_v62, %s4855_s14  ;;  %v1844_v62 = vld [vmem:[%s5662_s5 + $0x18] sm:$0xff] }
0x1359   :  { %v1698_v0 = vpop.permute.xlu1 %1697 }
0x135a   :  { %4170 = vmatmul.mubr.msk.f32.vlgmr.msra.gmra.mrb[18].mxu0 %vm143_vm2, %v1698_v0  ;;  %v4456_v0 = vpack.c.bf16 %v1844_v62, %v1842_v61 }
0x135b   :  { %4180 = vmatprep.mubr.msk.f32.mxu0 %vm4853_vm0, %v4852_v8  ;;  %4466 = vmatpush3.bf16.msra.mxu0 %v5305_v59 }
0x135c   :  { %4467 = vmatprep.subr.bf16.mxu0 %v4851_v3 }
0x135d   :  { %v1618_v1 = vpop.permute.xlu1 %1617 }
0x135e   :  { %4159 = vmatmul.mubr.msk.f32.vlgmr.msra.gmra.mrb[14].mxu1 %vm143_vm2, %v1618_v1  ;;  %v2049_v1 = vld [vmem:[%s5663_s6 + $0x10] sm:$0xff] }
0x135f   :  { %1931 = vmatprep.mubr.f32.mxu1 %v4852_v8  ;;  %4451 = vmatpush1.bf16.msra.mxu1 %v4450_v51 }
0x1360   :  { %4453 = vmatprep.subr.bf16.mxu1 %v4452_v52 }
0x1363   :  { %4455 = vmatpush1.bf16.msra.mxu1 %v4454_v58 }
0x1364   :  { %4457 = vmatprep.subr.bf16.mxu1 %v4456_v0 }
0x142d   :  { %v1767_v2 = vpop.f32.mrb[18].mxu0 }
0x142e   :  { %v1771_v20 = vadd.f32 %v1767_v2, %v5003_v32  ;;  %v4171_v5 = vpop.f32.mrb[19].mxu0  ;;  %v2050_v2 = vld [vmem:[%s5663_s6 + $0x18] sm:$0xff] }
0x142f   :  { %v2052_v5 = vld [vmem:[%s5664_s7 + $0x8] sm:$0xff] }
0x1430   :  { %4683 = vtanh.f32 %v1771_v20  ;;  %v3801_v13 = vmul.f32 -1.442695, %v1771_v20  ;;  %v5324_v20 = vpack.c.bf16 %v2050_v2, %v2049_v1 }
0x1431   :  { %v1687_v6 = vpop.f32.mrb[14].mxu1 }
0x1432   :  { %v1692_v10 = vrot.slane %v1687_v6, 2  ;;  %v4160_v11 = vpop.f32.mrb[15].mxu1  ;;  %4469 = vmatpush3.bf16.msra.mxu0 %v5324_v20 }
0x1433   :  { %4470 = vmatprep.subr.bf16.mxu0 %v4851_v3 }
0x1434   :  { %v1694_v30 = vadd.f32 %v1692_v10, %v5006_v36 }
0x1435   :  { %4181 = vmatmul.mubr.f32.vlgmr.msra.gmra.mrb[20].mxu0 %v4852_v8 }
0x1436   :  { %4685 = vtanh.f32 %v1694_v30  ;;  %v3800_v14 = vmul.f32 -1.442695, %v1694_v30  ;;  %4191 = vmatprep.mubr.msk.f32.mxu0 %vm4853_vm0, %v4852_v8  ;;  %v2053_v30 = vld [vmem:[%s5664_s7 + $0x10] sm:$0xff] }
0x1437   :  { %4687 = vpow2.f32 %v3801_v13 }
0x1438   :  { %4689 = vpow2.f32 %v3800_v14  ;;  %v1838_v14 = vsel %vm1826_vm3, %v5140_v34, %v5099_v46 }
0x143a   :  { %v4684_v12 = vpop.eup %4683 }
0x143b   :  { %1811 = vrot.lane.b32.xlu0 %v4684_v12, %s4854_s4  ;;  %v2054_v12 = vld [vmem:[%s5664_s7 + $0x18] sm:$0xff] }
0x1440   :  { %v4686_v17 = vpop.eup %4685 }
0x1441   :  { %1784 = vrot.lane.b32.xlu0 %v4686_v17, %s4854_s4  ;;  %v4688_v18 = vpop.eup %4687  ;;  %v5349_v17 = vpack.c.bf16 %v2054_v12, %v2053_v30 }
0x1442   :  { %v1802_v32 = vadd.f32 1.0, %v4688_v18  ;;  %v4690_v19 = vpop.eup %4689 }
0x1443   :  { %v1775_v22 = vadd.f32 1.0, %v4690_v19 }
0x1444   :  { %4691 = vrcp.f32 %v1802_v32 }
0x1445   :  { %4693 = vrcp.f32 %v1775_v22 }
0x144e   :  { %v4692_v9 = vpop.eup %4691 }
0x144f   :  { %v5269_v25 = vpop.eup %4693  ;;  %v1809_v29 = vmul.f32 %v4692_v9, %v1807_v16 }
0x1450   :  { %v1782_v37 = vmul.f32 %v5269_v25, %v1780_v35 }
0x14ad   :  { %v1812_v21 = vpop.permute.xlu0 %1811 }
0x14ae   :  { %v1814_v36 = vmul.f32 %v4692_v9, %v1812_v21  ;;  %v1845_v21 = vld [vmem:[%s5662_s5 + $0x20] sm:$0xff] }
0x14b0   :  { %1816 = vrot.lane.b32.xlu1 %v1814_v36, %s4855_s14  ;;  %v1847_v36 = vld [vmem:[%s5662_s5 + $0x30] sm:$0xff] }
0x14b3   :  { %v1785_v27 = vpop.permute.xlu0 %1784 }
0x14b4   :  { %v1787_v28 = vmul.f32 %v5269_v25, %v1785_v27  ;;  %v4462_v27 = vpack.c.bf16 %v1847_v36, %v1845_v21 }
0x14b6   :  { %1789 = vrot.lane.b32.xlu1 %v1787_v28, %s4855_s14 }
0x1522   :  { %v1817_v31 = vpop.permute.xlu1 %1816 }
0x1523   :  { %v1819_v33 = vadd.f32 %v1817_v31, %v1809_v29  ;;  %v2121_v31 = vpop.f32.mrb[20].mxu0 }
0x1525   :  { %4695 = vtanh.f32 %v1819_v33  ;;  %v4182_v33 = vpop.f32.mrb[21].mxu0 }
0x1528   :  { %v1790_v38 = vpop.permute.xlu1 %1789 }
0x1529   :  { %v1792_v41 = vadd.f32 %v1790_v38, %v1782_v37  ;;  %v2031_v38 = vld [vmem:[%s5665_s8] sm:$0x3]  ;;  %s4856_s8 = smov 96  }
0x152b   :  { %4697 = vtanh.f32 %v1792_v41  ;;  %v2036_v41 = vrot.slane %v2031_v38, %v43_v24 }
0x152f   :  { %v4696_v42 = vpop.eup %4695 }
0x1530   :  { %1822 = vrot.lane.b32.xlu0 %v4696_v42, %s4854_s4  ;;  %v2040_v42 = vrot.slane %v2031_v38, %v47_v26 }
0x1535   :  { %v4698_v60 = vpop.eup %4697 }
0x1536   :  { %1795 = vrot.lane.b32.xlu0 %v4698_v60, %s4854_s4 }
0x153a   :  { %1946 = vrot.lane.b32.xlu0 %v5146_v39, %s4855_s14  ;;  %v2051_v39 = vld [vmem:[%s5664_s7] sm:$0xff] }
0x153b   :  { %v5334_v6 = vpack.c.bf16 %v2052_v5, %v2051_v39 }
0x153d   :  { %4472 = vmatpush3.bf16.msra.mxu0 %v5334_v6 }
0x153e   :  { %4473 = vmatprep.subr.bf16.mxu0 %v4851_v3 }
0x1541   :  { %4475 = vmatpush3.bf16.msra.mxu0 %v5349_v17 }
0x1542   :  { %4482 = vmatprep.subr.bf16.mxu0 %v4851_v3 }
0x1544   :  { %4192 = vmatmul.mubr.f32.vlgmr.msra.gmra.mrb[22].mxu0 %v4852_v8 }
0x1545   :  { %4484 = vmatpush3.bf16.msra.mxu0 %v5334_v6  ;;  %4213 = vmatprep.mubr.msk.f32.mxu0 %vm4853_vm0, %v4852_v8 }
0x1546   :  { %4485 = vmatprep.subr.bf16.mxu0 %v4851_v3 }
0x1549   :  { %4487 = vmatpush3.bf16.msra.mxu0 %v5349_v17 }
0x154a   :  { %4494 = vmatprep.subr.bf16.mxu0 %v4851_v3 }
0x15a2   :  { %v1823_v10 = vpop.permute.xlu0 %1822 }
0x15a3   :  { %v5340_v11 = vmul.f32 %v4692_v9, %v1823_v10 }
0x15a5   :  { %v1835_v13 = vsel %vm1826_vm3, %v5340_v11, %v5248_v57  ;;  %v1839_v57 = vsel %vm1828_vm4, %v1838_v14, %v5061_v55 }
0x15a6   :  { %v1836_v18 = vsel %vm1828_vm4, %v1835_v13, %v5217_v40  ;;  %v1840_v34 = vsel %vm1830_vm5, %v1839_v57, %v5023_v4  ;;  %v1843_v4 = vld [vmem:[%s5662_s5 + $0x10] sm:$0xff]  ;;  %v1846_v40 = vld [vmem:[%s5662_s5 + $0x28] sm:$0xff] }
0x15a7   :  { %v1837_v32 = vsel %vm1830_vm5, %v1836_v18, %v5179_v15  ;;  %v1841_v15 = vld [vmem:[%s5662_s5] sm:$0xff] }
0x15a8   :  { %1859 = vrot.lane.b32.xlu1 %v1837_v32, %s4855_s14  ;;  %v1796_v19 = vpop.permute.xlu0 %1795  ;;  %v4458_v22 = vpack.c.bf16 %v1843_v4, %v1841_v15 }
0x15a9   :  { %v5371_v46 = vmul.f32 %v5269_v25, %v1796_v19 }
0x15ab   :  { %v1834_v55 = vsel %vm1830_vm5, %v5256_v63, %v5371_v46  ;;  %v1848_v63 = vld [vmem:[%s5662_s5 + $0x38] sm:$0xff] }
0x15ac   :  { %1861 = vrot.lane.b32.xlu1 %v1840_v34, %s4855_s14  ;;  %v4460_v9 = vpack.c.bf16 %v1848_v63, %v1846_v40  ;;  %v1947_v16 = vpop.permute.xlu0 %1946 }
0x15b0   :  { %1948 = vrot.lane.b32.xlu1 %v1834_v55, %s4855_s14 }
0x1617   :  { %v2192_v35 = vpop.f32.mrb[22].mxu0 }
0x1618   :  { %v4193_v37 = vpop.f32.mrb[23].mxu0  ;;  %v2197_v50 = vrot.slane %v2192_v35, 2 }
0x161a   :  { %v1860_v25 = vpop.permute.xlu1 %1859 }
0x161b   :  { %3802 = vmatmul.mubr.msk.f32.vlgmr.msra.gmra.mrb[16].mxu1 %vm143_vm2, %v1860_v25 }
0x161c   :  { %4459 = vmatpush1.bf16.msra.mxu1 %v4458_v22  ;;  %1937 = vmatprep.mubr.f32.mxu1 %v4852_v8 }
0x161d   :  { %4461 = vmatprep.subr.bf16.mxu1 %v4460_v9 }
0x161e   :  { %v1862_v28 = vpop.permute.xlu1 %1861 }
0x161f   :  { %3803 = vmatmul.mubr.msk.f32.gmra.mrb[18].mxu1 %vm143_vm2, %v1862_v28 }
0x1620   :  { %4463 = vmatpush1.bf16.msra.mxu1 %v4462_v27  ;;  %2018 = vmatprep.mubr.f32.mxu1 %v4852_v8 }
0x1621   :  { %4476 = vmatprep.subr.bf16.mxu1 %v4851_v3 }
0x1622   :  { %v1949_v29 = vpop.permute.xlu1 %1948 }
0x1623   :  { %3804 = vmatmul.mubr.msk.f32.vlgmr.msra.gmra.mrb[16].mxu1 %vm143_vm2, %v1947_v16 }
0x1624   :  { %2024 = vmatprep.mubr.f32.mxu1 %v4852_v8  ;;  %4478 = vmatpush3.bf16.msra.mxu1 %v5305_v59 }
0x1625   :  { %4479 = vmatprep.subr.bf16.mxu1 %v4851_v3 }
0x1627   :  { %3805 = vmatmul.mubr.msk.f32.gmra.mrb[18].mxu1 %vm143_vm2, %v1949_v29 }
0x1628   :  { %4481 = vmatpush3.bf16.msra.mxu1 %v5324_v20  ;;  %4202 = vmatprep.mubr.msk.f32.mxu1 %vm4853_vm0, %v4852_v8 }
0x1629   :  { %4488 = vmatprep.subr.bf16.mxu1 %v4851_v3 }
0x16f6   :  { %v2020_v43 = vpop.f32.mrb[16].mxu1 }
0x16f7   :  { %v5422_v44 = vadd.f32 %v2036_v41, %v2020_v43  ;;  %v2022_v45 = vpop.f32.mrb[17].mxu1 }
0x16f8   :  { %v5424_v47 = vadd.f32 %v2040_v42, %v2022_v45 }
0x16f9   :  { %v2125_v48 = vadd.f32 %v2121_v31, %v5422_v44 }
0x16fa   :  { %v2026_v49 = vpop.f32.mrb[18].mxu1 }
0x16fb   :  { %4699 = vtanh.f32 %v2125_v48  ;;  %v5427_v51 = vadd.f32 %v2036_v41, %v2026_v49  ;;  %v2028_v52 = vpop.f32.mrb[19].mxu1  ;;  %v3806_v54 = vmul.f32 -1.442695, %v2125_v48 }
0x16fc   :  { %v5429_v53 = vadd.f32 %v2040_v42, %v2028_v52 }
0x16fe   :  { %v2199_v24 = vadd.f32 %v2197_v50, %v5429_v53 }
0x1700   :  { %4701 = vtanh.f32 %v2199_v24  ;;  %v3807_v7 = vmul.f32 -1.442695, %v2199_v24 }
0x1701   :  { %4703 = vpow2.f32 %v3806_v54 }
0x1702   :  { %4705 = vpow2.f32 %v3807_v7 }
0x1705   :  { %v4700_v23 = vpop.eup %4699 }
0x1706   :  { %2209 = vrot.lane.b32.xlu0 %v4700_v23, %s4854_s4 }
0x170a   :  { %v4702_v26 = vpop.eup %4701 }
0x170b   :  { %2233 = vrot.lane.b32.xlu1 %v4702_v26, %s4854_s4  ;;  %v4704_v56 = vpop.eup %4703 }
0x170c   :  { %v2203_v58 = vadd.f32 1.0, %v4704_v56  ;;  %v4706_v60 = vpop.eup %4705 }
0x170d   :  { %v2227_v61 = vadd.f32 1.0, %v4706_v60 }
0x170e   :  { %4707 = vrcp.f32 %v2203_v58 }
0x170f   :  { %4709 = vrcp.f32 %v2227_v61 }
0x1718   :  { %v4708_v62 = vpop.eup %4707 }
0x1719   :  { %v4710_v2 = vpop.eup %4709  ;;  %v2207_v10 = vmul.f32 0.0, %v4708_v62 }
0x171a   :  { %v2231_v13 = vmul.f32 0.0, %v4710_v2 }
0x1778   :  { %v2210_v0 = vpop.permute.xlu0 %2209 }
0x1779   :  { %v2212_v1 = vmul.f32 %v4708_v62, %v2210_v0 }
0x177b   :  { %2214 = vrot.lane.b32.xlu0 %v2212_v1, %s4855_s14 }
0x177d   :  { %v2234_v39 = vpop.permute.xlu1 %2233 }
0x177e   :  { %v2236_v5 = vmul.f32 %v4710_v2, %v2234_v39 }
0x1780   :  { %2238 = vrot.lane.b32.xlu1 %v2236_v5, %s4855_s14 }
0x17ed   :  { %v2215_v30 = vpop.permute.xlu0 %2214 }
0x17ee   :  { %v5436_v12 = vadd.f32 %v2215_v30, %v2207_v10 }
0x17f0   :  { %4711 = vtanh.f32 %v5436_v12  ;;  %v2415_v24 = vrot.slane %v5436_v12, 6 }
0x17f2   :  { %v2239_v14 = vpop.permute.xlu1 %2238 }
0x17f3   :  { %v5439_v18 = vadd.f32 %v2239_v14, %v2231_v13 }
0x17f5   :  { %4713 = vtanh.f32 %v5439_v18  ;;  %v2442_v7 = vrot.slane %v5439_v18, 2 }
0x17fa   :  { %v4712_v32 = vpop.eup %4711 }
0x17fb   :  { %2220 = vrot.lane.b32.xlu0 %v4712_v32, %s4854_s4 }
0x17ff   :  { %v4714_v19 = vpop.eup %4713 }
0x1800   :  { %2244 = vrot.lane.b32.xlu1 %v4714_v19, %s4854_s4 }
0x186d   :  { %v2221_v57 = vpop.permute.xlu0 %2220 }
0x186e   :  { %v2223_v34 = vmul.f32 %v4708_v62, %v2221_v57 }
0x1870   :  { %2249 = vrot.lane.b32.xlu0 %v2223_v34, %s4855_s14 }
0x1872   :  { %v2245_v55 = vpop.permute.xlu1 %2244 }
0x1873   :  { %v2247_v15 = vmul.f32 %v4710_v2, %v2245_v55 }
0x1875   :  { %v2328_v4 = vrot.slane %v2247_v15, 6 }
0x1877   :  { %2329 = vrot.lane.b32.xlu1 %v2328_v4, %s4855_s14 }
0x18e2   :  { %v2250_v40 = vpop.permute.xlu0 %2249 }
0x18e3   :  { %4203 = vmatmul.mubr.msk.f32.vlgmr.msra.gmra.mrb[20].mxu1 %vm143_vm2, %v2250_v40 }
0x18e4   :  { %4490 = vmatpush3.bf16.msra.mxu1 %v5305_v59  ;;  %4224 = vmatprep.mubr.msk.f32.mxu1 %vm4853_vm0, %v4852_v8 }
0x18e5   :  { %4491 = vmatprep.subr.bf16.mxu1 %v4851_v3 }
0x18e8   :  { %4493 = vmatpush3.bf16.msra.mxu1 %v5324_v20 }
0x18e9   :  { %v2330_v63 = vpop.permute.xlu1 %2329  ;;  %4500 = vmatprep.subr.bf16.mxu1 %v4851_v3 }
0x18ea   :  { %4214 = vmatmul.mubr.msk.f32.vlgmr.msra.gmra.mrb[24].mxu0 %vm143_vm2, %v2330_v63 }
0x18eb   :  { %4496 = vmatpush3.bf16.msra.mxu0 %v5334_v6  ;;  %4235 = vmatprep.mubr.msk.f32.mxu0 %vm4853_vm0, %v4852_v8 }
0x18ec   :  { %4497 = vmatprep.subr.bf16.mxu0 %v4851_v3 }
0x18ef   :  { %4499 = vmatpush3.bf16.msra.mxu0 %v5349_v17 }
0x18f0   :  { %4506 = vmatprep.subr.bf16.mxu0 %v4851_v3 }
0x19b6   :  { %v2319_v22 = vpop.f32.mrb[20].mxu1 }
0x19b7   :  { %v2324_v9 = vrot.slane %v2319_v22, 6  ;;  %v4204_v21 = vpop.f32.mrb[21].mxu1 }
0x19b9   :  { %v2326_v36 = vadd.f32 %v2324_v9, %v5422_v44 }
0x19bb   :  { %4715 = vtanh.f32 %v2326_v36  ;;  %v3810_v33 = vmul.f32 -1.442695, %v2326_v36 }
0x19bd   :  { %v2399_v25 = vpop.f32.mrb[24].mxu0 }
0x19be   :  { %v2404_v27 = vrot.slane %v2399_v25, 4  ;;  %v4215_v28 = vpop.f32.mrb[25].mxu0 }
0x19c0   :  { %v2406_v16 = vadd.f32 %v2404_v27, %v5429_v53 }
0x19c2   :  { %4717 = vtanh.f32 %v2406_v16  ;;  %v3811_v35 = vmul.f32 -1.442695, %v2406_v16 }
0x19c3   :  { %4719 = vpow2.f32 %v3810_v33 }
0x19c4   :  { %4721 = vpow2.f32 %v3811_v35 }
0x19c5   :  { %v4716_v29 = vpop.eup %4715 }
0x19c6   :  { %2419 = vrot.lane.b32.xlu0 %v4716_v29, %s4854_s4 }
0x19cc   :  { %v4718_v31 = vpop.eup %4717 }
0x19cd   :  { %2446 = vrot.lane.b32.xlu1 %v4718_v31, %s4854_s4  ;;  %v4720_v37 = vpop.eup %4719 }
0x19ce   :  { %v2410_v38 = vadd.f32 1.0, %v4720_v37  ;;  %v4722_v41 = vpop.eup %4721 }
0x19cf   :  { %v2437_v42 = vadd.f32 1.0, %v4722_v41 }
0x19d0   :  { %4723 = vrcp.f32 %v2410_v38 }
0x19d1   :  { %4725 = vrcp.f32 %v2437_v42 }
0x19da   :  { %v4724_v43 = vpop.eup %4723 }
0x19db   :  { %v4726_v49 = vpop.eup %4725  ;;  %v2417_v23 = vmul.f32 %v4724_v43, %v2415_v24 }
0x19dc   :  { %v2444_v56 = vmul.f32 %v4726_v49, %v2442_v7 }
0x1a38   :  { %v2420_v45 = vpop.permute.xlu0 %2419 }
0x1a39   :  { %v2422_v48 = vmul.f32 %v4724_v43, %v2420_v45 }
0x1a3b   :  { %2424 = vrot.lane.b32.xlu0 %v2422_v48, %s4855_s14 }
0x1a3f   :  { %v2447_v50 = vpop.permute.xlu1 %2446 }
0x1a40   :  { %v2449_v52 = vmul.f32 %v4726_v49, %v2447_v50 }
0x1a42   :  { %2451 = vrot.lane.b32.xlu1 %v2449_v52, %s4855_s14 }
0x1aad   :  { %v2425_v26 = vpop.permute.xlu0 %2424 }
0x1aae   :  { %v5467_v54 = vadd.f32 %v2425_v26, %v2417_v23 }
0x1ab0   :  { %4727 = vtanh.f32 %v5467_v54  ;;  %v2629_v33 = vrot.slane %v5467_v54, 6 }
0x1ab4   :  { %v2452_v58 = vpop.permute.xlu1 %2451 }
0x1ab5   :  { %v5471_v60 = vadd.f32 %v2452_v58, %v2444_v56 }
0x1ab7   :  { %4729 = vtanh.f32 %v5471_v60  ;;  %v2656_v41 = vrot.slane %v5471_v60, 2 }
0x1aba   :  { %v4728_v61 = vpop.eup %4727 }
0x1abb   :  { %2430 = vrot.lane.b32.xlu0 %v4728_v61, %s4854_s4 }
0x1ac1   :  { %v4730_v62 = vpop.eup %4729 }
0x1ac2   :  { %2457 = vrot.lane.b32.xlu1 %v4730_v62, %s4854_s4 }
0x1b2d   :  { %v2431_v0 = vpop.permute.xlu0 %2430 }
0x1b2e   :  { %v2433_v1 = vmul.f32 %v4724_v43, %v2431_v0 }
0x1b30   :  { %v2462_v2 = vrot.slane %v2433_v1, 2 }
0x1b32   :  { %2463 = vrot.lane.b32.xlu0 %v2462_v2, %s4855_s14 }
0x1b34   :  { %v2458_v39 = vpop.permute.xlu1 %2457 }
0x1b35   :  { %v2460_v5 = vmul.f32 %v4726_v49, %v2458_v39 }
0x1b37   :  { %v2542_v10 = vrot.slane %v2460_v5, 4 }
0x1b39   :  { %2543 = vrot.lane.b32.xlu1 %v2542_v10, %s4855_s14 }
0x1ba4   :  { %v2464_v30 = vpop.permute.xlu0 %2463 }
0x1ba5   :  { %4225 = vmatmul.mubr.msk.f32.vlgmr.msra.gmra.mrb[22].mxu1 %vm143_vm2, %v2464_v30 }
0x1ba6   :  { %4502 = vmatpush3.bf16.msra.mxu1 %v5305_v59  ;;  %4246 = vmatprep.mubr.msk.f32.mxu1 %vm4853_vm0, %v4852_v8 }
0x1ba7   :  { %4503 = vmatprep.subr.bf16.mxu1 %v4851_v3 }
0x1baa   :  { %4505 = vmatpush3.bf16.msra.mxu1 %v5324_v20 }
0x1bab   :  { %v2544_v12 = vpop.permute.xlu1 %2543  ;;  %4512 = vmatprep.subr.bf16.mxu1 %v4851_v3 }
0x1bac   :  { %4236 = vmatmul.mubr.msk.f32.vlgmr.msra.gmra.mrb[26].mxu0 %vm143_vm2, %v2544_v12 }
0x1bad   :  { %4508 = vmatpush3.bf16.msra.mxu0 %v5334_v6  ;;  %4257 = vmatprep.mubr.msk.f32.mxu0 %vm4853_vm0, %v4852_v8 }
0x1bae   :  { %4509 = vmatprep.subr.bf16.mxu0 %v4851_v3 }
0x1bb1   :  { %4511 = vmatpush3.bf16.msra.mxu0 %v5349_v17 }
0x1bb2   :  { %4518 = vmatprep.subr.bf16.mxu0 %v4851_v3 }
0x1c78   :  { %v2533_v13 = vpop.f32.mrb[22].mxu1 }
0x1c79   :  { %v2538_v14 = vrot.slane %v2533_v13, 4  ;;  %v4226_v18 = vpop.f32.mrb[23].mxu1 }
0x1c7b   :  { %v2540_v32 = vadd.f32 %v2538_v14, %v5422_v44 }
0x1c7d   :  { %4731 = vtanh.f32 %v2540_v32  ;;  %v3814_v40 = vmul.f32 -1.442695, %v2540_v32 }
0x1c7f   :  { %v2613_v19 = vpop.f32.mrb[26].mxu0 }
0x1c80   :  { %v2618_v57 = vrot.slane %v2613_v19, 6  ;;  %v4237_v34 = vpop.f32.mrb[27].mxu0 }
0x1c82   :  { %v2620_v55 = vadd.f32 %v2618_v57, %v5429_v53 }
0x1c84   :  { %4733 = vtanh.f32 %v2620_v55  ;;  %v3815_v63 = vmul.f32 -1.442695, %v2620_v55 }
0x1c85   :  { %4735 = vpow2.f32 %v3814_v40 }
0x1c86   :  { %4737 = vpow2.f32 %v3815_v63 }
0x1c87   :  { %v4732_v15 = vpop.eup %4731 }
0x1c88   :  { %2633 = vrot.lane.b32.xlu0 %v4732_v15, %s4854_s4 }
0x1c8e   :  { %v4734_v4 = vpop.eup %4733 }
0x1c8f   :  { %2660 = vrot.lane.b32.xlu1 %v4734_v4, %s4854_s4  ;;  %v4736_v22 = vpop.eup %4735 }
0x1c90   :  { %v2624_v9 = vadd.f32 1.0, %v4736_v22  ;;  %v4738_v21 = vpop.eup %4737 }
0x1c91   :  { %v2651_v36 = vadd.f32 1.0, %v4738_v21 }
0x1c92   :  { %4739 = vrcp.f32 %v2624_v9 }
0x1c93   :  { %4741 = vrcp.f32 %v2651_v36 }
0x1c9c   :  { %v4740_v25 = vpop.eup %4739 }
0x1c9d   :  { %v4742_v16 = vpop.eup %4741  ;;  %v2631_v35 = vmul.f32 %v4740_v25, %v2629_v33 }
0x1c9e   :  { %v2658_v42 = vmul.f32 %v4742_v16, %v2656_v41 }
0x1cfa   :  { %v2634_v27 = vpop.permute.xlu0 %2633 }
0x1cfb   :  { %v2636_v28 = vmul.f32 %v4740_v25, %v2634_v27 }
0x1cfd   :  { %2638 = vrot.lane.b32.xlu0 %v2636_v28, %s4855_s14 }
0x1d01   :  { %v2661_v29 = vpop.permute.xlu1 %2660 }
0x1d02   :  { %v2663_v31 = vmul.f32 %v4742_v16, %v2661_v29 }
0x1d04   :  { %2665 = vrot.lane.b32.xlu1 %v2663_v31, %s4855_s14 }
0x1d6f   :  { %v2639_v37 = vpop.permute.xlu0 %2638 }
0x1d70   :  { %v5499_v38 = vadd.f32 %v2639_v37, %v2631_v35 }
0x1d72   :  { %4743 = vtanh.f32 %v5499_v38  ;;  %v2840_v55 = vrot.slane %v5499_v38, 6 }
0x1d76   :  { %v2666_v43 = vpop.permute.xlu1 %2665 }
0x1d77   :  { %v5503_v45 = vadd.f32 %v2666_v43, %v2658_v42 }
0x1d79   :  { %4745 = vtanh.f32 %v5503_v45  ;;  %v2867_v63 = vrot.slane %v5503_v45, 2 }
0x1d7c   :  { %v4744_v48 = vpop.eup %4743 }
0x1d7d   :  { %2644 = vrot.lane.b32.xlu0 %v4744_v48, %s4854_s4 }
0x1d83   :  { %v4746_v49 = vpop.eup %4745 }
0x1d84   :  { %2671 = vrot.lane.b32.xlu1 %v4746_v49, %s4854_s4 }
0x1def   :  { %v2645_v50 = vpop.permute.xlu0 %2644 }
0x1df0   :  { %v2647_v52 = vmul.f32 %v4740_v25, %v2645_v50 }
0x1df2   :  { %v2676_v24 = vrot.slane %v2647_v52, 4 }
0x1df4   :  { %2677 = vrot.lane.b32.xlu0 %v2676_v24, %s4855_s14 }
0x1df6   :  { %v2672_v23 = vpop.permute.xlu1 %2671 }
0x1df7   :  { %v2674_v26 = vmul.f32 %v4742_v16, %v2672_v23 }
0x1df9   :  { %v2756_v54 = vrot.slane %v2674_v26, 2 }
0x1dfb   :  { %2757 = vrot.lane.b32.xlu1 %v2756_v54, %s4855_s14 }
0x1e66   :  { %v2678_v7 = vpop.permute.xlu0 %2677 }
0x1e67   :  { %4247 = vmatmul.mubr.msk.f32.vlgmr.msra.gmra.mrb[24].mxu1 %vm143_vm2, %v2678_v7 }
0x1e68   :  { %4514 = vmatpush3.bf16.msra.mxu1 %v5305_v59  ;;  %4268 = vmatprep.mubr.msk.f32.mxu1 %vm4853_vm0, %v4852_v8 }
0x1e69   :  { %4515 = vmatprep.subr.bf16.mxu1 %v4851_v3 }
0x1e6c   :  { %4517 = vmatpush3.bf16.msra.mxu1 %v5324_v20 }
0x1e6d   :  { %v2758_v56 = vpop.permute.xlu1 %2757  ;;  %4524 = vmatprep.subr.bf16.mxu1 %v4851_v3 }
0x1e6e   :  { %4258 = vmatmul.mubr.msk.f32.vlgmr.msra.gmra.mrb[28].mxu0 %vm143_vm2, %v2758_v56 }
0x1e6f   :  { %4520 = vmatpush3.bf16.msra.mxu0 %v5334_v6  ;;  %4279 = vmatprep.mubr.msk.f32.mxu0 %vm4853_vm0, %v4852_v8 }
0x1e70   :  { %4521 = vmatprep.subr.bf16.mxu0 %v4851_v3 }
0x1e73   :  { %4523 = vmatpush3.bf16.msra.mxu0 %v5349_v17 }
0x1e74   :  { %4530 = vmatprep.subr.bf16.mxu0 %v4851_v3 }
0x1f3a   :  { %v2747_v58 = vpop.f32.mrb[24].mxu1 }
0x1f3b   :  { %v2752_v60 = vrot.slane %v2747_v58, 2  ;;  %v4248_v61 = vpop.f32.mrb[25].mxu1 }
0x1f3d   :  { %v2754_v62 = vadd.f32 %v2752_v60, %v5422_v44 }
0x1f3f   :  { %4747 = vtanh.f32 %v2754_v62  ;;  %v3818_v10 = vmul.f32 -1.442695, %v2754_v62 }
0x1f41   :  { %v2827_v0 = vpop.f32.mrb[28].mxu0 }
0x1f42   :  { %v2831_v1 = vadd.f32 %v2827_v0, %v5429_v53  ;;  %v4259_v2 = vpop.f32.mrb[29].mxu0 }
0x1f44   :  { %4749 = vtanh.f32 %v2831_v1  ;;  %v3819_v30 = vmul.f32 -1.442695, %v2831_v1 }
0x1f45   :  { %4751 = vpow2.f32 %v3818_v10 }
0x1f46   :  { %4753 = vpow2.f32 %v3819_v30 }
0x1f49   :  { %v4748_v39 = vpop.eup %4747 }
0x1f4a   :  { %2844 = vrot.lane.b32.xlu0 %v4748_v39, %s4854_s4 }
0x1f4e   :  { %v4750_v5 = vpop.eup %4749 }
0x1f4f   :  { %2871 = vrot.lane.b32.xlu1 %v4750_v5, %s4854_s4  ;;  %v4752_v12 = vpop.eup %4751 }
0x1f50   :  { %v2835_v13 = vadd.f32 1.0, %v4752_v12  ;;  %v4754_v14 = vpop.eup %4753 }
0x1f51   :  { %v2862_v44 = vadd.f32 1.0, %v4754_v14 }
0x1f52   :  { %4755 = vrcp.f32 %v2835_v13 }
0x1f53   :  { %4757 = vrcp.f32 %v2862_v44 }
0x1f5c   :  { %v4756_v18 = vpop.eup %4755 }
0x1f5d   :  { %v4758_v19 = vpop.eup %4757  ;;  %v2842_v15 = vmul.f32 %v4756_v18, %v2840_v55 }
0x1f5e   :  { %v2869_v22 = vmul.f32 %v4758_v19, %v2867_v63 }
0x1fbc   :  { %v2845_v53 = vpop.permute.xlu0 %2844 }
0x1fbd   :  { %v2847_v32 = vmul.f32 %v4756_v18, %v2845_v53 }
0x1fbf   :  { %2849 = vrot.lane.b32.xlu0 %v2847_v32, %s4855_s14 }
0x1fc1   :  { %v2872_v57 = vpop.permute.xlu1 %2871 }
0x1fc2   :  { %v2874_v34 = vmul.f32 %v4758_v19, %v2872_v57 }
0x1fc4   :  { %2876 = vrot.lane.b32.xlu1 %v2874_v34, %s4855_s14 }
0x2031   :  { %v2850_v4 = vpop.permute.xlu0 %2849 }
0x2032   :  { %v5531_v40 = vadd.f32 %v2850_v4, %v2842_v15 }
0x2034   :  { %4759 = vtanh.f32 %v5531_v40  ;;  %v3050_v1 = vrot.slane %v5531_v40, 6 }
0x2036   :  { %v2877_v9 = vpop.permute.xlu1 %2876 }
0x2037   :  { %v5535_v21 = vadd.f32 %v2877_v9, %v2869_v22 }
0x2039   :  { %4761 = vtanh.f32 %v5535_v21  ;;  %v3077_v10 = vrot.slane %v5535_v21, 2 }
0x203e   :  { %v4760_v36 = vpop.eup %4759 }
0x203f   :  { %2855 = vrot.lane.b32.xlu0 %v4760_v36, %s4854_s4 }
0x2043   :  { %v4762_v25 = vpop.eup %4761 }
0x2044   :  { %2882 = vrot.lane.b32.xlu1 %v4762_v25, %s4854_s4 }
0x20b1   :  { %v2856_v27 = vpop.permute.xlu0 %2855 }
0x20b2   :  { %v2858_v28 = vmul.f32 %v4756_v18, %v2856_v27 }
0x20b4   :  { %v2887_v16 = vrot.slane %v2858_v28, 6 }
0x20b6   :  { %2888 = vrot.lane.b32.xlu0 %v2887_v16, %s4855_s14  ;;  %v2883_v29 = vpop.permute.xlu1 %2882 }
0x20b7   :  { %v2885_v31 = vmul.f32 %v4758_v19, %v2883_v29 }
0x20b9   :  { %2964 = vrot.lane.b32.xlu1 %v2885_v31, %s4855_s14 }
0x2128   :  { %v2889_v33 = vpop.permute.xlu0 %2888 }
0x2129   :  { %4269 = vmatmul.mubr.msk.f32.vlgmr.msra.gmra.mrb[26].mxu1 %vm143_vm2, %v2889_v33 }
0x212a   :  { %4526 = vmatpush3.bf16.msra.mxu1 %v5305_v59  ;;  %4290 = vmatprep.mubr.msk.f32.mxu1 %vm4853_vm0, %v4852_v8 }
0x212b   :  { %v2965_v35 = vpop.permute.xlu1 %2964  ;;  %4527 = vmatprep.subr.bf16.mxu1 %v4851_v3 }
0x212c   :  { %4280 = vmatmul.mubr.msk.f32.vlgmr.msra.gmra.mrb[30].mxu0 %vm143_vm2, %v2965_v35 }
0x212d   :  { %4532 = vmatpush3.bf16.msra.mxu0 %v5334_v6  ;;  %4301 = vmatprep.mubr.msk.f32.mxu0 %vm4853_vm0, %v4852_v8 }
0x212e   :  { %4529 = vmatpush3.bf16.msra.mxu1 %v5324_v20  ;;  %4533 = vmatprep.subr.bf16.mxu0 %v4851_v3 }
0x212f   :  { %4536 = vmatprep.subr.bf16.mxu1 %v4851_v3 }
0x2131   :  { %4535 = vmatpush3.bf16.msra.mxu0 %v5349_v17 }
0x2132   :  { %4542 = vmatprep.subr.bf16.mxu0 %v4851_v3 }
0x21fc   :  { %v2958_v37 = vpop.f32.mrb[26].mxu1 }
0x21fd   :  { %v2962_v38 = vadd.f32 %v2958_v37, %v5427_v51  ;;  %v4270_v41 = vpop.f32.mrb[27].mxu1 }
0x21ff   :  { %4763 = vtanh.f32 %v2962_v38  ;;  %v3034_v42 = vpop.f32.mrb[30].mxu0  ;;  %v3822_v52 = vmul.f32 -1.442695, %v2962_v38 }
0x2200   :  { %v3039_v43 = vrot.slane %v3034_v42, 2  ;;  %v4281_v45 = vpop.f32.mrb[31].mxu0 }
0x2202   :  { %v3041_v48 = vadd.f32 %v3039_v43, %v5424_v47 }
0x2204   :  { %4765 = vtanh.f32 %v3041_v48  ;;  %v3823_v24 = vmul.f32 -1.442695, %v3041_v48 }
0x2205   :  { %4767 = vpow2.f32 %v3822_v52 }
0x2206   :  { %4769 = vpow2.f32 %v3823_v24 }
0x2209   :  { %v4764_v49 = vpop.eup %4763 }
0x220a   :  { %3054 = vrot.lane.b32.xlu0 %v4764_v49, %s4854_s4 }
0x220e   :  { %v4766_v50 = vpop.eup %4765 }
0x220f   :  { %3081 = vrot.lane.b32.xlu1 %v4766_v50, %s4854_s4  ;;  %v4768_v23 = vpop.eup %4767 }
0x2210   :  { %v3045_v26 = vadd.f32 1.0, %v4768_v23  ;;  %v4770_v54 = vpop.eup %4769 }
0x2211   :  { %v3072_v7 = vadd.f32 1.0, %v4770_v54 }
0x2212   :  { %4771 = vrcp.f32 %v3045_v26 }
0x2213   :  { %4773 = vrcp.f32 %v3072_v7 }
0x221c   :  { %v4772_v56 = vpop.eup %4771 }
0x221d   :  { %v4774_v61 = vpop.eup %4773  ;;  %v3052_v2 = vmul.f32 %v4772_v56, %v3050_v1 }
0x221e   :  { %v3079_v30 = vmul.f32 %v4774_v61, %v3077_v10 }
0x227c   :  { %v3055_v58 = vpop.permute.xlu0 %3054 }
0x227d   :  { %v3057_v60 = vmul.f32 %v4772_v56, %v3055_v58 }
0x227f   :  { %3059 = vrot.lane.b32.xlu0 %v3057_v60, %s4855_s14 }
0x2281   :  { %v3082_v62 = vpop.permute.xlu1 %3081 }
0x2282   :  { %v3084_v0 = vmul.f32 %v4774_v61, %v3082_v62 }
0x2284   :  { %3086 = vrot.lane.b32.xlu1 %v3084_v0, %s4855_s14 }
0x22f1   :  { %v3060_v39 = vpop.permute.xlu0 %3059 }
0x22f2   :  { %v5563_v5 = vadd.f32 %v3060_v39, %v3052_v2 }
0x22f4   :  { %4775 = vtanh.f32 %v5563_v5  ;;  %v3263_v48 = vrot.slane %v5563_v5, 6 }
0x22f6   :  { %v3087_v12 = vpop.permute.xlu1 %3086 }
0x22f7   :  { %v5567_v13 = vadd.f32 %v3087_v12, %v3079_v30 }
0x22f9   :  { %4777 = vtanh.f32 %v5567_v13  ;;  %v3290_v24 = vrot.slane %v5567_v13, 2 }
0x22fe   :  { %v4776_v14 = vpop.eup %4775 }
0x22ff   :  { %3065 = vrot.lane.b32.xlu0 %v4776_v14, %s4854_s4 }
0x2303   :  { %v4778_v44 = vpop.eup %4777 }
0x2304   :  { %3092 = vrot.lane.b32.xlu1 %v4778_v44, %s4854_s4 }
0x2371   :  { %v3066_v18 = vpop.permute.xlu0 %3065 }
0x2372   :  { %v3068_v53 = vmul.f32 %v4772_v56, %v3066_v18 }
0x2374   :  { %3097 = vrot.lane.b32.xlu0 %v3068_v53, %s4855_s14 }
0x2376   :  { %v3093_v32 = vpop.permute.xlu1 %3092 }
0x2377   :  { %v3095_v19 = vmul.f32 %v4774_v61, %v3093_v32 }
0x2379   :  { %v3176_v57 = vrot.slane %v3095_v19, 6 }
0x237b   :  { %3177 = vrot.lane.b32.xlu1 %v3176_v57, %s4855_s14 }
0x23e6   :  { %v3098_v34 = vpop.permute.xlu0 %3097 }
0x23e7   :  { %4291 = vmatmul.mubr.msk.f32.vlgmr.msra.gmra.mrb[28].mxu1 %vm143_vm2, %v3098_v34 }
0x23e8   :  { %4538 = vmatpush3.bf16.msra.mxu1 %v5305_v59  ;;  %4312 = vmatprep.mubr.msk.f32.mxu1 %vm4853_vm0, %v4852_v8 }
0x23e9   :  { %4539 = vmatprep.subr.bf16.mxu1 %v4851_v3 }
0x23ec   :  { %4541 = vmatpush3.bf16.msra.mxu1 %v5324_v20 }
0x23ed   :  { %v3178_v55 = vpop.permute.xlu1 %3177  ;;  %4548 = vmatprep.subr.bf16.mxu1 %v4851_v3 }
0x23ee   :  { %4302 = vmatmul.mubr.msk.f32.vlgmr.msra.gmra.mrb[32].mxu0 %vm143_vm2, %v3178_v55 }
0x23ef   :  { %4544 = vmatpush3.bf16.msra.mxu0 %v5334_v6  ;;  %4323 = vmatprep.mubr.msk.f32.mxu0 %vm4853_vm0, %v4852_v8 }
0x23f0   :  { %4545 = vmatprep.subr.bf16.mxu0 %v4851_v3 }
0x23f3   :  { %4547 = vmatpush3.bf16.msra.mxu0 %v5349_v17 }
0x23f4   :  { %4554 = vmatprep.subr.bf16.mxu0 %v4851_v3 }
0x24ba   :  { %v3167_v15 = vpop.f32.mrb[28].mxu1 }
0x24bb   :  { %v3172_v4 = vrot.slane %v3167_v15, 6  ;;  %v4292_v40 = vpop.f32.mrb[29].mxu1 }
0x24bd   :  { %v3174_v63 = vadd.f32 %v3172_v4, %v5427_v51 }
0x24bf   :  { %4779 = vtanh.f32 %v3174_v63  ;;  %v3826_v28 = vmul.f32 -1.442695, %v3174_v63 }
0x24c1   :  { %v3247_v22 = vpop.f32.mrb[32].mxu0 }
0x24c2   :  { %v3252_v9 = vrot.slane %v3247_v22, 4  ;;  %v4303_v21 = vpop.f32.mrb[33].mxu0 }
0x24c4   :  { %v3254_v36 = vadd.f32 %v3252_v9, %v5424_v47 }
0x24c6   :  { %4781 = vtanh.f32 %v3254_v36  ;;  %v3827_v16 = vmul.f32 -1.442695, %v3254_v36 }
0x24c7   :  { %4783 = vpow2.f32 %v3826_v28 }
0x24c8   :  { %4785 = vpow2.f32 %v3827_v16 }
0x24c9   :  { %v4780_v25 = vpop.eup %4779 }
0x24ca   :  { %3267 = vrot.lane.b32.xlu0 %v4780_v25, %s4854_s4 }
0x24d0   :  { %v4782_v27 = vpop.eup %4781 }
0x24d1   :  { %3294 = vrot.lane.b32.xlu1 %v4782_v27, %s4854_s4  ;;  %v4784_v29 = vpop.eup %4783 }
0x24d2   :  { %v3258_v31 = vadd.f32 1.0, %v4784_v29  ;;  %v4786_v33 = vpop.eup %4785 }
0x24d3   :  { %v3285_v35 = vadd.f32 1.0, %v4786_v33 }
0x24d4   :  { %4787 = vrcp.f32 %v3258_v31 }
0x24d5   :  { %4789 = vrcp.f32 %v3285_v35 }
0x24de   :  { %v4788_v37 = vpop.eup %4787 }
0x24df   :  { %v4790_v42 = vpop.eup %4789  ;;  %v3265_v49 = vmul.f32 %v4788_v37, %v3263_v48 }
0x24e0   :  { %v3292_v23 = vmul.f32 %v4790_v42, %v3290_v24 }
0x253c   :  { %v3268_v38 = vpop.permute.xlu0 %3267 }
0x253d   :  { %v3270_v41 = vmul.f32 %v4788_v37, %v3268_v38 }
0x253f   :  { %3272 = vrot.lane.b32.xlu0 %v3270_v41, %s4855_s14 }
0x2543   :  { %v3295_v43 = vpop.permute.xlu1 %3294 }
0x2544   :  { %v3297_v45 = vmul.f32 %v4790_v42, %v3295_v43 }
0x2546   :  { %3299 = vrot.lane.b32.xlu1 %v3297_v45, %s4855_s14 }
0x25b1   :  { %v3273_v50 = vpop.permute.xlu0 %3272 }
0x25b2   :  { %v5595_v52 = vadd.f32 %v3273_v50, %v3265_v49 }
0x25b4   :  { %4791 = vtanh.f32 %v5595_v52  ;;  %v3477_v40 = vrot.slane %v5595_v52, 6 }
0x25b8   :  { %v3300_v26 = vpop.permute.xlu1 %3299 }
0x25b9   :  { %v5599_v54 = vadd.f32 %v3300_v26, %v3292_v23 }
0x25bb   :  { %4793 = vtanh.f32 %v5599_v54  ;;  %v3504_v21 = vrot.slane %v5599_v54, 2 }
0x25be   :  { %v4792_v7 = vpop.eup %4791 }
0x25bf   :  { %3278 = vrot.lane.b32.xlu0 %v4792_v7, %s4854_s4 }
0x25c5   :  { %v4794_v56 = vpop.eup %4793 }
0x25c6   :  { %3305 = vrot.lane.b32.xlu1 %v4794_v56, %s4854_s4 }
0x2631   :  { %v3279_v58 = vpop.permute.xlu0 %3278 }
0x2632   :  { %v3281_v60 = vmul.f32 %v4788_v37, %v3279_v58 }
0x2634   :  { %v3310_v61 = vrot.slane %v3281_v60, 2 }
0x2636   :  { %3311 = vrot.lane.b32.xlu0 %v3310_v61, %s4855_s14 }
0x2638   :  { %v3306_v62 = vpop.permute.xlu1 %3305 }
0x2639   :  { %v3308_v0 = vmul.f32 %v4790_v42, %v3306_v62 }
0x263b   :  { %v3390_v1 = vrot.slane %v3308_v0, 4 }
0x263d   :  { %3391 = vrot.lane.b32.xlu1 %v3390_v1, %s4855_s14 }
0x26a8   :  { %v3312_v2 = vpop.permute.xlu0 %3311 }
0x26a9   :  { %4313 = vmatmul.mubr.msk.f32.vlgmr.msra.gmra.mrb[30].mxu1 %vm143_vm2, %v3312_v2 }
0x26aa   :  { %4550 = vmatpush3.bf16.msra.mxu1 %v5305_v59  ;;  %4334 = vmatprep.mubr.msk.f32.mxu1 %vm4853_vm0, %v4852_v8 }
0x26ab   :  { %4551 = vmatprep.subr.bf16.mxu1 %v4851_v3 }
0x26ae   :  { %4553 = vmatpush3.bf16.msra.mxu1 %v5324_v20 }
0x26af   :  { %v3392_v39 = vpop.permute.xlu1 %3391 }
0x26b0   :  { %4324 = vmatmul.mubr.msk.f32.vlgmr.msra.gmra.mrb[34].mxu0 %vm143_vm2, %v3392_v39 }
0x26b1   :  { %4556 = vmatpush3.bf16.msra.mxu0 %v5334_v6  ;;  %4345 = vmatprep.mubr.msk.f32.mxu0 %vm4853_vm0, %v4852_v8 }
0x26b2   :  { %4557 = vmatprep.subr.bf16.mxu0 %v4851_v3 }
0x26b5   :  { %4559 = vmatpush3.bf16.msra.mxu0 %v5349_v17 }
0x277c   :  { %v3381_v59 = vpop.f32.mrb[30].mxu1 }
0x277d   :  { %v3386_v5 = vrot.slane %v3381_v59, 4  ;;  %v4314_v10 = vpop.f32.mrb[31].mxu1 }
0x277f   :  { %v3388_v30 = vadd.f32 %v3386_v5, %v5427_v51 }
0x2781   :  { %4795 = vtanh.f32 %v3388_v30  ;;  %v3830_v3 = vmul.f32 -1.442695, %v3388_v30 }
0x2783   :  { %v3461_v12 = vpop.f32.mrb[34].mxu0 }
0x2784   :  { %v3466_v20 = vrot.slane %v3461_v12, 6  ;;  %v4325_v13 = vpop.f32.mrb[35].mxu0 }
0x2786   :  { %v3468_v14 = vadd.f32 %v3466_v20, %v5424_v47 }
0x2788   :  { %4797 = vtanh.f32 %v3468_v14  ;;  %v3831_v17 = vmul.f32 -1.442695, %v3468_v14 }
0x2789   :  { %4799 = vpow2.f32 %v3830_v3 }
0x278a   :  { %4801 = vpow2.f32 %v3831_v17 }
0x278b   :  { %v4796_v6 = vpop.eup %4795 }
0x278c   :  { %3481 = vrot.lane.b32.xlu0 %v4796_v6, %s4854_s4 }
0x2792   :  { %v4798_v8 = vpop.eup %4797 }
0x2793   :  { %3508 = vrot.lane.b32.xlu1 %v4798_v8, %s4854_s4  ;;  %v4800_v44 = vpop.eup %4799  ;;  %v3739_v8 = vrot.slane %v5340_v11, 2 }
0x2794   :  { %v3472_v18 = vadd.f32 1.0, %v4800_v44  ;;  %v4802_v53 = vpop.eup %4801 }
0x2795   :  { %v3499_v32 = vadd.f32 1.0, %v4802_v53 }
0x2796   :  { %4803 = vrcp.f32 %v3472_v18 }
0x2797   :  { %4805 = vrcp.f32 %v3499_v32 }
0x27a0   :  { %v4804_v19 = vpop.eup %4803 }
0x27a1   :  { %v4806_v55 = vpop.eup %4805  ;;  %v3479_v63 = vmul.f32 %v4804_v19, %v3477_v40 }
0x27a2   :  { %v3506_v36 = vmul.f32 %v4806_v55, %v3504_v21 }
0x27fe   :  { %v3482_v57 = vpop.permute.xlu0 %3481 }
0x27ff   :  { %v3484_v34 = vmul.f32 %v4804_v19, %v3482_v57 }
0x2801   :  { %3486 = vrot.lane.b32.xlu0 %v3484_v34, %s4855_s14 }
0x2805   :  { %v3509_v15 = vpop.permute.xlu1 %3508 }
0x2806   :  { %v3511_v4 = vmul.f32 %v4806_v55, %v3509_v15 }
0x2808   :  { %3513 = vrot.lane.b32.xlu1 %v3511_v4, %s4855_s14 }
0x2873   :  { %v3487_v22 = vpop.permute.xlu0 %3486 }
0x2874   :  { %v3489_v9 = vadd.f32 %v3487_v22, %v3479_v63 }
0x2876   :  { %4807 = vtanh.f32 %v3489_v9  ;;  %v3688_v39 = vrot.slane %v3489_v9, 6 }
0x287a   :  { %v3514_v25 = vpop.permute.xlu1 %3513 }
0x287b   :  { %v3516_v27 = vadd.f32 %v3514_v25, %v3506_v36 }
0x287d   :  { %4809 = vtanh.f32 %v3516_v27  ;;  %v3715_v30 = vrot.slane %v3516_v27, 2 }
0x2880   :  { %v4808_v28 = vpop.eup %4807 }
0x2881   :  { %3492 = vrot.lane.b32.xlu0 %v4808_v28, %s4854_s4 }
0x2887   :  { %v4810_v16 = vpop.eup %4809 }
0x2888   :  { %3519 = vrot.lane.b32.xlu1 %v4810_v16, %s4854_s4 }
0x28f3   :  { %v3493_v29 = vpop.permute.xlu0 %3492 }
0x28f4   :  { %v3495_v31 = vmul.f32 %v4804_v19, %v3493_v29 }
0x28f6   :  { %v3524_v33 = vrot.slane %v3495_v31, 4 }
0x28f8   :  { %3525 = vrot.lane.b32.xlu0 %v3524_v33, %s4855_s14 }
0x28fa   :  { %v3520_v35 = vpop.permute.xlu1 %3519 }
0x28fb   :  { %v3522_v37 = vmul.f32 %v4806_v55, %v3520_v35 }
0x28fd   :  { %v3604_v38 = vrot.slane %v3522_v37, 2 }
0x28ff   :  { %3605 = vrot.lane.b32.xlu1 %v3604_v38, %s4855_s14 }
0x296a   :  { %v3526_v41 = vpop.permute.xlu0 %3525 }
0x296b   :  { %4335 = vmatmul.mubr.msk.f32.vlgmr.msra.gmra.mrb[32].mxu1 %vm143_vm2, %v3526_v41 }
0x2971   :  { %v3606_v42 = vpop.permute.xlu1 %3605 }
0x2972   :  { %4346 = vmatmul.mubr.msk.f32.vlgmr.msra.gmra.mrb[36].mxu0 %vm143_vm2, %v3606_v42 }
0x2a3e   :  { %v3595_v43 = vpop.f32.mrb[32].mxu1 }
0x2a3f   :  { %v3600_v45 = vrot.slane %v3595_v43, 2  ;;  %v4336_v48 = vpop.f32.mrb[33].mxu1 }
0x2a41   :  { %v3602_v49 = vadd.f32 %v3600_v45, %v5427_v51 }
0x2a43   :  { %4811 = vtanh.f32 %v3602_v49  ;;  %v3834_v54 = vmul.f32 -1.442695, %v3602_v49 }
0x2a45   :  { %v3675_v50 = vpop.f32.mrb[36].mxu0 }
0x2a46   :  { %v3679_v52 = vadd.f32 %v3675_v50, %v5424_v47  ;;  %v4347_v24 = vpop.f32.mrb[37].mxu0 }
0x2a48   :  { %4813 = vtanh.f32 %v3679_v52  ;;  %v3835_v7 = vmul.f32 -1.442695, %v3679_v52 }
0x2a49   :  { %4815 = vpow2.f32 %v3834_v54 }
0x2a4a   :  { %4817 = vpow2.f32 %v3835_v7 }
0x2a4d   :  { %v4812_v23 = vpop.eup %4811 }
0x2a4e   :  { %3692 = vrot.lane.b32.xlu0 %v4812_v23, %s4854_s4 }
0x2a52   :  { %v4814_v26 = vpop.eup %4813 }
0x2a53   :  { %3719 = vrot.lane.b32.xlu1 %v4814_v26, %s4854_s4  ;;  %v4816_v56 = vpop.eup %4815 }
0x2a54   :  { %v3683_v58 = vadd.f32 1.0, %v4816_v56  ;;  %v4818_v60 = vpop.eup %4817 }
0x2a55   :  { %v3710_v51 = vadd.f32 1.0, %v4818_v60 }
0x2a56   :  { %4819 = vrcp.f32 %v3683_v58 }
0x2a57   :  { %4821 = vrcp.f32 %v3710_v51 }
0x2a60   :  { %v4820_v61 = vpop.eup %4819 }
0x2a61   :  { %v4822_v0 = vpop.eup %4821  ;;  %v3690_v59 = vmul.f32 %v4820_v61, %v3688_v39 }
0x2a62   :  { %v3717_v12 = vmul.f32 %v4822_v0, %v3715_v30 }
0x2ac0   :  { %v3693_v47 = vpop.permute.xlu0 %3692 }
0x2ac1   :  { %v3695_v62 = vmul.f32 %v4820_v61, %v3693_v47 }
0x2ac3   :  { %3697 = vrot.lane.b32.xlu0 %v3695_v62, %s4855_s14 }
0x2ac5   :  { %v3720_v1 = vpop.permute.xlu1 %3719 }
0x2ac6   :  { %v3722_v2 = vmul.f32 %v4822_v0, %v3720_v1 }
0x2ac8   :  { %3724 = vrot.lane.b32.xlu1 %v3722_v2, %s4855_s14 }
0x2b35   :  { %v3698_v5 = vpop.permute.xlu0 %3697 }
0x2b36   :  { %v3700_v10 = vadd.f32 %v3698_v5, %v3690_v59 }
0x2b38   :  { %4823 = vtanh.f32 %v3700_v10 }
0x2b3a   :  { %v3725_v20 = vpop.permute.xlu1 %3724 }
0x2b3b   :  { %v3727_v13 = vadd.f32 %v3725_v20, %v3717_v12 }
0x2b3d   :  { %4825 = vtanh.f32 %v3727_v13 }
0x2b42   :  { %v4824_v14 = vpop.eup %4823 }
0x2b43   :  { %3703 = vrot.lane.b32.xlu0 %v4824_v14, %s4854_s4 }
0x2b47   :  { %v4826_v6 = vpop.eup %4825  ;;  %3735 = vrot.lane.b32.xlu0 %v5371_v46, %s4855_s14 }
0x2b48   :  { %3730 = vrot.lane.b32.xlu1 %v4826_v6, %s4854_s4 }
0x2b4c   :  { %3740 = vrot.lane.b32.xlu1 %v3739_v8, %s4854_s4  ;;  %s4827_s4 = scalar_lea.vmem %s3763_s15, 32 }
0x2b4d   :  { %p4828_p0 = scmp.ne.s32.totalorder %s3763_s15, %s4827_s4  ;;  %p4833_p2 = scmp.lt.s32.totalorder %s4827_s4, %s4827_s4 }
0x2b4f   :  { %p4834_p3 = por %p4833_p2, %p4832_p1 }
0x2b51   :  { %p4835_p4 = pnand %p4834_p3, %p4828_p0 }
0x2bb5   :  { %v3704_v3 = vpop.permute.xlu0 %3703 }
0x2bb6   :  { %v3706_v17 = vmul.f32 %v4820_v61, %v3704_v3 }
0x2bb8   :  { %3744 = vrot.lane.b32.xlu0 %v3706_v17, %s4856_s8 }
0x2bb9   :  { %v3736_v18 = vpop.permute.xlu0 %3735 }
0x2bba   :  { %v3731_v44 = vpop.permute.xlu1 %3730 }
0x2bbb   :  { %v3733_v53 = vmul.f32 %v4822_v0, %v3731_v44 }
0x2bbd   :  { %v3748_v19 = vrot.slane %v3733_v53, 2 }
0x2bbe   :  { %v3741_v32 = vpop.permute.xlu1 %3740 }
0x2bbf   :  { %v3750_v46 = vsel %vm143_vm2, %v3736_v18, %v3741_v32 }
0x2c2a   :  { %v3745_v57 = vpop.permute.xlu0 %3744 }
0x2c2b   :  { %v3752_v34 = vsel %vm3751_vm6, %v3750_v46, %v3745_v57 }
0x2c2c   :  { %v3754_v11 = vsel %vm3753_vm7, %v3752_v34, %v3748_v19 }
0x2c2d   :  { %3755 = vst [vmem:[#allocation2 - $0x6] sm:$0xc0] %v3754_v11 }
0x2c2e   :  { %4838 = shalt.err (!%p4835_p4)
}
0x2c2f   :  { %s4839_s17 = scalar_lea.hbm %s5666_s9, 32 }
0x2c30   :  { %p4840_p5 = scmp.ne.s32.totalorder %s5666_s9, %s4839_s17  ;;  %p4843_p6 = scmp.lt.u32.totalorder %s4839_s17, %s5666_s9 }
0x2c32   :  { %p4845_p7 = pnand %p4843_p6, %p4840_p5 }
0x2c34   :  { %4848 = shalt.err (!%p4845_p7)
}
0x2c35   :  { %3765 = dma.vmem_to_hbm [thread:$0]  %s3763_s15, 32, %s5666_s9, [#allocation3]  }
0x2c36   :  { %4849 = dma.done.wait [#allocation3], 32  }
0x2c37   :  { %4850 = vsyncadd [#allocation3], 4294967264 }
0x2c38   :  { %3769 = vsyncpa [#allocation3], 1 }

</bundles_post_ra>
